<compile_context>
chip_gen: v7x
topology: tpu7x:2x2x1
jax: 0.10.0
libtpu: 0.0.40
codegen_flags: <defaults>
</compile_context>

<pallas_src>
import functools

import jax
import jax.numpy as jnp
from jax import lax
from jax.experimental import pallas as pl
from jax.experimental.pallas import tpu as pltpu


# ------------------------------ small helpers --------------------------------

def _round_up(x, m):
    return ((x + m - 1) // m) * m


def _pick_tile_m(m, cap=512):
    """Largest multiple-of-8 divisor of m that is <= min(cap, m//2) (so >=2 grid blocks)."""
    limit = min(cap, m // 2)
    for t in range(limit - limit % 8, 7, -8):
        if m % t == 0:
            return t
    return m


# --------------- direct 3x3 stride-1 conv + fused BN-stats kernel ------------

def _conv3x3_s1_kernel(x_ref, w_ref, y_ref, stat_ref, *, H, W):
    """Per-image 3x3/stride-1 conv: 9 shifted-tap matmuls accumulated in f32 in VMEM."""
    x = x_ref[0]                                   # (H+2, W+2, C) bf16, zero borders
    C = x.shape[-1]
    opad = w_ref.shape[-1]
    acc = jnp.zeros((H * W, opad), jnp.float32)
    for t in range(9):
        di, dj = t // 3, t % 3
        xt = x[di:di + H, dj:dj + W, :].reshape(H * W, C)
        acc = acc + jnp.dot(xt, w_ref[t], preferred_element_type=jnp.float32)
    y_ref[0] = acc.astype(y_ref.dtype)
    s1 = jnp.sum(acc, axis=0, keepdims=True)
    s2 = jnp.sum(acc * acc, axis=0, keepdims=True)
    stat_ref[0] = jnp.concatenate(
        [s1, s2, jnp.zeros((6, opad), jnp.float32)], axis=0)   # single (8, Opad) store


def conv3x3_s1_bn_stats(x_pad, w_taps):
    """x_pad: (N, H+2, W+2, C) bf16 zero-padded; w_taps: (9, C, Opad) bf16.

    Returns y (N, H*W, Opad) bf16 and stats (8, Opad) f32 = [col sum; col sum-of-squares].
    """
    N, Hp, Wp, C = x_pad.shape
    H, W = Hp - 2, Wp - 2
    T, C2, opad = w_taps.shape
    assert T == 9 and C2 == C
    M = H * W
    y, stats = pl.pallas_call(
        functools.partial(_conv3x3_s1_kernel, H=H, W=W),
        out_shape=(jax.ShapeDtypeStruct((N, M, opad), jnp.bfloat16),
                   jax.ShapeDtypeStruct((N, 8, opad), jnp.float32)),
        grid_spec=pltpu.PrefetchScalarGridSpec(
            num_scalar_prefetch=0,
            grid=(N,),
            in_specs=[pl.BlockSpec((1, Hp, Wp, C), lambda n: (n, 0, 0, 0)),
                      pl.BlockSpec((9, C, opad), lambda n: (0, 0, 0))],
            out_specs=[pl.BlockSpec((1, M, opad), lambda n: (n, 0, 0)),
                       pl.BlockSpec((1, 8, opad), lambda n: (n, 0, 0))]),
        compiler_params=pltpu.CompilerParams(
            dimension_semantics=("parallel",),
            vmem_limit_bytes=64 * 1024 * 1024),
    )(x_pad, w_taps)
    return y, jnp.sum(stats, axis=0)


# --------------- im2col matmul + fused BN-stats (stride != 1 conv1) ----------

def _matmul_bn_kernel(a_ref, b_ref, y_ref, stat_ref):
    acc = jnp.dot(a_ref[...], b_ref[...], preferred_element_type=jnp.float32)
    y_ref[...] = acc.astype(y_ref.dtype)
    s1 = jnp.sum(acc, axis=0, keepdims=True)
    s2 = jnp.sum(acc * acc, axis=0, keepdims=True)
    stat_ref[0] = jnp.concatenate(
        [s1, s2, jnp.zeros((6, acc.shape[-1]), jnp.float32)], axis=0)


def matmul_bn_stats(a, b, tm_cap=512):
    """(M, K) bf16 x (K, Opad) bf16 -> y (M, Opad) bf16, stats (8, Opad) f32."""
    M, K = a.shape
    K2, opad = b.shape
    assert K == K2
    tm = _pick_tile_m(M, tm_cap)
    mb = M // tm
    y, stats = pl.pallas_call(
        _matmul_bn_kernel,
        out_shape=(jax.ShapeDtypeStruct((M, opad), jnp.bfloat16),
                   jax.ShapeDtypeStruct((mb, 8, opad), jnp.float32)),
        grid_spec=pltpu.PrefetchScalarGridSpec(
            num_scalar_prefetch=0,
            grid=(mb,),
            in_specs=[pl.BlockSpec((tm, K), lambda i: (i, 0)),
                      pl.BlockSpec((K, opad), lambda i: (0, 0))],
            out_specs=[pl.BlockSpec((tm, opad), lambda i: (i, 0)),
                       pl.BlockSpec((1, 8, opad), lambda i: (i, 0, 0))]),
        compiler_params=pltpu.CompilerParams(
            dimension_semantics=("parallel",),
            vmem_limit_bytes=64 * 1024 * 1024),
    )(a, b)
    return y, jnp.sum(stats, axis=0)


# --------------- fused BN / residual / ReLU (+ zero-padding) kernels ----------

def _bn_relu_pad_kernel(y_ref, sc_ref, sh_ref, o_ref, *, H, W):
    P = o_ref.shape[-1]
    y = y_ref[0][:, :P].astype(jnp.float32)                     # valid conv columns
    v = jnp.maximum(y * sc_ref[...] + sh_ref[...], 0.0)
    o_ref[...] = jnp.zeros(o_ref.shape, o_ref.dtype)            # zero halo for next conv
    o_ref[0, 1:H + 1, 1:W + 1, :] = v.reshape(H, W, P).astype(o_ref.dtype)


def bn_relu_pad(y, scale, shift, N, H, W):
    """relu(y*scale + shift) emitted directly as a zero-padded bf16 NHWC image."""
    P = scale.shape[0]
    opad = y.shape[-1]
    return pl.pallas_call(
        functools.partial(_bn_relu_pad_kernel, H=H, W=W),
        out_shape=jax.ShapeDtypeStruct((N, H + 2, W + 2, P), jnp.bfloat16),
        grid_spec=pltpu.PrefetchScalarGridSpec(
            num_scalar_prefetch=0,
            grid=(N,),
            in_specs=[pl.BlockSpec((1, H * W, opad), lambda n: (n, 0, 0)),
                      pl.BlockSpec((1, P), lambda n: (0, 0)),
                      pl.BlockSpec((1, P), lambda n: (0, 0))],
            out_specs=pl.BlockSpec((1, H + 2, W + 2, P), lambda n: (n, 0, 0, 0))),
        compiler_params=pltpu.CompilerParams(dimension_semantics=("parallel",)),
    )(y, scale.reshape(1, P), shift.reshape(1, P))


def _bn2_add_ds_relu_pad_kernel(y2_ref, y1_ref, sc_ref, sh_ref, rsc_ref, rsh_ref,
                                o_ref, *, H, W, ds_col):
    P = o_ref.shape[-1]
    y2 = y2_ref[0][:, :P].astype(jnp.float32)
    r = y1_ref[0][:, ds_col:ds_col + P].astype(jnp.float32)     # folded downsample cols
    v = jnp.maximum(y2 * sc_ref[...] + sh_ref[...]
                    + r * rsc_ref[...] + rsh_ref[...], 0.0)
    o_ref[...] = jnp.zeros(o_ref.shape, o_ref.dtype)
    o_ref[0, 1:H + 1, 1:W + 1, :] = v.reshape(H, W, P).astype(o_ref.dtype)


def bn_add_relu_pad_ds(y2, sc, sh, y1, rsc, rsh, N, H, W, ds_col):
    P = sc.shape[0]
    o2, o1 = y2.shape[-1], y1.shape[-1]
    return pl.pallas_call(
        functools.partial(_bn2_add_ds_relu_pad_kernel, H=H, W=W, ds_col=ds_col),
        out_shape=jax.ShapeDtypeStruct((N, H + 2, W + 2, P), jnp.bfloat16),
        grid_spec=pltpu.PrefetchScalarGridSpec(
            num_scalar_prefetch=0,
            grid=(N,),
            in_specs=[pl.BlockSpec((1, H * W, o2), lambda n: (n, 0, 0)),
                      pl.BlockSpec((1, H * W, o1), lambda n: (n, 0, 0)),
                      pl.BlockSpec((1, P), lambda n: (0, 0)),
                      pl.BlockSpec((1, P), lambda n: (0, 0)),
                      pl.BlockSpec((1, P), lambda n: (0, 0)),
                      pl.BlockSpec((1, P), lambda n: (0, 0))],
            out_specs=pl.BlockSpec((1, H + 2, W + 2, P), lambda n: (n, 0, 0, 0))),
        compiler_params=pltpu.CompilerParams(dimension_semantics=("parallel",)),
    )(y2, y1, sc.reshape(1, P), sh.reshape(1, P), rsc.reshape(1, P), rsh.reshape(1, P))


def _bn2_add_id_relu_pad_kernel(y2_ref, xpad_ref, sc_ref, sh_ref, o_ref, *, H, W):
    P = o_ref.shape[-1]
    y2 = y2_ref[0][:, :P].astype(jnp.float32)
    r = xpad_ref[0, 1:H + 1, 1:W + 1, :].astype(jnp.float32).reshape(H * W, P)
    v = jnp.maximum(y2 * sc_ref[...] + sh_ref[...] + r, 0.0)    # no dead residual affine
    o_ref[...] = jnp.zeros(o_ref.shape, o_ref.dtype)
    o_ref[0, 1:H + 1, 1:W + 1, :] = v.reshape(H, W, P).astype(o_ref.dtype)


def bn_add_relu_pad_id(y2, sc, sh, x_pad, N, H, W):
    P = sc.shape[0]
    o2 = y2.shape[-1]
    return pl.pallas_call(
        functools.partial(_bn2_add_id_relu_pad_kernel, H=H, W=W),
        out_shape=jax.ShapeDtypeStruct((N, H + 2, W + 2, P), jnp.bfloat16),
        grid_spec=pltpu.PrefetchScalarGridSpec(
            num_scalar_prefetch=0,
            grid=(N,),
            in_specs=[pl.BlockSpec((1, H * W, o2), lambda n: (n, 0, 0)),
                      pl.BlockSpec((1, H + 2, W + 2, P), lambda n: (n, 0, 0, 0)),
                      pl.BlockSpec((1, P), lambda n: (0, 0)),
                      pl.BlockSpec((1, P), lambda n: (0, 0))],
            out_specs=pl.BlockSpec((1, H + 2, W + 2, P), lambda n: (n, 0, 0, 0))),
        compiler_params=pltpu.CompilerParams(dimension_semantics=("parallel",)),
    )(y2, x_pad, sc.reshape(1, P), sh.reshape(1, P))


# ------------------------------- conv / BN glue -------------------------------

def _im2col_from_padded(x_pad, stride, Ho, Wo):
    """3x3 patches at the given stride from an already zero-padded bf16 NHWC tensor."""
    # TODO(synk): strided conv1 still materializes this patch matrix in HBM via XLA.
    cols = [x_pad[:, di:di + stride * (Ho - 1) + 1:stride,
                  dj:dj + stride * (Wo - 1) + 1:stride, :]
            for di in range(3) for dj in range(3)]
    N = x_pad.shape[0]
    C = x_pad.shape[-1]
    return jnp.concatenate(cols, axis=-1).reshape(N * Ho * Wo, 9 * C)


def _bn_affine(stats, col0, m_count, gamma, beta, eps=1e-5):
    """Training-mode BatchNorm: batch mean/var from fused f32 stats -> scale / shift."""
    P = gamma.shape[0]
    s = stats[0, col0:col0 + P]
    sq = stats[1, col0:col0 + P]
    mean = s / m_count
    # single-pass E[x^2]-E[x]^2 from the f32 accumulator; clamped at 0 for safety.
    var = jnp.maximum(sq / m_count - mean * mean, 0.0)
    scale = gamma * lax.rsqrt(var + eps)
    shift = beta - mean * scale
    return scale, shift


# --------------------------------- parameters ---------------------------------

def _kaiming_conv(key, kh, kw, cin, cout):
    # kaiming_normal_(mode='fan_out', nonlinearity='relu'): std = sqrt(2/(cout*kh*kw))
    std = (2.0 / (cout * kh * kw)) ** 0.5
    return jax.random.normal(key, (kh, kw, cin, cout), jnp.float32) * std


def init_basic_block(key, inplanes, planes, stride=1):
    """BasicBlock(inplanes, planes, norm=BatchNorm2d, stride, downsample=1x1 conv + BN)."""
    k1, k2, k3 = jax.random.split(key, 3)
    w1 = _kaiming_conv(k1, 3, 3, inplanes, planes)     # HWIO
    w2 = _kaiming_conv(k2, 3, 3, planes, planes)
    ones = jnp.ones((planes,), jnp.float32)
    zeros = jnp.zeros((planes,), jnp.float32)
    has_ds = (stride != 1) or (inplanes != planes)

    raw = {'w1': w1, 'w2': w2}

    # conv1 weight (+ folded 1x1 downsample as extra output columns of the center tap),
    # output channels zero-padded to a multiple of 128 (lane-dense stores), bf16, once.
    out_cols = 2 * planes if has_ds else planes
    opad1 = _round_up(out_cols, 128)
    cols1 = jnp.zeros((9, inplanes, opad1), jnp.float32)
    cols1 = cols1.at[:, :, :planes].set(w1.reshape(9, inplanes, planes))
    if has_ds:
        wd = _kaiming_conv(k3, 1, 1, inplanes, planes)
        raw['ds_w'] = wd
        cols1 = cols1.at[4, :, planes:2 * planes].set(wd.reshape(inplanes, planes))
    if stride == 1:
        w1_k = cols1.astype(jnp.bfloat16)                           # (9, Ci, Opad) taps
    else:
        w1_k = cols1.reshape(9 * inplanes, opad1).astype(jnp.bfloat16)  # im2col matmul

    opad2 = _round_up(planes, 128)
    w2_k = jnp.zeros((9, planes, opad2), jnp.float32).at[:, :, :planes].set(
        w2.reshape(9, planes, planes)).astype(jnp.bfloat16)

    params = {'w1': w1_k, 'bn1': (ones, zeros), 'w2': w2_k, 'bn2': (ones, zeros)}
    if has_ds:
        params['ds_bn'] = (ones, zeros)
    return params, raw


# ----------------------------------- forward ----------------------------------

def basic_block_forward(params, x_pad, stride):
    """BasicBlock.forward; x_pad is a zero-padded bf16 NHWC image, output is the same."""
    N, Hp, Wp, Ci = x_pad.shape
    H, W = Hp - 2, Wp - 2
    gamma1, _ = params['bn1']
    P = gamma1.shape[0]
    has_ds = 'ds_bn' in params
    Ho = (H - 1) // stride + 1
    Wo = (W - 1) // stride + 1
    M = N * Ho * Wo

    # conv1 (3x3, stride) [+ folded 1x1 downsample columns] with fused BN stats
    if stride == 1:
        y1, st1 = conv3x3_s1_bn_stats(x_pad, params['w1'])          # (N, H*W, Opad)
    else:
        patches = _im2col_from_padded(x_pad, stride, Ho, Wo)        # (M, 9*Ci) bf16
        y1_flat, st1 = matmul_bn_stats(patches, params['w1'])
        y1 = y1_flat.reshape(N, Ho * Wo, -1)

    # BN1 + ReLU, emitted directly as the zero-padded input of conv2
    sc1, sh1 = _bn_affine(st1, 0, M, *params['bn1'])
    h1_pad = bn_relu_pad(y1, sc1, sh1, N, Ho, Wo)                   # (N, Ho+2, Wo+2, P)

    # conv2 (3x3, stride 1) with fused BN stats
    y2, st2 = conv3x3_s1_bn_stats(h1_pad, params['w2'])             # (N, Ho*Wo, Opad)
    sc2, sh2 = _bn_affine(st2, 0, M, *params['bn2'])

    # out = relu(bn2(conv2) + residual), fused; output is the padded next-block input
    if has_ds:
        rsc, rsh = _bn_affine(st1, P, M, *params['ds_bn'])
        return bn_add_relu_pad_ds(y2, sc2, sh2, y1, rsc, rsh, N, Ho, Wo, ds_col=P)
    return bn_add_relu_pad_id(y2, sc2, sh2, x_pad, N, Ho, Wo)


# --------------------------- pure-JAX f32 reference ----------------------------

def _ref_conv(x, w, stride, padding):
    return lax.conv_general_dilated(x, w, (stride, stride), padding,
                                    dimension_numbers=('NHWC', 'HWIO', 'NHWC'))


def _ref_bn(y, gamma, beta, eps=1e-5):
    mean = jnp.mean(y, axis=(0, 1, 2))
    var = jnp.var(y, axis=(0, 1, 2))
    return (y - mean) * (gamma * lax.rsqrt(var + eps)) + beta


def basic_block_reference(params, raw, x, stride):
    out = jax.nn.relu(_ref_bn(_ref_conv(x, raw['w1'], stride, ((1, 1), (1, 1))),
                              *params['bn1']))
    out = _ref_bn(_ref_conv(out, raw['w2'], 1, ((1, 1), (1, 1))), *params['bn2'])
    if 'ds_w' in raw:
        res = _ref_bn(_ref_conv(x, raw['ds_w'], stride, ((0, 0), (0, 0))),
                      *params['ds_bn'])
    else:
        res = x
    return jax.nn.relu(out + res)


# -------------------------------------- main -----------------------------------

if __name__ == "__main__":
    root = jax.random.PRNGKey(0)
    kb1, kb2, kx = jax.random.split(root, 3)

    inplanes, planes = 4, 32
    x_nchw = jax.random.normal(kx, (2, inplanes, 16, 16), jnp.float32)   # NCHW like PyTorch

    blk1, raw1 = init_basic_block(kb1, inplanes, planes, stride=2)   # downsample path
    blk2, raw2 = init_basic_block(kb2, planes, planes, stride=1)     # identity path

    @jax.jit
    def forward(p1, p2, x):
        h = jnp.transpose(x, (0, 2, 3, 1)).astype(jnp.bfloat16)      # NCHW -> NHWC, bf16 once
        h = jnp.pad(h, ((0, 0), (1, 1), (1, 1), (0, 0)))             # zero halo once at entry
        h = basic_block_forward(p1, h, stride=2)
        h = basic_block_forward(p2, h, stride=1)
        h = h[:, 1:-1, 1:-1, :].astype(jnp.float32)                  # strip halo at exit
        return jnp.transpose(h, (0, 3, 1, 2))                        # back to NCHW once

    out = jax.block_until_ready(forward(blk1, blk2, x_nchw))
    assert out.shape == (2, planes, 8, 8), out.shape
    assert bool(jnp.all(jnp.isfinite(out)))

    # f32 XLA reference of the exact PyTorch math; tolerance sized for the bf16 MXU path.
    h = jnp.transpose(x_nchw, (0, 2, 3, 1))
    h = basic_block_reference(blk1, raw1, h, 2)
    h = basic_block_reference(blk2, raw2, h, 1)
    ref = jnp.transpose(h, (0, 3, 1, 2))
    rel = float(jnp.linalg.norm(out - ref) / (jnp.linalg.norm(ref) + 1e-8))
    assert rel < 0.05, f"relative L2 error vs f32 reference too high: {rel}"
    print("KERNEL_OK")
</pallas_src>

<mosaic_0001>
module attributes {stable_mosaic.version = 11 : i64} {
  func.func @_matmul_bn_kernel(%arg0: i32, %arg1: memref<64x36xbf16, #tpu.memory_space<vmem>>, %arg2: memref<36x128xbf16, #tpu.memory_space<vmem>>, %arg3: memref<64x128xbf16, #tpu.memory_space<vmem>>, %arg4: memref<1x8x128xf32, #tpu.memory_space<vmem>>) attributes {dimension_semantics = [#tpu.dimension_semantics<parallel>], iteration_bounds = array<i64: 2>, scalar_prefetch = 0 : i64, scratch_operands = 0 : i64, tpu.core_type = #tpu.core_type<tc>, window_params = [{transform_indices = @transform_0, window_bounds = array<i64: 64, 36>}, {pipeline_mode = #tpu.pipeline_mode<synchronous>, transform_indices = @transform_1, window_bounds = array<i64: 36, 128>}, {transform_indices = @transform_2, window_bounds = array<i64: 64, 128>}, {transform_indices = @transform_3, window_bounds = array<i64: 1, 8, 128>}]} {
    %c0 = arith.constant 0 : index
    %c0_0 = arith.constant 0 : index
    %0 = vector.load %arg1[%c0, %c0_0] : memref<64x36xbf16, #tpu.memory_space<vmem>>, vector<64x36xbf16>
    %c0_1 = arith.constant 0 : index
    %c0_2 = arith.constant 0 : index
    %1 = vector.load %arg2[%c0_1, %c0_2] : memref<36x128xbf16, #tpu.memory_space<vmem>>, vector<36x128xbf16>
    %cst = arith.constant dense<0.000000e+00> : vector<64x128xf32>
    %2 = tpu.matmul %0, %1, %cst {dimension_numbers = #tpu.dot_dimension_numbers<[1], [0], [0], [1], [0, 0, 1, 1], [], []>} : vector<64x36xbf16>, vector<36x128xbf16>, vector<64x128xf32> -> vector<64x128xf32>
    %3 = arith.truncf %2 : vector<64x128xf32> to vector<64x128xbf16>
    %c0_3 = arith.constant 0 : index
    %c0_4 = arith.constant 0 : index
    %4 = vector.load %arg3[%c0_3, %c0_4] : memref<64x128xbf16, #tpu.memory_space<vmem>>, vector<64x128xbf16>
    tpu.vector_store %arg3[%c0_3, %c0_4], %3 {strides = array<i32>} : memref<64x128xbf16, #tpu.memory_space<vmem>>, vector<64x128xbf16>,
    %cst_5 = arith.constant dense<0.000000e+00> : vector<128xf32>
    %5 = vector.multi_reduction <add>, %2, %cst_5 [0] : vector<64x128xf32> to vector<128xf32>
    %6 = vector.shape_cast %5 : vector<128xf32> to vector<1x128xf32>
    %7 = arith.mulf %2, %2 : vector<64x128xf32>
    %cst_6 = arith.constant dense<0.000000e+00> : vector<128xf32>
    %8 = vector.multi_reduction <add>, %7, %cst_6 [0] : vector<64x128xf32> to vector<128xf32>
    %9 = vector.shape_cast %8 : vector<128xf32> to vector<1x128xf32>
    %cst_7 = arith.constant 0.000000e+00 : f32
    %10 = vector.broadcast %cst_7 : f32 to vector<6x128xf32>
    %11 = tpu.concatenate %6, %9, %10 in 0 : vector<1x128xf32>, vector<1x128xf32>, vector<6x128xf32> -> vector<8x128xf32>
    %c0_8 = arith.constant 0 : index
    %c0_9 = arith.constant 0 : index
    %c0_10 = arith.constant 0 : index
    %12 = vector.load %arg4[%c0_8, %c0_9, %c0_10] : memref<1x8x128xf32, #tpu.memory_space<vmem>>, vector<1x8x128xf32>
    %13 = vector.shape_cast %12 : vector<1x8x128xf32> to vector<8x128xf32>
    %14 = vector.shape_cast %11 : vector<8x128xf32> to vector<1x8x128xf32>
    tpu.vector_store %arg4[%c0_8, %c0_9, %c0_10], %14 {strides = array<i32>} : memref<1x8x128xf32, #tpu.memory_space<vmem>>, vector<1x8x128xf32>,
    return
  }
  func.func @transform_0(%arg0: i32) -> (i32, i32) {
    %c0_i32 = arith.constant 0 : i32
    %c0_i32_0 = arith.constant 0 : i32
    return %arg0, %c0_i32 : i32, i32
  }
  func.func @transform_1(%arg0: i32) -> (i32, i32) {
    %c0_i32 = arith.constant 0 : i32
    %c0_i32_0 = arith.constant 0 : i32
    %c0_i32_1 = arith.constant 0 : i32
    return %c0_i32, %c0_i32_0 : i32, i32
  }
  func.func @transform_2(%arg0: i32) -> (i32, i32) {
    %c0_i32 = arith.constant 0 : i32
    %c0_i32_0 = arith.constant 0 : i32
    return %arg0, %c0_i32 : i32, i32
  }
  func.func @transform_3(%arg0: i32) -> (i32, i32, i32) {
    %c0_i32 = arith.constant 0 : i32
    %c0_i32_0 = arith.constant 0 : i32
    %c0_i32_1 = arith.constant 0 : i32
    return %arg0, %c0_i32, %c0_i32_0 : i32, i32, i32
  }
}

module attributes {stable_mosaic.version = 11 : i64} {
  func.func @_bn_relu_pad_kernel(%arg0: i32, %arg1: memref<1x64x128xbf16, #tpu.memory_space<vmem>>, %arg2: memref<1x32xf32, #tpu.memory_space<vmem>>, %arg3: memref<1x32xf32, #tpu.memory_space<vmem>>, %arg4: memref<1x10x10x32xbf16, #tpu.memory_space<vmem>>) attributes {dimension_semantics = [#tpu.dimension_semantics<parallel>], iteration_bounds = array<i64: 2>, scalar_prefetch = 0 : i64, scratch_operands = 0 : i64, tpu.core_type = #tpu.core_type<tc>, window_params = [{transform_indices = @transform_0, window_bounds = array<i64: 1, 64, 128>}, {pipeline_mode = #tpu.pipeline_mode<synchronous>, transform_indices = @transform_1, window_bounds = array<i64: 1, 32>}, {pipeline_mode = #tpu.pipeline_mode<synchronous>, transform_indices = @transform_2, window_bounds = array<i64: 1, 32>}, {transform_indices = @transform_3, window_bounds = array<i64: 1, 10, 10, 32>}]} {
    %c0 = arith.constant 0 : index
    %c0_0 = arith.constant 0 : index
    %c0_1 = arith.constant 0 : index
    %0 = vector.load %arg1[%c0, %c0_0, %c0_1] : memref<1x64x128xbf16, #tpu.memory_space<vmem>>, vector<1x64x128xbf16>
    %1 = vector.shape_cast %0 : vector<1x64x128xbf16> to vector<64x128xbf16>
    %2 = vector.extract_strided_slice %1 {offsets = [0, 0], sizes = [64, 32], strides = [1, 1]} : vector<64x128xbf16> to vector<64x32xbf16>
    %3 = arith.extf %2 : vector<64x32xbf16> to vector<64x32xf32>
    %c0_2 = arith.constant 0 : index
    %c0_3 = arith.constant 0 : index
    %4 = vector.load %arg2[%c0_2, %c0_3] : memref<1x32xf32, #tpu.memory_space<vmem>>, vector<1x32xf32>
    %5 = vector.broadcast %4 : vector<1x32xf32> to vector<64x32xf32>
    %6 = arith.mulf %3, %5 : vector<64x32xf32>
    %c0_4 = arith.constant 0 : index
    %c0_5 = arith.constant 0 : index
    %7 = vector.load %arg3[%c0_4, %c0_5] : memref<1x32xf32, #tpu.memory_space<vmem>>, vector<1x32xf32>
    %8 = vector.broadcast %7 : vector<1x32xf32> to vector<64x32xf32>
    %9 = arith.addf %6, %8 : vector<64x32xf32>
    %cst = arith.constant 0.000000e+00 : f32
    %10 = vector.broadcast %cst : f32 to vector<64x32xf32>
    %11 = arith.maximumf %9, %10 : vector<64x32xf32>
    %cst_6 = arith.constant 0.000000e+00 : bf16
    %12 = vector.broadcast %cst_6 : bf16 to vector<1x10x10x32xbf16>
    %c0_7 = arith.constant 0 : index
    %c0_8 = arith.constant 0 : index
    %c0_9 = arith.constant 0 : index
    %c0_10 = arith.constant 0 : index
    %13 = vector.load %arg4[%c0_7, %c0_8, %c0_9, %c0_10] : memref<1x10x10x32xbf16, #tpu.memory_space<vmem>>, vector<1x10x10x32xbf16>
    tpu.vector_store %arg4[%c0_7, %c0_8, %c0_9, %c0_10], %12 {strides = array<i32>} : memref<1x10x10x32xbf16, #tpu.memory_space<vmem>>, vector<1x10x10x32xbf16>,
    %14 = vector.shape_cast %11 : vector<64x32xf32> to vector<8x8x32xf32>
    %15 = arith.truncf %14 : vector<8x8x32xf32> to vector<8x8x32xbf16>
    %c0_11 = arith.constant 0 : index
    %c1 = arith.constant 1 : index
    %c1_12 = arith.constant 1 : index
    %c0_13 = arith.constant 0 : index
    %16 = vector.load %arg4[%c0_11, %c1, %c1_12, %c0_13] : memref<1x10x10x32xbf16, #tpu.memory_space<vmem>>, vector<1x8x8x32xbf16>
    %17 = vector.shape_cast %16 : vector<1x8x8x32xbf16> to vector<8x8x32xbf16>
    %18 = vector.shape_cast %15 : vector<8x8x32xbf16> to vector<1x8x8x32xbf16>
    tpu.vector_store %arg4[%c0_11, %c1, %c1_12, %c0_13], %18 {strides = array<i32>} : memref<1x10x10x32xbf16, #tpu.memory_space<vmem>>, vector<1x8x8x32xbf16>,
    return
  }
  func.func @transform_0(%arg0: i32) -> (i32, i32, i32) {
    %c0_i32 = arith.constant 0 : i32
    %c0_i32_0 = arith.constant 0 : i32
    %c0_i32_1 = arith.constant 0 : i32
    return %arg0, %c0_i32, %c0_i32_0 : i32, i32, i32
  }
  func.func @transform_1(%arg0: i32) -> (i32, i32) {
    %c0_i32 = arith.constant 0 : i32
    %c0_i32_0 = arith.constant 0 : i32
    %c0_i32_1 = arith.constant 0 : i32
    return %c0_i32, %c0_i32_0 : i32, i32
  }
  func.func @transform_2(%arg0: i32) -> (i32, i32) {
    %c0_i32 = arith.constant 0 : i32
    %c0_i32_0 = arith.constant 0 : i32
    %c0_i32_1 = arith.constant 0 : i32
    return %c0_i32, %c0_i32_0 : i32, i32
  }
  func.func @transform_3(%arg0: i32) -> (i32, i32, i32, i32) {
    %c0_i32 = arith.constant 0 : i32
    %c0_i32_0 = arith.constant 0 : i32
    %c0_i32_1 = arith.constant 0 : i32
    %c0_i32_2 = arith.constant 0 : i32
    return %arg0, %c0_i32, %c0_i32_0, %c0_i32_1 : i32, i32, i32, i32
  }
}

module attributes {stable_mosaic.version = 11 : i64} {
  func.func @_conv3x3_s1_kernel(%arg0: i32, %arg1: memref<1x10x10x32xbf16, #tpu.memory_space<vmem>>, %arg2: memref<9x32x128xbf16, #tpu.memory_space<vmem>>, %arg3: memref<1x64x128xbf16, #tpu.memory_space<vmem>>, %arg4: memref<1x8x128xf32, #tpu.memory_space<vmem>>) attributes {dimension_semantics = [#tpu.dimension_semantics<parallel>], iteration_bounds = array<i64: 2>, scalar_prefetch = 0 : i64, scratch_operands = 0 : i64, tpu.core_type = #tpu.core_type<tc>, window_params = [{transform_indices = @transform_0, window_bounds = array<i64: 1, 10, 10, 32>}, {pipeline_mode = #tpu.pipeline_mode<synchronous>, transform_indices = @transform_1, window_bounds = array<i64: 9, 32, 128>}, {transform_indices = @transform_2, window_bounds = array<i64: 1, 64, 128>}, {transform_indices = @transform_3, window_bounds = array<i64: 1, 8, 128>}]} {
    %c0 = arith.constant 0 : index
    %c0_0 = arith.constant 0 : index
    %c0_1 = arith.constant 0 : index
    %c0_2 = arith.constant 0 : index
    %0 = vector.load %arg1[%c0, %c0_0, %c0_1, %c0_2] : memref<1x10x10x32xbf16, #tpu.memory_space<vmem>>, vector<1x10x10x32xbf16>
    %1 = vector.shape_cast %0 : vector<1x10x10x32xbf16> to vector<10x10x32xbf16>
    %cst = arith.constant 0.000000e+00 : f32
    %2 = vector.broadcast %cst : f32 to vector<64x128xf32>
    %3 = vector.extract_strided_slice %1 {offsets = [0, 0, 0], sizes = [8, 8, 32], strides = [1, 1, 1]} : vector<10x10x32xbf16> to vector<8x8x32xbf16>
    %4 = vector.shape_cast %3 : vector<8x8x32xbf16> to vector<64x32xbf16>
    %c0_3 = arith.constant 0 : index
    %c0_4 = arith.constant 0 : index
    %c0_5 = arith.constant 0 : index
    %5 = vector.load %arg2[%c0_3, %c0_4, %c0_5] : memref<9x32x128xbf16, #tpu.memory_space<vmem>>, vector<1x32x128xbf16>
    %6 = vector.shape_cast %5 : vector<1x32x128xbf16> to vector<32x128xbf16>
    %cst_6 = arith.constant dense<0.000000e+00> : vector<64x128xf32>
    %7 = tpu.matmul %4, %6, %cst_6 {dimension_numbers = #tpu.dot_dimension_numbers<[1], [0], [0], [1], [0, 0, 1, 1], [], []>} : vector<64x32xbf16>, vector<32x128xbf16>, vector<64x128xf32> -> vector<64x128xf32>
    %8 = arith.addf %2, %7 : vector<64x128xf32>
    %9 = vector.extract_strided_slice %1 {offsets = [0, 1, 0], sizes = [8, 8, 32], strides = [1, 1, 1]} : vector<10x10x32xbf16> to vector<8x8x32xbf16>
    %10 = vector.shape_cast %9 : vector<8x8x32xbf16> to vector<64x32xbf16>
    %c1 = arith.constant 1 : index
    %c0_7 = arith.constant 0 : index
    %c0_8 = arith.constant 0 : index
    %11 = vector.load %arg2[%c1, %c0_7, %c0_8] : memref<9x32x128xbf16, #tpu.memory_space<vmem>>, vector<1x32x128xbf16>
    %12 = vector.shape_cast %11 : vector<1x32x128xbf16> to vector<32x128xbf16>
    %cst_9 = arith.constant dense<0.000000e+00> : vector<64x128xf32>
    %13 = tpu.matmul %10, %12, %cst_9 {dimension_numbers = #tpu.dot_dimension_numbers<[1], [0], [0], [1], [0, 0, 1, 1], [], []>} : vector<64x32xbf16>, vector<32x128xbf16>, vector<64x128xf32> -> vector<64x128xf32>
    %14 = arith.addf %8, %13 : vector<64x128xf32>
    %15 = vector.extract_strided_slice %1 {offsets = [0, 2, 0], sizes = [8, 8, 32], strides = [1, 1, 1]} : vector<10x10x32xbf16> to vector<8x8x32xbf16>
    %16 = vector.shape_cast %15 : vector<8x8x32xbf16> to vector<64x32xbf16>
    %c2 = arith.constant 2 : index
    %c0_10 = arith.constant 0 : index
    %c0_11 = arith.constant 0 : index
    %17 = vector.load %arg2[%c2, %c0_10, %c0_11] : memref<9x32x128xbf16, #tpu.memory_space<vmem>>, vector<1x32x128xbf16>
    %18 = vector.shape_cast %17 : vector<1x32x128xbf16> to vector<32x128xbf16>
    %cst_12 = arith.constant dense<0.000000e+00> : vector<64x128xf32>
    %19 = tpu.matmul %16, %18, %cst_12 {dimension_numbers = #tpu.dot_dimension_numbers<[1], [0], [0], [1], [0, 0, 1, 1], [], []>} : vector<64x32xbf16>, vector<32x128xbf16>, vector<64x128xf32> -> vector<64x128xf32>
    %20 = arith.addf %14, %19 : vector<64x128xf32>
    %21 = vector.extract_strided_slice %1 {offsets = [1, 0, 0], sizes = [8, 8, 32], strides = [1, 1, 1]} : vector<10x10x32xbf16> to vector<8x8x32xbf16>
    %22 = vector.shape_cast %21 : vector<8x8x32xbf16> to vector<64x32xbf16>
    %c3 = arith.constant 3 : index
    %c0_13 = arith.constant 0 : index
    %c0_14 = arith.constant 0 : index
    %23 = vector.load %arg2[%c3, %c0_13, %c0_14] : memref<9x32x128xbf16, #tpu.memory_space<vmem>>, vector<1x32x128xbf16>
    %24 = vector.shape_cast %23 : vector<1x32x128xbf16> to vector<32x128xbf16>
    %cst_15 = arith.constant dense<0.000000e+00> : vector<64x128xf32>
    %25 = tpu.matmul %22, %24, %cst_15 {dimension_numbers = #tpu.dot_dimension_numbers<[1], [0], [0], [1], [0, 0, 1, 1], [], []>} : vector<64x32xbf16>, vector<32x128xbf16>, vector<64x128xf32> -> vector<64x128xf32>
    %26 = arith.addf %20, %25 : vector<64x128xf32>
    %27 = vector.extract_strided_slice %1 {offsets = [1, 1, 0], sizes = [8, 8, 32], strides = [1, 1, 1]} : vector<10x10x32xbf16> to vector<8x8x32xbf16>
    %28 = vector.shape_cast %27 : vector<8x8x32xbf16> to vector<64x32xbf16>
    %c4 = arith.constant 4 : index
    %c0_16 = arith.constant 0 : index
    %c0_17 = arith.constant 0 : index
    %29 = vector.load %arg2[%c4, %c0_16, %c0_17] : memref<9x32x128xbf16, #tpu.memory_space<vmem>>, vector<1x32x128xbf16>
    %30 = vector.shape_cast %29 : vector<1x32x128xbf16> to vector<32x128xbf16>
    %cst_18 = arith.constant dense<0.000000e+00> : vector<64x128xf32>
    %31 = tpu.matmul %28, %30, %cst_18 {dimension_numbers = #tpu.dot_dimension_numbers<[1], [0], [0], [1], [0, 0, 1, 1], [], []>} : vector<64x32xbf16>, vector<32x128xbf16>, vector<64x128xf32> -> vector<64x128xf32>
    %32 = arith.addf %26, %31 : vector<64x128xf32>
    %33 = vector.extract_strided_slice %1 {offsets = [1, 2, 0], sizes = [8, 8, 32], strides = [1, 1, 1]} : vector<10x10x32xbf16> to vector<8x8x32xbf16>
    %34 = vector.shape_cast %33 : vector<8x8x32xbf16> to vector<64x32xbf16>
    %c5 = arith.constant 5 : index
    %c0_19 = arith.constant 0 : index
    %c0_20 = arith.constant 0 : index
    %35 = vector.load %arg2[%c5, %c0_19, %c0_20] : memref<9x32x128xbf16, #tpu.memory_space<vmem>>, vector<1x32x128xbf16>
    %36 = vector.shape_cast %35 : vector<1x32x128xbf16> to vector<32x128xbf16>
    %cst_21 = arith.constant dense<0.000000e+00> : vector<64x128xf32>
    %37 = tpu.matmul %34, %36, %cst_21 {dimension_numbers = #tpu.dot_dimension_numbers<[1], [0], [0], [1], [0, 0, 1, 1], [], []>} : vector<64x32xbf16>, vector<32x128xbf16>, vector<64x128xf32> -> vector<64x128xf32>
    %38 = arith.addf %32, %37 : vector<64x128xf32>
    %39 = vector.extract_strided_slice %1 {offsets = [2, 0, 0], sizes = [8, 8, 32], strides = [1, 1, 1]} : vector<10x10x32xbf16> to vector<8x8x32xbf16>
    %40 = vector.shape_cast %39 : vector<8x8x32xbf16> to vector<64x32xbf16>
    %c6 = arith.constant 6 : index
    %c0_22 = arith.constant 0 : index
    %c0_23 = arith.constant 0 : index
    %41 = vector.load %arg2[%c6, %c0_22, %c0_23] : memref<9x32x128xbf16, #tpu.memory_space<vmem>>, vector<1x32x128xbf16>
    %42 = vector.shape_cast %41 : vector<1x32x128xbf16> to vector<32x128xbf16>
    %cst_24 = arith.constant dense<0.000000e+00> : vector<64x128xf32>
    %43 = tpu.matmul %40, %42, %cst_24 {dimension_numbers = #tpu.dot_dimension_numbers<[1], [0], [0], [1], [0, 0, 1, 1], [], []>} : vector<64x32xbf16>, vector<32x128xbf16>, vector<64x128xf32> -> vector<64x128xf32>
    %44 = arith.addf %38, %43 : vector<64x128xf32>
    %45 = vector.extract_strided_slice %1 {offsets = [2, 1, 0], sizes = [8, 8, 32], strides = [1, 1, 1]} : vector<10x10x32xbf16> to vector<8x8x32xbf16>
    %46 = vector.shape_cast %45 : vector<8x8x32xbf16> to vector<64x32xbf16>
    %c7 = arith.constant 7 : index
    %c0_25 = arith.constant 0 : index
    %c0_26 = arith.constant 0 : index
    %47 = vector.load %arg2[%c7, %c0_25, %c0_26] : memref<9x32x128xbf16, #tpu.memory_space<vmem>>, vector<1x32x128xbf16>
    %48 = vector.shape_cast %47 : vector<1x32x128xbf16> to vector<32x128xbf16>
    %cst_27 = arith.constant dense<0.000000e+00> : vector<64x128xf32>
    %49 = tpu.matmul %46, %48, %cst_27 {dimension_numbers = #tpu.dot_dimension_numbers<[1], [0], [0], [1], [0, 0, 1, 1], [], []>} : vector<64x32xbf16>, vector<32x128xbf16>, vector<64x128xf32> -> vector<64x128xf32>
    %50 = arith.addf %44, %49 : vector<64x128xf32>
    %51 = vector.extract_strided_slice %1 {offsets = [2, 2, 0], sizes = [8, 8, 32], strides = [1, 1, 1]} : vector<10x10x32xbf16> to vector<8x8x32xbf16>
    %52 = vector.shape_cast %51 : vector<8x8x32xbf16> to vector<64x32xbf16>
    %c8 = arith.constant 8 : index
    %c0_28 = arith.constant 0 : index
    %c0_29 = arith.constant 0 : index
    %53 = vector.load %arg2[%c8, %c0_28, %c0_29] : memref<9x32x128xbf16, #tpu.memory_space<vmem>>, vector<1x32x128xbf16>
    %54 = vector.shape_cast %53 : vector<1x32x128xbf16> to vector<32x128xbf16>
    %cst_30 = arith.constant dense<0.000000e+00> : vector<64x128xf32>
    %55 = tpu.matmul %52, %54, %cst_30 {dimension_numbers = #tpu.dot_dimension_numbers<[1], [0], [0], [1], [0, 0, 1, 1], [], []>} : vector<64x32xbf16>, vector<32x128xbf16>, vector<64x128xf32> -> vector<64x128xf32>
    %56 = arith.addf %50, %55 : vector<64x128xf32>
    %57 = arith.truncf %56 : vector<64x128xf32> to vector<64x128xbf16>
    %c0_31 = arith.constant 0 : index
    %c0_32 = arith.constant 0 : index
    %c0_33 = arith.constant 0 : index
    %58 = vector.load %arg3[%c0_31, %c0_32, %c0_33] : memref<1x64x128xbf16, #tpu.memory_space<vmem>>, vector<1x64x128xbf16>
    %59 = vector.shape_cast %58 : vector<1x64x128xbf16> to vector<64x128xbf16>
    %60 = vector.shape_cast %57 : vector<64x128xbf16> to vector<1x64x128xbf16>
    tpu.vector_store %arg3[%c0_31, %c0_32, %c0_33], %60 {strides = array<i32>} : memref<1x64x128xbf16, #tpu.memory_space<vmem>>, vector<1x64x128xbf16>,
    %cst_34 = arith.constant dense<0.000000e+00> : vector<128xf32>
    %61 = vector.multi_reduction <add>, %56, %cst_34 [0] : vector<64x128xf32> to vector<128xf32>
    %62 = vector.shape_cast %61 : vector<128xf32> to vector<1x128xf32>
    %63 = arith.mulf %56, %56 : vector<64x128xf32>
    %cst_35 = arith.constant dense<0.000000e+00> : vector<128xf32>
    %64 = vector.multi_reduction <add>, %63, %cst_35 [0] : vector<64x128xf32> to vector<128xf32>
    %65 = vector.shape_cast %64 : vector<128xf32> to vector<1x128xf32>
    %cst_36 = arith.constant 0.000000e+00 : f32
    %66 = vector.broadcast %cst_36 : f32 to vector<6x128xf32>
    %67 = tpu.concatenate %62, %65, %66 in 0 : vector<1x128xf32>, vector<1x128xf32>, vector<6x128xf32> -> vector<8x128xf32>
    %c0_37 = arith.constant 0 : index
    %c0_38 = arith.constant 0 : index
    %c0_39 = arith.constant 0 : index
    %68 = vector.load %arg4[%c0_37, %c0_38, %c0_39] : memref<1x8x128xf32, #tpu.memory_space<vmem>>, vector<1x8x128xf32>
    %69 = vector.shape_cast %68 : vector<1x8x128xf32> to vector<8x128xf32>
    %70 = vector.shape_cast %67 : vector<8x128xf32> to vector<1x8x128xf32>
    tpu.vector_store %arg4[%c0_37, %c0_38, %c0_39], %70 {strides = array<i32>} : memref<1x8x128xf32, #tpu.memory_space<vmem>>, vector<1x8x128xf32>,
    return
  }
  func.func @transform_0(%arg0: i32) -> (i32, i32, i32, i32) {
    %c0_i32 = arith.constant 0 : i32
    %c0_i32_0 = arith.constant 0 : i32
    %c0_i32_1 = arith.constant 0 : i32
    %c0_i32_2 = arith.constant 0 : i32
    return %arg0, %c0_i32, %c0_i32_0, %c0_i32_1 : i32, i32, i32, i32
  }
  func.func @transform_1(%arg0: i32) -> (i32, i32, i32) {
    %c0_i32 = arith.constant 0 : i32
    %c0_i32_0 = arith.constant 0 : i32
    %c0_i32_1 = arith.constant 0 : i32
    %c0_i32_2 = arith.constant 0 : i32
    return %c0_i32, %c0_i32_0, %c0_i32_1 : i32, i32, i32
  }
  func.func @transform_2(%arg0: i32) -> (i32, i32, i32) {
    %c0_i32 = arith.constant 0 : i32
    %c0_i32_0 = arith.constant 0 : i32
    %c0_i32_1 = arith.constant 0 : i32
    return %arg0, %c0_i32, %c0_i32_0 : i32, i32, i32
  }
  func.func @transform_3(%arg0: i32) -> (i32, i32, i32) {
    %c0_i32 = arith.constant 0 : i32
    %c0_i32_0 = arith.constant 0 : i32
    %c0_i32_1 = arith.constant 0 : i32
    return %arg0, %c0_i32, %c0_i32_0 : i32, i32, i32
  }
}

module attributes {stable_mosaic.version = 11 : i64} {
  func.func @_bn2_add_ds_relu_pad_kernel(%arg0: i32, %arg1: memref<1x64x128xbf16, #tpu.memory_space<vmem>>, %arg2: memref<1x64x128xbf16, #tpu.memory_space<vmem>>, %arg3: memref<1x32xf32, #tpu.memory_space<vmem>>, %arg4: memref<1x32xf32, #tpu.memory_space<vmem>>, %arg5: memref<1x32xf32, #tpu.memory_space<vmem>>, %arg6: memref<1x32xf32, #tpu.memory_space<vmem>>, %arg7: memref<1x10x10x32xbf16, #tpu.memory_space<vmem>>) attributes {dimension_semantics = [#tpu.dimension_semantics<parallel>], iteration_bounds = array<i64: 2>, scalar_prefetch = 0 : i64, scratch_operands = 0 : i64, tpu.core_type = #tpu.core_type<tc>, window_params = [{transform_indices = @transform_0, window_bounds = array<i64: 1, 64, 128>}, {transform_indices = @transform_1, window_bounds = array<i64: 1, 64, 128>}, {pipeline_mode = #tpu.pipeline_mode<synchronous>, transform_indices = @transform_2, window_bounds = array<i64: 1, 32>}, {pipeline_mode = #tpu.pipeline_mode<synchronous>, transform_indices = @transform_3, window_bounds = array<i64: 1, 32>}, {pipeline_mode = #tpu.pipeline_mode<synchronous>, transform_indices = @transform_4, window_bounds = array<i64: 1, 32>}, {pipeline_mode = #tpu.pipeline_mode<synchronous>, transform_indices = @transform_5, window_bounds = array<i64: 1, 32>}, {transform_indices = @transform_6, window_bounds = array<i64: 1, 10, 10, 32>}]} {
    %c0 = arith.constant 0 : index
    %c0_0 = arith.constant 0 : index
    %c0_1 = arith.constant 0 : index
    %0 = vector.load %arg1[%c0, %c0_0, %c0_1] : memref<1x64x128xbf16, #tpu.memory_space<vmem>>, vector<1x64x128xbf16>
    %1 = vector.shape_cast %0 : vector<1x64x128xbf16> to vector<64x128xbf16>
    %2 = vector.extract_strided_slice %1 {offsets = [0, 0], sizes = [64, 32], strides = [1, 1]} : vector<64x128xbf16> to vector<64x32xbf16>
    %3 = arith.extf %2 : vector<64x32xbf16> to vector<64x32xf32>
    %c0_2 = arith.constant 0 : index
    %c0_3 = arith.constant 0 : index
    %c0_4 = arith.constant 0 : index
    %4 = vector.load %arg2[%c0_2, %c0_3, %c0_4] : memref<1x64x128xbf16, #tpu.memory_space<vmem>>, vector<1x64x128xbf16>
    %5 = vector.shape_cast %4 : vector<1x64x128xbf16> to vector<64x128xbf16>
    %6 = vector.extract_strided_slice %5 {offsets = [0, 32], sizes = [64, 32], strides = [1, 1]} : vector<64x128xbf16> to vector<64x32xbf16>
    %7 = arith.extf %6 : vector<64x32xbf16> to vector<64x32xf32>
    %c0_5 = arith.constant 0 : index
    %c0_6 = arith.constant 0 : index
    %8 = vector.load %arg3[%c0_5, %c0_6] : memref<1x32xf32, #tpu.memory_space<vmem>>, vector<1x32xf32>
    %9 = vector.broadcast %8 : vector<1x32xf32> to vector<64x32xf32>
    %10 = arith.mulf %3, %9 : vector<64x32xf32>
    %c0_7 = arith.constant 0 : index
    %c0_8 = arith.constant 0 : index
    %11 = vector.load %arg4[%c0_7, %c0_8] : memref<1x32xf32, #tpu.memory_space<vmem>>, vector<1x32xf32>
    %12 = vector.broadcast %11 : vector<1x32xf32> to vector<64x32xf32>
    %13 = arith.addf %10, %12 : vector<64x32xf32>
    %c0_9 = arith.constant 0 : index
    %c0_10 = arith.constant 0 : index
    %14 = vector.load %arg5[%c0_9, %c0_10] : memref<1x32xf32, #tpu.memory_space<vmem>>, vector<1x32xf32>
    %15 = vector.broadcast %14 : vector<1x32xf32> to vector<64x32xf32>
    %16 = arith.mulf %7, %15 : vector<64x32xf32>
    %17 = arith.addf %13, %16 : vector<64x32xf32>
    %c0_11 = arith.constant 0 : index
    %c0_12 = arith.constant 0 : index
    %18 = vector.load %arg6[%c0_11, %c0_12] : memref<1x32xf32, #tpu.memory_space<vmem>>, vector<1x32xf32>
    %19 = vector.broadcast %18 : vector<1x32xf32> to vector<64x32xf32>
    %20 = arith.addf %17, %19 : vector<64x32xf32>
    %cst = arith.constant 0.000000e+00 : f32
    %21 = vector.broadcast %cst : f32 to vector<64x32xf32>
    %22 = arith.maximumf %20, %21 : vector<64x32xf32>
    %cst_13 = arith.constant 0.000000e+00 : bf16
    %23 = vector.broadcast %cst_13 : bf16 to vector<1x10x10x32xbf16>
    %c0_14 = arith.constant 0 : index
    %c0_15 = arith.constant 0 : index
    %c0_16 = arith.constant 0 : index
    %c0_17 = arith.constant 0 : index
    %24 = vector.load %arg7[%c0_14, %c0_15, %c0_16, %c0_17] : memref<1x10x10x32xbf16, #tpu.memory_space<vmem>>, vector<1x10x10x32xbf16>
    tpu.vector_store %arg7[%c0_14, %c0_15, %c0_16, %c0_17], %23 {strides = array<i32>} : memref<1x10x10x32xbf16, #tpu.memory_space<vmem>>, vector<1x10x10x32xbf16>,
    %25 = vector.shape_cast %22 : vector<64x32xf32> to vector<8x8x32xf32>
    %26 = arith.truncf %25 : vector<8x8x32xf32> to vector<8x8x32xbf16>
    %c0_18 = arith.constant 0 : index
    %c1 = arith.constant 1 : index
    %c1_19 = arith.constant 1 : index
    %c0_20 = arith.constant 0 : index
    %27 = vector.load %arg7[%c0_18, %c1, %c1_19, %c0_20] : memref<1x10x10x32xbf16, #tpu.memory_space<vmem>>, vector<1x8x8x32xbf16>
    %28 = vector.shape_cast %27 : vector<1x8x8x32xbf16> to vector<8x8x32xbf16>
    %29 = vector.shape_cast %26 : vector<8x8x32xbf16> to vector<1x8x8x32xbf16>
    tpu.vector_store %arg7[%c0_18, %c1, %c1_19, %c0_20], %29 {strides = array<i32>} : memref<1x10x10x32xbf16, #tpu.memory_space<vmem>>, vector<1x8x8x32xbf16>,
    return
  }
  func.func @transform_0(%arg0: i32) -> (i32, i32, i32) {
    %c0_i32 = arith.constant 0 : i32
    %c0_i32_0 = arith.constant 0 : i32
    %c0_i32_1 = arith.constant 0 : i32
    return %arg0, %c0_i32, %c0_i32_0 : i32, i32, i32
  }
  func.func @transform_1(%arg0: i32) -> (i32, i32, i32) {
    %c0_i32 = arith.constant 0 : i32
    %c0_i32_0 = arith.constant 0 : i32
    %c0_i32_1 = arith.constant 0 : i32
    return %arg0, %c0_i32, %c0_i32_0 : i32, i32, i32
  }
  func.func @transform_2(%arg0: i32) -> (i32, i32) {
    %c0_i32 = arith.constant 0 : i32
    %c0_i32_0 = arith.constant 0 : i32
    %c0_i32_1 = arith.constant 0 : i32
    return %c0_i32, %c0_i32_0 : i32, i32
  }
  func.func @transform_3(%arg0: i32) -> (i32, i32) {
    %c0_i32 = arith.constant 0 : i32
    %c0_i32_0 = arith.constant 0 : i32
    %c0_i32_1 = arith.constant 0 : i32
    return %c0_i32, %c0_i32_0 : i32, i32
  }
  func.func @transform_4(%arg0: i32) -> (i32, i32) {
    %c0_i32 = arith.constant 0 : i32
    %c0_i32_0 = arith.constant 0 : i32
    %c0_i32_1 = arith.constant 0 : i32
    return %c0_i32, %c0_i32_0 : i32, i32
  }
  func.func @transform_5(%arg0: i32) -> (i32, i32) {
    %c0_i32 = arith.constant 0 : i32
    %c0_i32_0 = arith.constant 0 : i32
    %c0_i32_1 = arith.constant 0 : i32
    return %c0_i32, %c0_i32_0 : i32, i32
  }
  func.func @transform_6(%arg0: i32) -> (i32, i32, i32, i32) {
    %c0_i32 = arith.constant 0 : i32
    %c0_i32_0 = arith.constant 0 : i32
    %c0_i32_1 = arith.constant 0 : i32
    %c0_i32_2 = arith.constant 0 : i32
    return %arg0, %c0_i32, %c0_i32_0, %c0_i32_1 : i32, i32, i32, i32
  }
}

module attributes {stable_mosaic.version = 11 : i64} {
  func.func @_bn_relu_pad_kernel(%arg0: i32, %arg1: memref<1x64x128xbf16, #tpu.memory_space<vmem>>, %arg2: memref<1x32xf32, #tpu.memory_space<vmem>>, %arg3: memref<1x32xf32, #tpu.memory_space<vmem>>, %arg4: memref<1x10x10x32xbf16, #tpu.memory_space<vmem>>) attributes {dimension_semantics = [#tpu.dimension_semantics<parallel>], iteration_bounds = array<i64: 2>, scalar_prefetch = 0 : i64, scratch_operands = 0 : i64, tpu.core_type = #tpu.core_type<tc>, window_params = [{transform_indices = @transform_0, window_bounds = array<i64: 1, 64, 128>}, {pipeline_mode = #tpu.pipeline_mode<synchronous>, transform_indices = @transform_1, window_bounds = array<i64: 1, 32>}, {pipeline_mode = #tpu.pipeline_mode<synchronous>, transform_indices = @transform_2, window_bounds = array<i64: 1, 32>}, {transform_indices = @transform_3, window_bounds = array<i64: 1, 10, 10, 32>}]} {
    %c0 = arith.constant 0 : index
    %c0_0 = arith.constant 0 : index
    %c0_1 = arith.constant 0 : index
    %0 = vector.load %arg1[%c0, %c0_0, %c0_1] : memref<1x64x128xbf16, #tpu.memory_space<vmem>>, vector<1x64x128xbf16>
    %1 = vector.shape_cast %0 : vector<1x64x128xbf16> to vector<64x128xbf16>
    %2 = vector.extract_strided_slice %1 {offsets = [0, 0], sizes = [64, 32], strides = [1, 1]} : vector<64x128xbf16> to vector<64x32xbf16>
    %3 = arith.extf %2 : vector<64x32xbf16> to vector<64x32xf32>
    %c0_2 = arith.constant 0 : index
    %c0_3 = arith.constant 0 : index
    %4 = vector.load %arg2[%c0_2, %c0_3] : memref<1x32xf32, #tpu.memory_space<vmem>>, vector<1x32xf32>
    %5 = vector.broadcast %4 : vector<1x32xf32> to vector<64x32xf32>
    %6 = arith.mulf %3, %5 : vector<64x32xf32>
    %c0_4 = arith.constant 0 : index
    %c0_5 = arith.constant 0 : index
    %7 = vector.load %arg3[%c0_4, %c0_5] : memref<1x32xf32, #tpu.memory_space<vmem>>, vector<1x32xf32>
    %8 = vector.broadcast %7 : vector<1x32xf32> to vector<64x32xf32>
    %9 = arith.addf %6, %8 : vector<64x32xf32>
    %cst = arith.constant 0.000000e+00 : f32
    %10 = vector.broadcast %cst : f32 to vector<64x32xf32>
    %11 = arith.maximumf %9, %10 : vector<64x32xf32>
    %cst_6 = arith.constant 0.000000e+00 : bf16
    %12 = vector.broadcast %cst_6 : bf16 to vector<1x10x10x32xbf16>
    %c0_7 = arith.constant 0 : index
    %c0_8 = arith.constant 0 : index
    %c0_9 = arith.constant 0 : index
    %c0_10 = arith.constant 0 : index
    %13 = vector.load %arg4[%c0_7, %c0_8, %c0_9, %c0_10] : memref<1x10x10x32xbf16, #tpu.memory_space<vmem>>, vector<1x10x10x32xbf16>
    tpu.vector_store %arg4[%c0_7, %c0_8, %c0_9, %c0_10], %12 {strides = array<i32>} : memref<1x10x10x32xbf16, #tpu.memory_space<vmem>>, vector<1x10x10x32xbf16>,
    %14 = vector.shape_cast %11 : vector<64x32xf32> to vector<8x8x32xf32>
    %15 = arith.truncf %14 : vector<8x8x32xf32> to vector<8x8x32xbf16>
    %c0_11 = arith.constant 0 : index
    %c1 = arith.constant 1 : index
    %c1_12 = arith.constant 1 : index
    %c0_13 = arith.constant 0 : index
    %16 = vector.load %arg4[%c0_11, %c1, %c1_12, %c0_13] : memref<1x10x10x32xbf16, #tpu.memory_space<vmem>>, vector<1x8x8x32xbf16>
    %17 = vector.shape_cast %16 : vector<1x8x8x32xbf16> to vector<8x8x32xbf16>
    %18 = vector.shape_cast %15 : vector<8x8x32xbf16> to vector<1x8x8x32xbf16>
    tpu.vector_store %arg4[%c0_11, %c1, %c1_12, %c0_13], %18 {strides = array<i32>} : memref<1x10x10x32xbf16, #tpu.memory_space<vmem>>, vector<1x8x8x32xbf16>,
    return
  }
  func.func @transform_0(%arg0: i32) -> (i32, i32, i32) {
    %c0_i32 = arith.constant 0 : i32
    %c0_i32_0 = arith.constant 0 : i32
    %c0_i32_1 = arith.constant 0 : i32
    return %arg0, %c0_i32, %c0_i32_0 : i32, i32, i32
  }
  func.func @transform_1(%arg0: i32) -> (i32, i32) {
    %c0_i32 = arith.constant 0 : i32
    %c0_i32_0 = arith.constant 0 : i32
    %c0_i32_1 = arith.constant 0 : i32
    return %c0_i32, %c0_i32_0 : i32, i32
  }
  func.func @transform_2(%arg0: i32) -> (i32, i32) {
    %c0_i32 = arith.constant 0 : i32
    %c0_i32_0 = arith.constant 0 : i32
    %c0_i32_1 = arith.constant 0 : i32
    return %c0_i32, %c0_i32_0 : i32, i32
  }
  func.func @transform_3(%arg0: i32) -> (i32, i32, i32, i32) {
    %c0_i32 = arith.constant 0 : i32
    %c0_i32_0 = arith.constant 0 : i32
    %c0_i32_1 = arith.constant 0 : i32
    %c0_i32_2 = arith.constant 0 : i32
    return %arg0, %c0_i32, %c0_i32_0, %c0_i32_1 : i32, i32, i32, i32
  }
}

module attributes {stable_mosaic.version = 11 : i64} {
  func.func @_bn2_add_id_relu_pad_kernel(%arg0: i32, %arg1: memref<1x64x128xbf16, #tpu.memory_space<vmem>>, %arg2: memref<1x10x10x32xbf16, #tpu.memory_space<vmem>>, %arg3: memref<1x32xf32, #tpu.memory_space<vmem>>, %arg4: memref<1x32xf32, #tpu.memory_space<vmem>>, %arg5: memref<1x10x10x32xbf16, #tpu.memory_space<vmem>>) attributes {dimension_semantics = [#tpu.dimension_semantics<parallel>], iteration_bounds = array<i64: 2>, scalar_prefetch = 0 : i64, scratch_operands = 0 : i64, tpu.core_type = #tpu.core_type<tc>, window_params = [{transform_indices = @transform_0, window_bounds = array<i64: 1, 64, 128>}, {transform_indices = @transform_1, window_bounds = array<i64: 1, 10, 10, 32>}, {pipeline_mode = #tpu.pipeline_mode<synchronous>, transform_indices = @transform_2, window_bounds = array<i64: 1, 32>}, {pipeline_mode = #tpu.pipeline_mode<synchronous>, transform_indices = @transform_3, window_bounds = array<i64: 1, 32>}, {transform_indices = @transform_4, window_bounds = array<i64: 1, 10, 10, 32>}]} {
    %c0 = arith.constant 0 : index
    %c0_0 = arith.constant 0 : index
    %c0_1 = arith.constant 0 : index
    %0 = vector.load %arg1[%c0, %c0_0, %c0_1] : memref<1x64x128xbf16, #tpu.memory_space<vmem>>, vector<1x64x128xbf16>
    %1 = vector.shape_cast %0 : vector<1x64x128xbf16> to vector<64x128xbf16>
    %2 = vector.extract_strided_slice %1 {offsets = [0, 0], sizes = [64, 32], strides = [1, 1]} : vector<64x128xbf16> to vector<64x32xbf16>
    %3 = arith.extf %2 : vector<64x32xbf16> to vector<64x32xf32>
    %c0_2 = arith.constant 0 : index
    %c1 = arith.constant 1 : index
    %c1_3 = arith.constant 1 : index
    %c0_4 = arith.constant 0 : index
    %4 = vector.load %arg2[%c0_2, %c1, %c1_3, %c0_4] : memref<1x10x10x32xbf16, #tpu.memory_space<vmem>>, vector<1x8x8x32xbf16>
    %5 = vector.shape_cast %4 : vector<1x8x8x32xbf16> to vector<8x8x32xbf16>
    %6 = arith.extf %5 : vector<8x8x32xbf16> to vector<8x8x32xf32>
    %7 = vector.shape_cast %6 : vector<8x8x32xf32> to vector<64x32xf32>
    %c0_5 = arith.constant 0 : index
    %c0_6 = arith.constant 0 : index
    %8 = vector.load %arg3[%c0_5, %c0_6] : memref<1x32xf32, #tpu.memory_space<vmem>>, vector<1x32xf32>
    %9 = vector.broadcast %8 : vector<1x32xf32> to vector<64x32xf32>
    %10 = arith.mulf %3, %9 : vector<64x32xf32>
    %c0_7 = arith.constant 0 : index
    %c0_8 = arith.constant 0 : index
    %11 = vector.load %arg4[%c0_7, %c0_8] : memref<1x32xf32, #tpu.memory_space<vmem>>, vector<1x32xf32>
    %12 = vector.broadcast %11 : vector<1x32xf32> to vector<64x32xf32>
    %13 = arith.addf %10, %12 : vector<64x32xf32>
    %14 = arith.addf %13, %7 : vector<64x32xf32>
    %cst = arith.constant 0.000000e+00 : f32
    %15 = vector.broadcast %cst : f32 to vector<64x32xf32>
    %16 = arith.maximumf %14, %15 : vector<64x32xf32>
    %cst_9 = arith.constant 0.000000e+00 : bf16
    %17 = vector.broadcast %cst_9 : bf16 to vector<1x10x10x32xbf16>
    %c0_10 = arith.constant 0 : index
    %c0_11 = arith.constant 0 : index
    %c0_12 = arith.constant 0 : index
    %c0_13 = arith.constant 0 : index
    %18 = vector.load %arg5[%c0_10, %c0_11, %c0_12, %c0_13] : memref<1x10x10x32xbf16, #tpu.memory_space<vmem>>, vector<1x10x10x32xbf16>
    tpu.vector_store %arg5[%c0_10, %c0_11, %c0_12, %c0_13], %17 {strides = array<i32>} : memref<1x10x10x32xbf16, #tpu.memory_space<vmem>>, vector<1x10x10x32xbf16>,
    %19 = vector.shape_cast %16 : vector<64x32xf32> to vector<8x8x32xf32>
    %20 = arith.truncf %19 : vector<8x8x32xf32> to vector<8x8x32xbf16>
    %c0_14 = arith.constant 0 : index
    %c1_15 = arith.constant 1 : index
    %c1_16 = arith.constant 1 : index
    %c0_17 = arith.constant 0 : index
    %21 = vector.load %arg5[%c0_14, %c1_15, %c1_16, %c0_17] : memref<1x10x10x32xbf16, #tpu.memory_space<vmem>>, vector<1x8x8x32xbf16>
    %22 = vector.shape_cast %21 : vector<1x8x8x32xbf16> to vector<8x8x32xbf16>
    %23 = vector.shape_cast %20 : vector<8x8x32xbf16> to vector<1x8x8x32xbf16>
    tpu.vector_store %arg5[%c0_14, %c1_15, %c1_16, %c0_17], %23 {strides = array<i32>} : memref<1x10x10x32xbf16, #tpu.memory_space<vmem>>, vector<1x8x8x32xbf16>,
    return
  }
  func.func @transform_0(%arg0: i32) -> (i32, i32, i32) {
    %c0_i32 = arith.constant 0 : i32
    %c0_i32_0 = arith.constant 0 : i32
    %c0_i32_1 = arith.constant 0 : i32
    return %arg0, %c0_i32, %c0_i32_0 : i32, i32, i32
  }
  func.func @transform_1(%arg0: i32) -> (i32, i32, i32, i32) {
    %c0_i32 = arith.constant 0 : i32
    %c0_i32_0 = arith.constant 0 : i32
    %c0_i32_1 = arith.constant 0 : i32
    %c0_i32_2 = arith.constant 0 : i32
    return %arg0, %c0_i32, %c0_i32_0, %c0_i32_1 : i32, i32, i32, i32
  }
  func.func @transform_2(%arg0: i32) -> (i32, i32) {
    %c0_i32 = arith.constant 0 : i32
    %c0_i32_0 = arith.constant 0 : i32
    %c0_i32_1 = arith.constant 0 : i32
    return %c0_i32, %c0_i32_0 : i32, i32
  }
  func.func @transform_3(%arg0: i32) -> (i32, i32) {
    %c0_i32 = arith.constant 0 : i32
    %c0_i32_0 = arith.constant 0 : i32
    %c0_i32_1 = arith.constant 0 : i32
    return %c0_i32, %c0_i32_0 : i32, i32
  }
  func.func @transform_4(%arg0: i32) -> (i32, i32, i32, i32) {
    %c0_i32 = arith.constant 0 : i32
    %c0_i32_0 = arith.constant 0 : i32
    %c0_i32_1 = arith.constant 0 : i32
    %c0_i32_2 = arith.constant 0 : i32
    return %arg0, %c0_i32, %c0_i32_0, %c0_i32_1 : i32, i32, i32, i32
  }
}

</mosaic_0001>

<bundles_post_ra>
// kernel: forward.8
= control target key start
LH: loop header
LB: loop body
LE: loop exit
PB: predicated region body
PF: predicated region fallthrough
CT: control target
= control target key end

     0   :  { %9 = vsyncpa [#allocation3], 0  ;;  %s1192_s0 = inlined_call_operand.hbm [shape: bf16[128,36], index: 0, kind: input, shape index: {}]   ;;  %s1193_s1 = inlined_call_operand.hbm [shape: bf16[36,128], index: 1, kind: input, shape index: {}]   ;;  %s1194_s2 = inlined_call_operand.hbm [shape: bf16[128,128], index: 2, kind: output, shape index: {0}]   ;;  %s1195_s3 = inlined_call_operand.hbm [shape: f32[2,8,128], index: 3, kind: output, shape index: {1}]  }
   0x1   :  { %11 = vsyncpa [#allocation3 + $0x1], 0 }
   0x2   :  { %12 = vsyncpa [#allocation6], 0 }
   0x3   :  { %13 = vsyncpa [#allocation4], 0 }
   0x4   :  { %15 = vsyncpa [#allocation4 + $0x1], 0 }
   0x5   :  { %16 = vsyncpa [#allocation9], 0 }
   0x6   :  { %18 = vsyncpa [#allocation9 + $0x1], 0  ;;  %s936_s12 = smov 0   ;;  %s938_s13 = smov 0  }
   0x7   :  { %s940_s14 = smov 0   ;;  %s942_s15 = smov 0  }
   0x8 LB: > { %s957_s16 = sadd.s32 4294967295, %s906_s15   ;;  %s573_s17 = sadd.s32 4294967294, %s906_s15   ;;  %s906_s15 = sphi %s942_s15, %s1215_s15   ;;  %s902_s14 = sphi %s940_s14, %s1214_s14   ;;  %s898_s13 = sphi %s938_s13, %s1213_s13   ;;  %s894_s12 = sphi %s936_s12, %s1212_s12  }
   0x9   : > { %p44_p0 = scmp.ne.s32.totalorder %s898_s13, %s894_s12  ;;  %p1196_p1 = scmp.eq.s32.totalorder %s957_s16, 0 }
   0xa   : > { %p95_p3 = scmp.eq.s32.totalorder %s573_s17, 1  ;;  %p574_p5 = scmp.ge.s32.totalorder %s906_s15, 1 }
   0xb   : > { %p966_p4 = por %p1196_p1, %p44_p0  ;;  %p128_p7 = scmp.lt.s32.totalorder %s906_s15, 3 }
   0xc   : > { %p971_p6 = por %p95_p3, %p44_p0  ;;  %s908_s21 = smov [#allocation5]  }
   0xd   : > { %s1199_s18 = scalar_select %p966_p4, 1, 0 }
   0xe   : > { %s1200_s19 = scalar_select %p971_p6, 1, 0 }
   0xf   : > { %p976_p8 = pnand %p574_p5, %p128_p7  ;;  %s140_s22 = sshll.u32 %s908_s21, 4  ;;  %s980_s22 = int_to_ptr.vmem [resolvable:$true] %s140_s22 }
  0x10   : > { %s992_s24 = sadd.s32 1, %s906_s15   ;;  %s31_s25 = sadd.s32 1, %s902_s14 }
  0x11   : > { %s1201_s20 = scalar_select %p976_p8, 1, 0 }
  0x12   : > { %p683_p9 = pneg %p976_p8  ;;  %s28_s26 = ssub.s32 %s906_s15, %s992_s24 }
  0x13   : > { %s746_s29 = scalar_lea.hbm %s1193_s1, 320 }
  0x14   : > { %p987_p11 = pnand %p683_p9, %p1196_p1  ;;  %p747_p12 = scmp.ne.s32.totalorder %s1193_s1, %s746_s29 }
  0x15   : > { %p753_p5 = scmp.lt.u32.totalorder %s746_s29, %s1193_s1 }
  0x16   : > { %p748_p13 = pneg %p987_p11 }
  0x18   : > { %p749_p0 = pnand %p748_p13, %p747_p12 }
  0x1a   : > { %p750_p3 = pneg %p749_p0 }
  0x1c   : > { %p755_p7 = pnand %p753_p5, %p750_p3 }
  0x1e   : > { %758 = shalt.err (!%p755_p7)
}
  0x1f   : > { %s759_s7 = scalar_lea.vmem %s980_s22, 320  ;;  %p767_p2 = scmp.lt.s32.totalorder %s980_s22, %s980_s22 }
  0x20   : > { %p760_p9 = scmp.ne.s32.totalorder %s980_s22, %s759_s7  ;;  %p768_p6 = scmp.lt.s32.totalorder %s759_s7, %s759_s7 }
  0x22   : > { %p762_p10 = pnand %p760_p9, %p748_p13  ;;  %p769_p4 = por %p768_p6, %p767_p2 }
  0x24   : > { %p763_p1 = pneg %p762_p10 }
  0x26   : > { %p770_p8 = pnand %p769_p4, %p763_p1 }
  0x28   : > { %773 = shalt.err (!%p770_p8)
}
  0x29   : > { %s909_s8 = smov 64   ;;  %s910_s9 = smov 4  }
  0x2a   : > { %686 = dma.hbm_to_vmem [thread:$0]  (!%p987_p11), %s1193_s1, 320, %s980_s22, [#allocation6], %s909_s8, %s909_s8, %s910_s9  }
  0x2b   : > { %p29_p1 = scmp.eq.s32.totalorder %s28_s26, 0  ;;  %p38_p2 = scmp.ne.s32.totalorder %s902_s14, %s898_s13 }
  0x2c   : > { %p39_p4 = scmp.eq.s32.totalorder %s906_s15, 0  ;;  %p699_p6 = scmp.lt.s32.totalorder %s906_s15, 2 }
  0x2d   : > { %s1026_s17 = scalar_select %p29_p1, %s902_s14, %s31_s25  }
  0x2e   : > { %p40_p8 = por %p39_p4, %p38_p2  ;;  %p1203_p10 = scmp.eq.s32.totalorder %s957_s16, 1 }
  0x2f   : > { %s154_s23 = sand.u32 1, %s902_s14   ;;  %s611_s27 = sshll.u32 %s906_s15, 9 }
  0x30   : > { %p1030_p12 = por %p1203_p10, %p38_p2  ;;  %s577_s28 = sshll.u32 %s154_s23, 5 }
  0x31   : > { %s1039_s4 = scalar_lea.hbm %s1192_s0, %s611_s27  ;;  %s158_s22 = scalar_lea.vmem [#allocation2], %s577_s28 }
  0x32   : > { %s165_s25 = sshll.u32 %s158_s22, 4  ;;  %p1041_p11 = pnand %p699_p6, %p40_p8  ;;  %s1045_s25 = int_to_ptr.vmem [resolvable:$true] %s165_s25 }
  0x33   : > { %s1047_s5 = scalar_lea.sflag [#allocation3], %s154_s23  ;;  %s774_s6 = scalar_lea.hbm %s1039_s4, 512 }
  0x34   : > { %p775_p13 = scmp.ne.s32.totalorder %s1039_s4, %s774_s6  ;;  %p776_p0 = pneg %p1041_p11 }
  0x35   : > { %s779_s11 = scalar_lea.hbm %s1192_s0, 1024  ;;  %p780_p7 = scmp.lt.u32.totalorder %s1039_s4, %s1192_s0 }
  0x36   : > { %p777_p3 = pnand %p776_p0, %p775_p13  ;;  %p781_p9 = scmp.lt.u32.totalorder %s779_s11, %s774_s6 }
  0x37   : > { %p783_p2 = scmp.lt.u32.totalorder %s774_s6, %s1039_s4 }
  0x38   : > { %p778_p5 = pneg %p777_p3  ;;  %p782_p1 = por %p781_p9, %p780_p7 }
  0x3a   : > { %p784_p4 = por %p783_p2, %p782_p1 }
  0x3c   : > { %p785_p6 = pnand %p784_p4, %p778_p5 }
  0x3e   : > { %788 = shalt.err (!%p785_p6)
}
  0x3f   : > { %s789_s23 = scalar_lea.vmem %s1045_s25, 512  ;;  %s911_s29 = smov [#allocation2]  }
  0x40   : > { %p790_p8 = scmp.ne.s32.totalorder %s1045_s25, %s789_s23  ;;  %s794_s30 = sshll.u32 %s911_s29, 4  ;;  %s795_s30 = int_to_ptr.vmem [resolvable:$false] %s794_s30 }
  0x41   : > { %s796_s22 = scalar_lea.vmem %s795_s30, 1024  ;;  %p797_p3 = scmp.lt.s32.totalorder %s1045_s25, %s795_s30 }
  0x42   : > { %p792_p10 = pnand %p790_p8, %p776_p0  ;;  %p798_p7 = scmp.lt.s32.totalorder %s796_s22, %s789_s23 }
  0x44   : > { %p793_p13 = pneg %p792_p10  ;;  %p799_p9 = por %p798_p7, %p797_p3 }
  0x46   : > { %p800_p1 = pnand %p799_p9, %p793_p13 }
  0x48   : > { %803 = shalt.err (!%p800_p1)
}
  0x49   : > { %690 = dma.hbm_to_vmem [thread:$0]  (!%p1041_p11), %s1039_s4, 512, %s1045_s25, %s1047_s5, %s909_s8, %s909_s8, %s910_s9  }
  0x4a   : > { %p1206_p0 = scmp.ne.s32.totalorder %s1201_s20, 0 }
  0x4b   : > { %s1081_s6 = sand.u32 (!%p1206_p0), 1, %s898_s13   ;;  %p1207_p5 = scmp.ne.s32.totalorder (!%p1206_p0), %s1199_s18, 0 }
  0x4c   : > { %177 = sbr.rel (%p1206_p0) target bundleno = 370 (0x172), region = 28  ;;  %s581_s7 = sshll.u32 (!%p1206_p0), %s1081_s6, 5 }
  0x4d   : > { %s180_s10 = scalar_lea.sflag (!%p1206_p0), [#allocation3], %s1081_s6  ;;  %s183_s26 = scalar_lea.vmem (!%p1206_p0), [#allocation2], %s581_s7 }
  0x53   : > { %877 = dma.done.wait (%p1207_p5), %s180_s10, 512  }
  0x54   : > { %879 = vsyncadd (%p1207_p5), %s180_s10, 4294966784  ;;  %p1208_p11 = scmp.eq.s32.totalorder %s957_s16, 0 }
  0x56   : > { %881 = dma.done.wait (%p1208_p11), [#allocation6], 320   ;;  %p1209_p2 = pmov %p1208_p11 }
  0x57   : > { %v739_v0 = vld [vmem:[#allocation5] sm:$0xff]   ;;  %v740_v1 = vld [vmem:[#allocation5 + $0x8] sm:$0xff]   ;;  %vm266_vm0 = vcmask 293888   ;;  %v741_v2 = vld [vmem:[#allocation5 + $0x10] ss:$0 sps:$4 sm:$0x33]  }
  0x58   : > { %883 = vsyncadd (%p1209_p2), [#allocation6], 4294966976  ;;  %651 = vmatprep.subr.bf16.mxu0 %v739_v0  ;;  %665 = vmatprep.subr.bf16.mxu1 %v739_v0  ;;  %v742_v3 = vld [vmem:[%s183_s26] sm:$0xff]   ;;  %vm279_vm1 = vcmask 1041408   ;;  %v744_v4 = vld [vmem:[%s183_s26 + $0x10] sm:$0xff]   ;;  %s207_s18 = scalar_lea.vmem [#allocation7], %s581_s7 }
  0x59   : > { %652 = vmatpush3.bf16.msra.mxu0 %v739_v0  ;;  %668 = vmatpush3.bf16.msra.mxu1 %v739_v0  ;;  %v281_v5 = vsel %vm279_vm1, %v741_v2, 0  ;;  %v743_v6 = vld [vmem:[%s183_s26 + $0x8] sm:$0xff]   ;;  %v745_v7 = vld [vmem:[%s183_s26 + $0x18] sm:$0xff]   ;;  %s445_s20 = sshll.u32 %s207_s18, 4  ;;  %s620_s8 = sshll.u32 %s957_s16, 9  ;;  %s1107_s20 = int_to_ptr.vmem [resolvable:$true] %s445_s20 }
  0x5a   : > { %653 = vmatprep.subr.bf16.mxu0 %v740_v1  ;;  %666 = vmatprep.subr.bf16.mxu1 %v740_v1  ;;  %s1113_s25 = scalar_lea.hbm %s1194_s2, %s620_s8  ;;  %s427_s5 = scalar_lea.sflag [#allocation4], %s1081_s6 }
  0x5b   : > { %657 = vmatprep.mubr.msk.bf16.mxu0 %vm266_vm0, %v742_v3  ;;  %661 = vmatprep.mubr.msk.bf16.mxu1 %vm266_vm0, %v744_v4  ;;  %s804_s11 = scalar_lea.vmem %s1107_s20, 512  ;;  %s912_s27 = smov [#allocation7]  }
  0x5c   : > { %p805_p4 = scmp.ne.s32.totalorder %s1107_s20, %s804_s11  ;;  %s808_s28 = sshll.u32 %s912_s27, 4  ;;  %s809_s28 = int_to_ptr.vmem [resolvable:$false] %s808_s28 }
  0x5d   : > { %654 = vmatpush3.bf16.msra.mxu0 %v740_v1  ;;  %669 = vmatpush3.bf16.msra.mxu1 %v740_v1  ;;  %s810_s23 = scalar_lea.vmem %s809_s28, 1024  ;;  %p811_p10 = scmp.lt.s32.totalorder %s1107_s20, %s809_s28 }
  0x5e   : > { %671 = vmatprep.subr.msk.bf16.mxu0 %vm279_vm1, %v741_v2  ;;  %672 = vmatprep.subr.msk.bf16.mxu1 %vm279_vm1, %v741_v2  ;;  %p806_p6 = pnand %p805_p4, %p1030_p12  ;;  %p812_p13 = scmp.lt.s32.totalorder %s810_s23, %s804_s11 }
  0x60   : > { %p807_p8 = pneg %p806_p6  ;;  %p813_p3 = por %p812_p13, %p811_p10 }
  0x61   : > { %656 = vmatpush3.bf16.msra.mxu0 %v281_v5  ;;  %670 = vmatpush3.bf16.msra.mxu1 %v281_v5 }
  0x62   : > { %p814_p7 = pnand %p813_p3, %p807_p8 }
  0x64   : > { %658 = vmatmul.mubr.msk.bf16.vlgmr.msra.gmra.mrb[0].mxu0 %vm266_vm0, %v743_v6  ;;  %662 = vmatmul.mubr.msk.bf16.vlgmr.msra.gmra.mrb[0].mxu1 %vm266_vm0, %v745_v7 }
 0x137   : > { %v659_v8 = vpop.f32.mrb[0].mxu0  ;;  %v1104_v9 = vpop.f32.mrb[0].mxu1 }
 0x138   : > { %v317_v10 = vpop.f32.mrb[1].mxu0  ;;  %v333_v11 = vpop.f32.mrb[1].mxu1  ;;  %v403_v23 = vmul.f32 %v659_v8, %v659_v8 }
 0x139   : > { %v660_v12 = vpop.f32.mrb[2].mxu0  ;;  %v664_v13 = vpop.f32.mrb[2].mxu1  ;;  %v401_v14 = vmul.f32 %v317_v10, %v317_v10 }
 0x13a   : > { %v629_v15 = vpack.c.bf16 %v660_v12, %v659_v8  ;;  %v320_v16 = vpop.f32.mrb[3].mxu0  ;;  %v639_v17 = vpack.c.bf16 %v664_v13, %v1104_v9  ;;  %v336_v18 = vpop.f32.mrb[3].mxu1 }
 0x13b   : > { %v624_v19 = vpack.c.bf16 %v320_v16, %v317_v10  ;;  %v388_v20 = vadd.f32 %v320_v16, %v317_v10  ;;  %v402_v21 = vmul.f32 %v320_v16, %v320_v16  ;;  %v634_v22 = vpack.c.bf16 %v336_v18, %v333_v11 }
 0x13c   : > { %641 = vst [vmem:[%s207_s18 + $0x8] sm:$0xff] %v629_v15   ;;  %643 = vst [vmem:[%s207_s18 + $0x18] sm:$0xff] %v639_v17  }
 0x13d   : > { %625 = vst [vmem:[%s207_s18] sm:$0xff] %v624_v19   ;;  %v389_v24 = vadd.f32 %v659_v8, %v388_v20  ;;  %v409_v25 = vadd.f32 %v402_v21, %v401_v14  ;;  %642 = vst [vmem:[%s207_s18 + $0x10] sm:$0xff] %v634_v22  }
 0x13e   : > { %817 = shalt.err (!%p814_p7)
}
 0x13f   : > { %s818_s29 = scalar_lea.hbm %s1113_s25, 512  ;;  %s822_s7 = scalar_lea.hbm %s1194_s2, 1024 }
 0x140   : > { %p819_p9 = scmp.ne.s32.totalorder %s1113_s25, %s818_s29  ;;  %p823_p5 = scmp.lt.u32.totalorder %s1113_s25, %s1194_s2 }
 0x141   : > { %p824_p11 = scmp.lt.u32.totalorder %s822_s7, %s818_s29  ;;  %p826_p4 = scmp.lt.u32.totalorder %s818_s29, %s1113_s25 }
 0x142   : > { %p820_p1 = pnand %p819_p9, %p1030_p12 }
 0x143   : > { %p825_p2 = por %p824_p11, %p823_p5 }
 0x144   : > { %p821_p0 = pneg %p820_p1 }
 0x145   : > { %p827_p6 = por %p826_p4, %p825_p2 }
 0x147   : > { %p828_p8 = pnand %p827_p6, %p821_p0 }
 0x149   : > { %831 = shalt.err (!%p828_p8)
}
 0x14a   : > { %s913_s18 = smov 64   ;;  %s914_s8 = smov 4   ;;  %v404_v26 = vmul.f32 %v660_v12, %v660_v12  ;;  %v410_v27 = vadd.f32 %v409_v25, %v403_v23  ;;  %v390_v28 = vadd.f32 %v660_v12, %v389_v24  ;;  %v405_v29 = vmul.f32 %v333_v11, %v333_v11 }
 0x14b   : > { %679 = dma.vmem_to_hbm [thread:$0]  (%p1030_p12), %s1107_s20, 512, %s1113_s25, %s427_s5, %s913_s18, %s913_s18, %s914_s8   ;;  %v406_v34 = vmul.f32 %v336_v18, %v336_v18  ;;  %v407_v35 = vmul.f32 %v1104_v9, %v1104_v9  ;;  %v408_v38 = vmul.f32 %v664_v13, %v664_v13  ;;  %vm422_vm2 = vcmask 1040384  }
 0x14c   : > { %v391_v30 = vadd.f32 %v390_v28, %v333_v11  ;;  %v411_v31 = vadd.f32 %v410_v27, %v404_v26  ;;  %s584_s20 = sshll.u32 %s1081_s6, 3  ;;  %s608_s9 = sshll.u32 %s957_s16, 7 }
 0x14d   : > { %s214_s4 = scalar_lea.vmem [#allocation8], %s584_s20  ;;  %s1147_s27 = scalar_lea.hbm %s1195_s3, %s608_s9 }
 0x14e   : > { %v412_v32 = vadd.f32 %v411_v31, %v405_v29  ;;  %v392_v33 = vadd.f32 %v391_v30, %v336_v18  ;;  %s461_s25 = sshll.u32 %s214_s4, 4  ;;  %s432_s28 = scalar_lea.sflag [#allocation9], %s1081_s6  ;;  %s1149_s25 = int_to_ptr.vmem [resolvable:$true] %s461_s25 }
 0x14f   : > { %s832_s16 = scalar_lea.vmem %s1149_s25, 128  ;;  %s915_s23 = smov [#allocation8]  }
 0x150   : > { %v393_v36 = vadd.f32 %v1104_v9, %v392_v33  ;;  %v413_v37 = vadd.f32 %v412_v32, %v406_v34  ;;  %p833_p10 = scmp.ne.s32.totalorder %s1149_s25, %s832_s16  ;;  %s836_s29 = sshll.u32 %s915_s23, 4  ;;  %s837_s29 = int_to_ptr.vmem [resolvable:$false] %s836_s29 }
 0x151   : > { %s838_s30 = scalar_lea.vmem %s837_s29, 256  ;;  %p839_p7 = scmp.lt.s32.totalorder %s1149_s25, %s837_s29 }
 0x152   : > { %v394_v39 = vadd.f32 %v664_v13, %v393_v36  ;;  %v414_v40 = vadd.f32 %v413_v37, %v407_v35  ;;  %p834_p13 = pnand %p833_p10, %p1030_p12  ;;  %p840_p9 = scmp.lt.s32.totalorder %s838_s30, %s832_s16 }
 0x154   : > { %v395_v41 = vrot.slane %v394_v39, 4  ;;  %v415_v42 = vadd.f32 %v414_v40, %v408_v38  ;;  %p835_p3 = pneg %p834_p13  ;;  %p841_p1 = por %p840_p9, %p839_p7 }
 0x156   : > { %v396_v43 = vadd.f32 %v395_v41, %v394_v39  ;;  %v416_v44 = vrot.slane %v415_v42, 4  ;;  %p842_p0 = pnand %p841_p1, %p835_p3 }
 0x158   : > { %v397_v45 = vrot.slane %v396_v43, 2  ;;  %v417_v46 = vadd.f32 %v416_v44, %v415_v42 }
 0x15a   : > { %v398_v47 = vadd.f32 %v397_v45, %v396_v43  ;;  %v418_v48 = vrot.slane %v417_v46, 2 }
 0x15c   : > { %v399_v49 = vrot.slane %v398_v47, 1  ;;  %v419_v50 = vadd.f32 %v418_v48, %v417_v46 }
 0x15e   : > { %v420_v51 = vrot.slane %v419_v50, 1  ;;  %v400_v52 = vadd.f32 %v399_v49, %v398_v47 }
 0x160   : > { %v421_v53 = vadd.f32 %v420_v51, %v419_v50 }
 0x162   : > { %v423_v54 = vsel %vm422_vm2, %v400_v52, %v421_v53 }
 0x163   : > { %v424_v55 = vsel %vm279_vm1, %v423_v54, 0.0 }
 0x164   : > { %425 = vst [vmem:[%s214_s4] sm:$0xff] %v424_v55 }
 0x165   : > { %845 = shalt.err (!%p842_p0)
}
 0x166   : > { %s846_s6 = scalar_lea.hbm %s1147_s27, 128  ;;  %s850_s10 = scalar_lea.hbm %s1195_s3, 256 }
 0x167   : > { %p847_p5 = scmp.ne.s32.totalorder %s1147_s27, %s846_s6  ;;  %p851_p4 = scmp.lt.u32.totalorder %s1147_s27, %s1195_s3 }
 0x168   : > { %p852_p6 = scmp.lt.u32.totalorder %s850_s10, %s846_s6  ;;  %p854_p10 = scmp.lt.u32.totalorder %s846_s6, %s1147_s27 }
 0x169   : > { %p848_p11 = pnand %p847_p5, %p1030_p12 }
 0x16a   : > { %p853_p8 = por %p852_p6, %p851_p4 }
 0x16b   : > { %p849_p2 = pneg %p848_p11 }
 0x16c   : > { %p855_p13 = por %p854_p10, %p853_p8 }
 0x16e   : > { %p856_p3 = pnand %p855_p13, %p849_p2 }
 0x170   : > { %859 = shalt.err (!%p856_p3)
}
 0x171   : > { %680 = dma.vmem_to_hbm [thread:$0]  (%p1030_p12), %s1149_s25, 128, %s1147_s27, %s432_s28  }
 0x172 PF: > { %s473_s8 = sand.u32 1, %s894_s12   ;;  %p1210_p7 = scmp.ne.s32.totalorder %s1200_s19, 0 }
 0x173   : > { %p1211_p9 = scmp.ge.s32.totalorder %s906_s15, 2  ;;  %s474_s20 = scalar_lea.sflag [#allocation4], %s473_s8 }
 0x175   : > { %p692_p1 = pnand %p1211_p9, %p1210_p7 }
 0x177   : > { %885 = dma.done.wait (!%p692_p1), %s474_s20, 512  }
 0x178   : > { %887 = vsyncadd (!%p692_p1), %s474_s20, 4294966784  ;;  %s483_s9 = scalar_lea.sflag [#allocation9], %s473_s8 }
 0x179   : > { %889 = dma.done.wait (!%p692_p1), %s483_s9, 128  }
 0x17a   : > { %891 = vsyncadd (!%p692_p1), %s483_s9, 4294967168  ;;  %p21_p12 = scmp.ge.s32.totalorder %s992_s24, 4   ;;  %s1212_s12 = smov %s898_s13 }
 0x17b   : > { %s1213_s13 = smov %s902_s14  ;;  %s1214_s14 = smov %s1026_s17 }
 0x17c   : > { %s1215_s15 = smov %s992_s24  ;;  %23 = sbr.rel (!%p21_p12) target bundleno = 8 (0x8), region = 94 }
 0x183   :  { %488 = vsyncpa [#allocation3], 1 }
 0x184   :  { %490 = vsyncpa [#allocation3 + $0x1], 1 }
 0x185   :  { %491 = vsyncpa [#allocation6], 1 }
 0x186   :  { %492 = vsyncpa [#allocation4], 1 }
 0x187   :  { %494 = vsyncpa [#allocation4 + $0x1], 1 }
 0x188   :  { %495 = vsyncpa [#allocation9], 1 }
 0x189   :  { %497 = vsyncpa [#allocation9 + $0x1], 1 }

// kernel: forward.9
= control target key start
LH: loop header
LB: loop body
LE: loop exit
PB: predicated region body
PF: predicated region fallthrough
CT: control target
= control target key end

     0   :  { %8 = vsyncpa [#allocation3], 0  ;;  %s946_s0 = inlined_call_operand.vmem [shape: bf16[2,64,128], index: 0, kind: input, shape index: {}]   ;;  %s947_s1 = inlined_call_operand.vmem [shape: f32[1,32], index: 1, kind: input, shape index: {}]   ;;  %s948_s2 = inlined_call_operand.vmem [shape: f32[1,32], index: 2, kind: input, shape index: {}]   ;;  %s949_s3 = inlined_call_operand.hbm [shape: bf16[2,10,10,32], index: 3, kind: output, shape index: {}]  }
   0x1   :  { %10 = vsyncpa [#allocation3 + $0x1], 0  ;;  %s700_s12 = smov 0   ;;  %s702_s13 = smov 0  }
   0x2   :  { %s704_s14 = smov 0   ;;  %s706_s15 = smov 0  }
   0x3 LB: > { %s721_s16 = sadd.s32 4294967295, %s674_s15   ;;  %s489_s17 = sadd.s32 4294967294, %s674_s15   ;;  %s674_s15 = sphi %s706_s15, %s959_s15   ;;  %s670_s14 = sphi %s704_s14, %s958_s14   ;;  %s666_s13 = sphi %s702_s13, %s957_s13   ;;  %s662_s12 = sphi %s700_s12, %s956_s12  }
   0x4   : > { %s725_s18 = sadd.s32 1, %s674_s15   ;;  %s91_s19 = sadd.s32 1, %s670_s14 }
   0x5   : > { %s88_s20 = ssub.s32 %s674_s15, %s725_s18  ;;  %p101_p0 = scmp.ne.s32.totalorder %s670_s14, %s666_s13 }
   0x6   : > { %p89_p1 = scmp.eq.s32.totalorder %s88_s20, 0  ;;  %p102_p2 = scmp.eq.s32.totalorder %s721_s16, 1 }
   0x7   : > { %p107_p3 = scmp.ne.s32.totalorder %s666_s13, %s662_s12  ;;  %p108_p4 = scmp.eq.s32.totalorder %s489_s17, 1 }
   0x8   : > { %s736_s21 = scalar_select %p89_p1, %s670_s14, %s91_s19  }
   0x9   : > { %p738_p5 = por %p102_p2, %p101_p0  ;;  %p742_p6 = por %p108_p4, %p107_p3 }
   0xa   : > { %p492_p7 = scmp.ge.s32.totalorder %s674_s15, 1  ;;  %p140_p8 = scmp.lt.s32.totalorder %s674_s15, 3 }
   0xc   : > { %p141_p9 = pnand %p492_p7, %p140_p8 }
   0xd   : > { %s161_s24 = sand.u32 (!%p141_p9), 1, %s666_s13   ;;  %p164_p10 = scmp.lt.s32.totalorder (!%p141_p9), %s721_s16, 1  ;;  %vm224_vm0 = vcmask (!%p141_p9), 257024   ;;  %vm226_vm1 = vcmask (!%p141_p9), 253952   ;;  %v676_v0 = vmov (!%p141_p9), 0  }
   0xe   : > { %144 = sbr.rel (%p141_p9) target bundleno = 68 (0x44), region = 32  ;;  %v495_v1 = vld [vmem:[%s947_s1] ss:$0 sm:$0xff] (!%p141_p9)  ;;  %vm360_vm2 = vsmask.f32 (!%p141_p9), 7938  ;;  %s905_s19 = scalar_lea.sflag (!%p141_p9), [#allocation3], %s161_s24 }
   0xf   : > { %s568_s25 = smul.u32 (!%p141_p9), 80, %s161_s24  ;;  %v496_v10 = vld [vmem:[%s948_s2] ss:$0 sm:$0xff] (!%p141_p9)  ;;  %vm366_vm3 = vsmask.f32 (!%p141_p9), 256  ;;  %vm820_vm4 = vmand (!%p141_p9), %vm224_vm0, %vm360_vm2 }
  0x10   : > { %vm829_vm5 = vmand (!%p141_p9), %vm226_vm1, %vm366_vm3  ;;  %s569_s9 = smul.u32 (!%p141_p9), 1280, %s721_s16 }
  0x11   : > { %s753_s27 = scalar_lea.vmem (!%p141_p9), [#allocation2], %s568_s25  ;;  %s677_s25 = smov (!%p141_p9), [#allocation2]  }
  0x12   : > { %228 = vst.msk [vmem:[%s753_s27 + $0x8] sm:$0xf] (!%p141_p9), %vm224_vm0, %v676_v0  ;;  %225 = vst.msk [vmem:[%s753_s27] sm:$0xf] (!%p141_p9), %vm224_vm0, %v676_v0  ;;  %s427_s10 = sshll.u32 (!%p141_p9), %s753_s27, 4  ;;  %s887_s17 = scalar_lea.hbm (!%p141_p9), %s949_s3, %s569_s9  ;;  %s889_s10 = int_to_ptr.vmem [resolvable:$true] %s427_s10 }
  0x13   : > { %230 = vst.msk [vmem:[%s753_s27 + $0x10] sm:$0xf] (!%p141_p9), %vm224_vm0, %v676_v0  ;;  %232 = vst.msk [vmem:[%s753_s27 + $0x18] sm:$0xf] (!%p141_p9), %vm224_vm0, %v676_v0  ;;  %s612_s20 = scalar_lea.vmem (!%p141_p9), %s889_s10, 1280 }
  0x14   : > { %234 = vst.msk [vmem:[%s753_s27 + $0x20] sm:$0xf] (!%p141_p9), %vm224_vm0, %v676_v0  ;;  %236 = vst.msk [vmem:[%s753_s27 + $0x28] sm:$0xf] (!%p141_p9), %vm224_vm0, %v676_v0  ;;  %p613_p11 = scmp.ne.s32.totalorder (!%p141_p9), %s889_s10, %s612_s20 }
  0x15   : > { %s165_s26 = scalar_select %p164_p10, %s721_s16, 1  ;;  %238 = vst.msk [vmem:[%s753_s27 + $0x30] sm:$0xf] %vm224_vm0, %v676_v0  ;;  %240 = vst.msk [vmem:[%s753_s27 + $0x38] sm:$0xf] %vm224_vm0, %v676_v0 }
  0x16   : > { %242 = vst.msk [vmem:[%s753_s27 + $0x40] sm:$0xf] %vm224_vm0, %v676_v0  ;;  %244 = vst.msk [vmem:[%s753_s27 + $0x48] sm:$0xf] %vm224_vm0, %v676_v0  ;;  %p614_p12 = pnand %p613_p11, %p738_p5 }
  0x17   : > { %229 = vst.msk [vmem:[%s753_s27 + $0xc] sm:$0x1] %vm226_vm1, %v676_v0  ;;  %227 = vst.msk [vmem:[%s753_s27 + $0x4] sm:$0x1] %vm226_vm1, %v676_v0  ;;  %s540_s28 = sshll.u32 %s165_s26, 5  ;;  %s616_s26 = sshll.u32 %s677_s25, 4  ;;  %s617_s26 = int_to_ptr.vmem [resolvable:$false] %s616_s26 }
  0x18   : > { %231 = vst.msk [vmem:[%s753_s27 + $0x14] sm:$0x1] %vm226_vm1, %v676_v0  ;;  %233 = vst.msk [vmem:[%s753_s27 + $0x1c] sm:$0x1] %vm226_vm1, %v676_v0  ;;  %s168_s4 = scalar_lea.vmem %s946_s0, %s540_s28  ;;  %p615_p13 = pneg %p614_p12 }
  0x19   : > { %235 = vst.msk [vmem:[%s753_s27 + $0x24] sm:$0x1] %vm226_vm1, %v676_v0  ;;  %237 = vst.msk [vmem:[%s753_s27 + $0x2c] sm:$0x1] %vm226_vm1, %v676_v0  ;;  %v550_v2 = vld [vmem:[%s168_s4] sm:$0xff]   ;;  %v565_v3 = vld [vmem:[%s168_s4 + $0x8] sm:$0xff]   ;;  %p619_p0 = scmp.lt.s32.totalorder %s889_s10, %s617_s26 }
  0x1a   : > { %239 = vst.msk [vmem:[%s753_s27 + $0x34] sm:$0x1] %vm226_vm1, %v676_v0  ;;  %241 = vst.msk [vmem:[%s753_s27 + $0x3c] sm:$0x1] %vm226_vm1, %v676_v0  ;;  %v566_v4 = vld [vmem:[%s168_s4 + $0x10] sm:$0xff]   ;;  %v551_v5 = vunpack.c.l.bf16 %v550_v2  ;;  %v552_v6 = vunpack.c.h.bf16 %v550_v2  ;;  %v555_v7 = vunpack.c.l.bf16 %v565_v3  ;;  %v556_v8 = vunpack.c.h.bf16 %v565_v3  ;;  %v567_v9 = vld [vmem:[%s168_s4 + $0x18] sm:$0xff]  }
  0x1b   : > { %243 = vst.msk [vmem:[%s753_s27 + $0x44] sm:$0x1] %vm226_vm1, %v676_v0  ;;  %245 = vst.msk [vmem:[%s753_s27 + $0x4c] sm:$0x1] %vm226_vm1, %v676_v0  ;;  %v559_v11 = vunpack.c.l.bf16 %v566_v4  ;;  %v560_v12 = vunpack.c.h.bf16 %v566_v4  ;;  %v563_v13 = vunpack.c.l.bf16 %v567_v9  ;;  %v564_v14 = vunpack.c.h.bf16 %v567_v9  ;;  %v505_v49 = vld [vmem:[%s753_s27 + $0x8] sm:$0xf] }
  0x1c   : > { %v193_v15 = vmul.f32 %v551_v5, %v495_v1  ;;  %v194_v16 = vmul.f32 %v552_v6, %v495_v1  ;;  %v195_v17 = vmul.f32 %v555_v7, %v495_v1  ;;  %v196_v18 = vmul.f32 %v556_v8, %v495_v1  ;;  %v509_v51 = vld [vmem:[%s753_s27 + $0x10] sm:$0xf]  ;;  %v513_v60 = vld [vmem:[%s753_s27 + $0x18] sm:$0xf]  ;;  %v517_v9 = vld [vmem:[%s753_s27 + $0x20] sm:$0xf] }
  0x1d   : > { %v197_v19 = vmul.f32 %v559_v11, %v495_v1  ;;  %v198_v20 = vmul.f32 %v560_v12, %v495_v1  ;;  %v199_v21 = vmul.f32 %v563_v13, %v495_v1  ;;  %v200_v22 = vmul.f32 %v564_v14, %v495_v1  ;;  %s618_s28 = scalar_lea.vmem %s617_s26, 2560 }
  0x1e   : > { %v208_v23 = vadd.f32 %v496_v10, %v193_v15  ;;  %v209_v24 = vadd.f32 %v496_v10, %v194_v16  ;;  %v210_v25 = vadd.f32 %v496_v10, %v195_v17  ;;  %v211_v26 = vadd.f32 %v496_v10, %v196_v18  ;;  %v507_v50 = vld [vmem:[%s753_s27 + $0xc] sm:$0x1]  ;;  %p620_p1 = scmp.lt.s32.totalorder %s618_s28, %s612_s20 }
  0x1f   : > { %v212_v27 = vadd.f32 %v496_v10, %v197_v19  ;;  %v213_v28 = vadd.f32 %v496_v10, %v198_v20  ;;  %v804_v29 = vadd.f32 %v496_v10, %v199_v21  ;;  %v806_v30 = vadd.f32 %v496_v10, %v200_v22  ;;  %v511_v52 = vld [vmem:[%s753_s27 + $0x14] sm:$0x1]  ;;  %v515_v1 = vld [vmem:[%s753_s27 + $0x1c] sm:$0x1] }
  0x20   : > { %v216_v31 = vmax.f32 %v208_v23, 0.0  ;;  %v217_v32 = vmax.f32 %v209_v24, 0.0  ;;  %v218_v33 = vmax.f32 %v210_v25, 0.0  ;;  %v219_v34 = vmax.f32 %v211_v26, 0.0  ;;  %v519_v10 = vld [vmem:[%s753_s27 + $0x24] sm:$0x1]  ;;  %p621_p2 = por %p620_p1, %p619_p0 }
  0x21   : > { %v220_v35 = vmax.f32 %v212_v27, 0.0  ;;  %v221_v36 = vmax.f32 %v213_v28, 0.0  ;;  %v222_v43 = vmax.f32 %v804_v29, 0.0  ;;  %v223_v44 = vmax.f32 %v806_v30, 0.0  ;;  %v521_v24 = vld [vmem:[%s753_s27 + $0x28] sm:$0xf] }
  0x22   : > { %v541_v37 = vpack.c.bf16 %v216_v31, %v216_v31  ;;  %v542_v38 = vpack.c.bf16 %v217_v32, %v217_v32  ;;  %v543_v39 = vpack.c.bf16 %v218_v33, %v218_v33  ;;  %v544_v40 = vpack.c.bf16 %v219_v34, %v219_v34  ;;  %v523_v28 = vld [vmem:[%s753_s27 + $0x2c] sm:$0x1]  ;;  %v525_v29 = vld [vmem:[%s753_s27 + $0x30] sm:$0xf]  ;;  %v527_v30 = vld [vmem:[%s753_s27 + $0x34] sm:$0x1]  ;;  %p622_p3 = pnand %p621_p2, %p615_p13 }
  0x23   : > { %v808_v41 = vpack.c.bf16 %v220_v35, %v220_v35  ;;  %v810_v42 = vpack.c.bf16 %v221_v36, %v221_v36  ;;  %v547_v26 = vpack.c.bf16 %v222_v43, %v222_v43  ;;  %v548_v27 = vpack.c.bf16 %v223_v44, %v223_v44  ;;  %v529_v44 = vld [vmem:[%s753_s27 + $0x38] sm:$0xf] }
  0x24   : > { %v279_v45 = vshrl.u32 %v541_v37, 16  ;;  %v282_v46 = vshll.u32 %v541_v37, 16  ;;  %v287_v47 = vshrl.u32 %v542_v38, 16  ;;  %v290_v48 = vshll.u32 %v542_v38, 16 }
  0x25   : > { %v295_v53 = vshrl.u32 %v543_v39, 16  ;;  %v298_v54 = vshll.u32 %v543_v39, 16  ;;  %v303_v55 = vshrl.u32 %v544_v40, 16  ;;  %v306_v56 = vshll.u32 %v544_v40, 16 }
  0x26   : > { %v281_v57 = vrot.slane %v279_v45, 7  ;;  %v289_v59 = vrot.slane %v287_v47, 7  ;;  %v311_v61 = vshrl.u32 %v808_v41, 16  ;;  %v314_v62 = vshll.u32 %v808_v41, 16  ;;  %v533_v47 = vld [vmem:[%s753_s27 + $0x40] sm:$0xf] }
  0x27   : > { %v297_v0 = vrot.slane %v295_v53, 7  ;;  %v305_v2 = vrot.slane %v303_v55, 7  ;;  %v319_v3 = vshrl.u32 %v810_v42, 16  ;;  %v322_v4 = vshll.u32 %v810_v42, 16 }
  0x28   : > { %v284_v5 = vor.u32 %v282_v46, %v281_v57  ;;  %v285_v6 = vrot.slane %v281_v57, 4  ;;  %v292_v7 = vor.u32 %v290_v48, %v289_v59  ;;  %v293_v8 = vrot.slane %v289_v59, 4  ;;  %v531_v46 = vld [vmem:[%s753_s27 + $0x3c] sm:$0x1]  ;;  %v535_v48 = vld [vmem:[%s753_s27 + $0x44] sm:$0x1] }
  0x29   : > { %v300_v11 = vor.u32 %v298_v54, %v297_v0  ;;  %v301_v12 = vrot.slane %v297_v0, 4  ;;  %v308_v13 = vor.u32 %v306_v56, %v305_v2  ;;  %v309_v14 = vrot.slane %v305_v2, 4 }
  0x2a   : > { %v363_v15 = vsel %vm820_vm4, %v284_v5, %v505_v49  ;;  %v369_v16 = vsel %vm829_vm5, %v285_v6, %v507_v50  ;;  %v372_v17 = vsel %vm820_vm4, %v292_v7, %v509_v51  ;;  %v375_v18 = vsel %vm829_vm5, %v293_v8, %v511_v52 }
  0x2b   : > { %506 = vst [vmem:[%s753_s27 + $0x8] sm:$0xf] %v363_v15  ;;  %508 = vst [vmem:[%s753_s27 + $0xc] sm:$0x1] %v369_v16  ;;  %v378_v19 = vsel %vm820_vm4, %v300_v11, %v513_v60  ;;  %v381_v20 = vsel %vm829_vm5, %v301_v12, %v515_v1  ;;  %v384_v21 = vsel %vm820_vm4, %v308_v13, %v517_v9  ;;  %v313_v23 = vrot.slane %v311_v61, 7 }
  0x2c   : > { %510 = vst [vmem:[%s753_s27 + $0x10] sm:$0xf] %v372_v17  ;;  %512 = vst [vmem:[%s753_s27 + $0x14] sm:$0x1] %v375_v18  ;;  %v387_v22 = vsel %vm829_vm5, %v309_v14, %v519_v10  ;;  %v321_v25 = vrot.slane %v319_v3, 7  ;;  %v327_v35 = vshrl.u32 %v547_v26, 16 }
  0x2d   : > { %514 = vst [vmem:[%s753_s27 + $0x18] sm:$0xf] %v378_v19  ;;  %516 = vst [vmem:[%s753_s27 + $0x1c] sm:$0x1] %v381_v20  ;;  %v316_v31 = vor.u32 %v314_v62, %v313_v23  ;;  %v317_v32 = vrot.slane %v313_v23, 4  ;;  %v330_v36 = vshll.u32 %v547_v26, 16 }
  0x2e   : > { %518 = vst [vmem:[%s753_s27 + $0x20] sm:$0xf] %v384_v21  ;;  %520 = vst [vmem:[%s753_s27 + $0x24] sm:$0x1] %v387_v22  ;;  %v324_v33 = vor.u32 %v322_v4, %v321_v25  ;;  %v325_v34 = vrot.slane %v321_v25, 4  ;;  %v335_v37 = vshrl.u32 %v548_v27, 16 }
  0x2f   : > { %v338_v38 = vshll.u32 %v548_v27, 16  ;;  %v390_v39 = vsel %vm820_vm4, %v316_v31, %v521_v24  ;;  %v393_v40 = vsel %vm829_vm5, %v317_v32, %v523_v28  ;;  %v329_v43 = vrot.slane %v327_v35, 7 }
  0x30   : > { %v396_v41 = vsel %vm820_vm4, %v324_v33, %v525_v29  ;;  %v399_v42 = vsel %vm829_vm5, %v325_v34, %v527_v30  ;;  %522 = vst [vmem:[%s753_s27 + $0x28] sm:$0xf] %v390_v39  ;;  %524 = vst [vmem:[%s753_s27 + $0x2c] sm:$0x1] %v393_v40  ;;  %v337_v45 = vrot.slane %v335_v37, 7 }
  0x31   : > { %526 = vst [vmem:[%s753_s27 + $0x30] sm:$0xf] %v396_v41  ;;  %528 = vst [vmem:[%s753_s27 + $0x34] sm:$0x1] %v399_v42  ;;  %v332_v49 = vor.u32 %v330_v36, %v329_v43  ;;  %v333_v50 = vrot.slane %v329_v43, 4 }
  0x32   : > { %v340_v51 = vor.u32 %v338_v38, %v337_v45  ;;  %v341_v52 = vrot.slane %v337_v45, 4 }
  0x33   : > { %v402_v53 = vsel %vm820_vm4, %v332_v49, %v529_v44  ;;  %v405_v54 = vsel %vm829_vm5, %v333_v50, %v531_v46 }
  0x34   : > { %v408_v55 = vsel %vm820_vm4, %v340_v51, %v533_v47  ;;  %v411_v56 = vsel %vm829_vm5, %v341_v52, %v535_v48  ;;  %530 = vst [vmem:[%s753_s27 + $0x38] sm:$0xf] %v402_v53  ;;  %532 = vst [vmem:[%s753_s27 + $0x3c] sm:$0x1] %v405_v54 }
  0x35   : > { %534 = vst [vmem:[%s753_s27 + $0x40] sm:$0xf] %v408_v55  ;;  %536 = vst [vmem:[%s753_s27 + $0x44] sm:$0x1] %v411_v56 }
  0x36   : > { %625 = shalt.err (!%p622_p3)
}
  0x37   : > { %s626_s24 = scalar_lea.hbm %s887_s17, 1280  ;;  %s630_s30 = scalar_lea.hbm %s949_s3, 2560 }
  0x38   : > { %p627_p4 = scmp.ne.s32.totalorder %s887_s17, %s626_s24  ;;  %p631_p9 = scmp.lt.u32.totalorder %s887_s17, %s949_s3 }
  0x39   : > { %p632_p10 = scmp.lt.u32.totalorder %s630_s30, %s626_s24  ;;  %p634_p12 = scmp.lt.u32.totalorder %s626_s24, %s887_s17 }
  0x3a   : > { %p628_p7 = pnand %p627_p4, %p738_p5 }
  0x3b   : > { %p633_p11 = por %p632_p10, %p631_p9 }
  0x3c   : > { %p629_p8 = pneg %p628_p7 }
  0x3d   : > { %p635_p13 = por %p634_p12, %p633_p11 }
  0x3f   : > { %p636_p0 = pnand %p635_p13, %p629_p8 }
  0x41   : > { %639 = shalt.err (!%p636_p0)
}
  0x42   : > { %s678_s6 = smov 64   ;;  %s679_s7 = smov 4  }
  0x43   : > { %570 = dma.vmem_to_hbm [thread:$0]  (%p738_p5), %s889_s10, 1280, %s887_s17, %s905_s19, %s678_s6, %s678_s6, %s679_s7  }
  0x44 PF: > { %p576_p1 = scmp.ge.s32.totalorder %s674_s15, 2  ;;  %s442_s8 = sand.u32 1, %s662_s12  }
  0x45   : > { %s443_s9 = scalar_lea.sflag [#allocation3], %s442_s8 }
  0x46   : > { %p573_p2 = pnand %p576_p1, %p742_p6 }
  0x48   : > { %657 = dma.done.wait (!%p573_p2), %s443_s9, 1280  }
  0x49   : > { %659 = vsyncadd (!%p573_p2), %s443_s9, 4294966016  ;;  %p13_p3 = scmp.ge.s32.totalorder %s725_s18, 4   ;;  %s956_s12 = smov %s666_s13 }
  0x4a   : > { %s957_s13 = smov %s670_s14  ;;  %s958_s14 = smov %s736_s21 }
  0x4b   : > { %s959_s15 = smov %s725_s18  ;;  %15 = sbr.rel (!%p13_p3) target bundleno = 3 (0x3), region = 68 }
  0x52   :  { %448 = vsyncpa [#allocation3], 1 }
  0x53   :  { %450 = vsyncpa [#allocation3 + $0x1], 1 }

// kernel: forward.11
= control target key start
LH: loop header
LB: loop body
LE: loop exit
PB: predicated region body
PF: predicated region fallthrough
CT: control target
= control target key end

     0   :  { %s1471_s0 = inlined_call_operand.hbm [shape: bf16[2,64,128], index: 0, kind: input, shape index: {}]   ;;  %s1472_s1 = inlined_call_operand.hbm [shape: bf16[2,64,128], index: 1, kind: input, shape index: {}]   ;;  %s1473_s2 = inlined_call_operand.vmem [shape: f32[1,32], index: 2, kind: input, shape index: {}]   ;;  %s1474_s3 = inlined_call_operand.vmem [shape: f32[1,32], index: 3, kind: input, shape index: {}]   ;;  %s1475_s4 = inlined_call_operand.vmem [shape: f32[1,32], index: 4, kind: input, shape index: {}]   ;;  %s1476_s5 = inlined_call_operand.vmem [shape: f32[1,32], index: 5, kind: input, shape index: {}]   ;;  %s1477_s6 = inlined_call_operand.hbm [shape: bf16[2,10,10,32], index: 6, kind: output, shape index: {}]  }
   0x1   :  { %1481 = sst [smem:[#allocation11_spill]] %s1471_s0 }
   0x2   :  { %11 = vsyncpa [#allocation3], 0 }
   0x3   :  { %13 = vsyncpa [#allocation3 + $0x1], 0 }
   0x4   :  { %14 = vsyncpa [#allocation6], 0 }
   0x5   :  { %16 = vsyncpa [#allocation6 + $0x1], 0 }
   0x6   :  { %17 = vsyncpa [#allocation4], 0 }
   0x7   :  { %19 = vsyncpa [#allocation4 + $0x1], 0  ;;  %s1096_s21 = smov 0   ;;  %s1098_s22 = smov 0  }
   0x8   :  { %s1100_s23 = smov 0   ;;  %s1102_s24 = smov 0  }
   0x9 LB: > { %s1117_s25 = sadd.s32 4294967295, %s1049_s24   ;;  %s752_s26 = sadd.s32 4294967294, %s1049_s24   ;;  %s1049_s24 = sphi %s1102_s24, %s1501_s24   ;;  %s1045_s23 = sphi %s1100_s23, %s1500_s23   ;;  %s1041_s22 = sphi %s1098_s22, %s1499_s22   ;;  %s1037_s21 = sphi %s1096_s21, %s1498_s21  }
   0xa   : > { %s1121_s27 = sadd.s32 1, %s1049_s24   ;;  %s32_s28 = sadd.s32 1, %s1045_s23 }
   0xb   : > { %s29_s29 = ssub.s32 %s1049_s24, %s1121_s27  ;;  %p39_p0 = scmp.ne.s32.totalorder %s1045_s23, %s1041_s22 }
   0xc   : > { %p30_p1 = scmp.eq.s32.totalorder %s29_s29, 0  ;;  %p40_p2 = scmp.eq.s32.totalorder %s1049_s24, 0 }
   0xd   : > { %p45_p3 = scmp.ne.s32.totalorder %s1041_s22, %s1037_s21  ;;  %p46_p4 = scmp.eq.s32.totalorder %s1117_s25, 0 }
   0xe   : > { %s1133_s30 = scalar_select %p30_p1, %s1045_s23, %s32_s28  }
   0xf   : > { %p1135_p5 = por %p40_p2, %p39_p0  ;;  %p1139_p6 = por %p46_p4, %p45_p3 }
  0x10   : > { %p179_p7 = scmp.eq.s32.totalorder %s1117_s25, 1  ;;  %p185_p8 = scmp.eq.s32.totalorder %s752_s26, 1 }
  0x11   : > { %s1483_s8 = scalar_select %p1139_p6, 1, 0 }
  0x12   : > { %p878_p10 = scmp.lt.s32.totalorder %s1049_s24, 2  ;;  %p1146_p11 = por %p179_p7, %p39_p0 }
  0x13   : > { %p1150_p12 = por %p185_p8, %p45_p3  ;;  %s1155_s11 = sand.u32 1, %s1045_s23  }
  0x14   : > { %s1484_s9 = scalar_select %p1146_p11, 1, 0 }
  0x15   : > { %s1485_s10 = scalar_select %p1150_p12, 1, 0 }
  0x16   : > { %s811_s12 = sshll.u32 %s1049_s24, 9  ;;  %s755_s13 = sshll.u32 %s1155_s11, 5 }
  0x17   : > { %s1486_s0 = sld [smem:[#allocation11_spill]]  ;;  %s221_s17 = scalar_lea.vmem [#allocation2], %s755_s13 }
  0x18   : > { %s228_s18 = sshll.u32 %s221_s17, 4  ;;  %p1170_p13 = pnand %p878_p10, %p1135_p5  ;;  %s1174_s18 = int_to_ptr.vmem [resolvable:$true] %s228_s18 }
  0x19   : > { %s218_s20 = scalar_lea.sflag [#allocation3], %s1155_s11 }
  0x1a   : > { %p921_p1 = pneg %p1170_p13 }
  0x1d   : > { %s1164_s16 = scalar_lea.hbm %s1486_s0, %s811_s12  ;;  %s924_s7 = scalar_lea.hbm %s1486_s0, 1024 }
  0x1e   : > { %s919_s26 = scalar_lea.hbm %s1164_s16, 512  ;;  %p925_p4 = scmp.lt.u32.totalorder %s1164_s16, %s1486_s0 }
  0x1f   : > { %p920_p0 = scmp.ne.s32.totalorder %s1164_s16, %s919_s26  ;;  %p926_p5 = scmp.lt.u32.totalorder %s924_s7, %s919_s26 }
  0x20   : > { %p928_p8 = scmp.lt.u32.totalorder %s919_s26, %s1164_s16 }
  0x21   : > { %p922_p2 = pnand %p921_p1, %p920_p0  ;;  %p927_p7 = por %p926_p5, %p925_p4 }
  0x23   : > { %p923_p3 = pneg %p922_p2  ;;  %p929_p10 = por %p928_p8, %p927_p7 }
  0x25   : > { %p930_p9 = pnand %p929_p10, %p923_p3 }
  0x27   : > { %933 = shalt.err (!%p930_p9)
}
  0x28   : > { %s934_s17 = scalar_lea.vmem %s1174_s18, 512  ;;  %s1051_s28 = smov [#allocation2]  }
  0x29   : > { %p935_p0 = scmp.ne.s32.totalorder %s1174_s18, %s934_s17  ;;  %s939_s29 = sshll.u32 %s1051_s28, 4  ;;  %s940_s29 = int_to_ptr.vmem [resolvable:$false] %s939_s29 }
  0x2a   : > { %s941_s14 = scalar_lea.vmem %s940_s29, 1024  ;;  %p942_p11 = scmp.lt.s32.totalorder %s1174_s18, %s940_s29 }
  0x2b   : > { %p937_p2 = pnand %p935_p0, %p921_p1  ;;  %p943_p4 = scmp.lt.s32.totalorder %s941_s14, %s934_s17 }
  0x2d   : > { %p938_p12 = pneg %p937_p2  ;;  %p944_p5 = por %p943_p4, %p942_p11 }
  0x2f   : > { %p945_p7 = pnand %p944_p5, %p938_p12 }
  0x31   : > { %948 = shalt.err (!%p945_p7)
}
  0x32   : > { %s1479_s26 = smov 64   ;;  %s1053_s7 = smov 4  }
  0x33   : > { %870 = dma.hbm_to_vmem [thread:$0]  (!%p1170_p13), %s1164_s16, 512, %s1174_s18, %s218_s20, %s1479_s26, %s1479_s26, %s1053_s7  }
  0x34   : > { %p761_p9 = scmp.ge.s32.totalorder %s1049_s24, 1  ;;  %p257_p11 = scmp.lt.s32.totalorder %s1049_s24, 3 }
  0x35   : > { %s1218_s29 = scalar_lea.hbm %s1472_s1, %s811_s12  ;;  %s242_s14 = scalar_lea.vmem [#allocation5], %s755_s13 }
  0x36   : > { %p1209_p12 = pnand %p761_p9, %p257_p11  ;;  %s249_s0 = sshll.u32 %s242_s14, 4  ;;  %s1222_s0 = int_to_ptr.vmem [resolvable:$true] %s249_s0 }
  0x37   : > { %s239_s16 = scalar_lea.sflag [#allocation6], %s1155_s11  ;;  %s949_s18 = scalar_lea.hbm %s1218_s29, 512 }
  0x38   : > { %p950_p3 = scmp.ne.s32.totalorder %s1218_s29, %s949_s18  ;;  %s954_s12 = scalar_lea.hbm %s1472_s1, 1024 }
  0x39   : > { %p955_p0 = scmp.lt.u32.totalorder %s1218_s29, %s1472_s1  ;;  %p956_p2 = scmp.lt.u32.totalorder %s954_s12, %s949_s18 }
  0x3a   : > { %p952_p8 = pnand %p950_p3, %p921_p1  ;;  %p958_p5 = scmp.lt.u32.totalorder %s949_s18, %s1218_s29 }
  0x3b   : > { %p957_p4 = por %p956_p2, %p955_p0 }
  0x3c   : > { %p953_p10 = pneg %p952_p8 }
  0x3d   : > { %p959_p7 = por %p958_p5, %p957_p4 }
  0x3f   : > { %p960_p9 = pnand %p959_p7, %p953_p10 }
  0x41   : > { %963 = shalt.err (!%p960_p9)
}
  0x42   : > { %s964_s13 = scalar_lea.vmem %s1222_s0, 512  ;;  %s1054_s14 = smov [#allocation5]  }
  0x43   : > { %p965_p11 = scmp.ne.s32.totalorder %s1222_s0, %s964_s13  ;;  %s969_s20 = sshll.u32 %s1054_s14, 4  ;;  %s970_s20 = int_to_ptr.vmem [resolvable:$false] %s969_s20 }
  0x44   : > { %s971_s26 = scalar_lea.vmem %s970_s20, 1024  ;;  %p972_p6 = scmp.lt.s32.totalorder %s1222_s0, %s970_s20 }
  0x45   : > { %p967_p3 = pnand %p965_p11, %p921_p1  ;;  %p973_p0 = scmp.lt.s32.totalorder %s971_s26, %s964_s13 }
  0x47   : > { %p968_p8 = pneg %p967_p3  ;;  %p974_p2 = por %p973_p0, %p972_p6 }
  0x49   : > { %p975_p4 = pnand %p974_p2, %p968_p8 }
  0x4b   : > { %978 = shalt.err (!%p975_p4)
}
  0x4c   : > { %s1489_s18 = smov 64   ;;  %261 = sbr.rel (%p1209_p12) target bundleno = 367 (0x16f), region = 44 }
  0x4d   : > { %873 = dma.hbm_to_vmem [thread:$0]  (!%p1170_p13), %s1218_s29, 512, %s1222_s0, %s239_s16, %s1489_s18, %s1489_s18, %s1053_s7  }
  0x4e   : > { %s1256_s17 = sand.u32 (!%p1209_p12), 1, %s1041_s22   ;;  %p1490_p6 = scmp.ne.s32.totalorder (!%p1209_p12), %s1483_s8, 0 }
  0x4f   : > { %s762_s12 = sshll.u32 (!%p1209_p12), %s1256_s17, 5  ;;  %s264_s28 = scalar_lea.sflag (!%p1209_p12), [#allocation3], %s1256_s17 }
  0x50   : > { %s1260_s19 = scalar_lea.vmem (!%p1209_p12), [#allocation2], %s762_s12 }
  0x53   : > { %1024 = dma.done.wait (%p1490_p6), %s264_s28, 512  }
  0x54   : > { %1026 = vsyncadd (%p1490_p6), %s264_s28, 4294966784  ;;  %s273_s0 = scalar_lea.sflag [#allocation6], %s1256_s17  ;;  %s1267_s11 = scalar_lea.vmem [#allocation5], %s762_s12 }
  0x55   : > { %1028 = dma.done.wait (%p1490_p6), %s273_s0, 512  }
  0x56   : > { %1030 = vsyncadd (%p1490_p6), %s273_s0, 4294966784  ;;  %v766_v0 = vld [vmem:[%s1475_s4] ss:$0 sm:$0xff]  ;;  %s1055_s29 = smov 32   ;;  %s859_s16 = smul.u32 80, %s1256_s17  ;;  %vm453_vm0 = vcmask 257024  }
  0x57   : > { %379 = vrot.lane.b32.xlu0 %v766_v0, %s1055_s29  ;;  %vm455_vm1 = vcmask 253952   ;;  %v1056_v1 = vmov 0   ;;  %v838_v2 = vld [vmem:[%s1267_s11] sm:$0xff]   ;;  %v856_v5 = vld [vmem:[%s1267_s11 + $0x8] sm:$0xff]   ;;  %v857_v11 = vld [vmem:[%s1267_s11 + $0x10] sm:$0xff]   ;;  %s1057_s8 = smov 96  }
  0x58   : > { %s1277_s13 = scalar_lea.vmem [#allocation7], %s859_s16  ;;  %v840_v3 = vunpack.c.h.bf16 %v838_v2  ;;  %v839_v4 = vunpack.c.l.bf16 %v838_v2  ;;  %v843_v9 = vunpack.c.l.bf16 %v856_v5  ;;  %v844_v10 = vunpack.c.h.bf16 %v856_v5  ;;  %v858_v16 = vld [vmem:[%s1267_s11 + $0x18] sm:$0xff]   ;;  %v822_v23 = vld [vmem:[%s1260_s19] sm:$0xff]   ;;  %v853_v27 = vld [vmem:[%s1260_s19 + $0x8] sm:$0xff]   ;;  %s643_s15 = scalar_lea.sflag [#allocation4], %s1256_s17 }
  0x59   : > { %459 = vst.msk [vmem:[%s1277_s13 + $0x10] sm:$0xf] %vm453_vm0, %v1056_v1  ;;  %454 = vst.msk [vmem:[%s1277_s13] sm:$0xf] %vm453_vm0, %v1056_v1  ;;  %v847_v14 = vunpack.c.l.bf16 %v857_v11  ;;  %v848_v15 = vunpack.c.h.bf16 %v857_v11  ;;  %v851_v19 = vunpack.c.l.bf16 %v858_v16  ;;  %v852_v20 = vunpack.c.h.bf16 %v858_v16  ;;  %v764_v26 = vld [vmem:[%s1473_s2] ss:$0 sm:$0xff] }
  0x5a   : > { %460 = vst.msk [vmem:[%s1277_s13 + $0x14] sm:$0x1] %vm455_vm1, %v1056_v1  ;;  %456 = vst.msk [vmem:[%s1277_s13 + $0x4] sm:$0x1] %vm455_vm1, %v1056_v1  ;;  %v824_v24 = vunpack.c.h.bf16 %v822_v23  ;;  %v823_v25 = vunpack.c.l.bf16 %v822_v23  ;;  %v827_v30 = vunpack.c.l.bf16 %v853_v27  ;;  %v828_v31 = vunpack.c.h.bf16 %v853_v27  ;;  %v765_v32 = vld [vmem:[%s1474_s3] ss:$0 sm:$0xff] }
  0x5b   : > { %457 = vst.msk [vmem:[%s1277_s13 + $0x8] sm:$0xf] %vm453_vm0, %v1056_v1  ;;  %461 = vst.msk [vmem:[%s1277_s13 + $0x18] sm:$0xf] %vm453_vm0, %v1056_v1  ;;  %v854_v33 = vld [vmem:[%s1260_s19 + $0x10] sm:$0xff]   ;;  %v855_v38 = vld [vmem:[%s1260_s19 + $0x18] sm:$0xff]  }
  0x5c   : > { %458 = vst.msk [vmem:[%s1277_s13 + $0xc] sm:$0x1] %vm455_vm1, %v1056_v1  ;;  %462 = vst.msk [vmem:[%s1277_s13 + $0x1c] sm:$0x1] %vm455_vm1, %v1056_v1  ;;  %v351_v28 = vmul.f32 %v824_v24, %v764_v26  ;;  %v350_v29 = vmul.f32 %v823_v25, %v764_v26  ;;  %v352_v36 = vmul.f32 %v827_v30, %v764_v26  ;;  %v831_v39 = vunpack.c.l.bf16 %v854_v33  ;;  %v1336_v41 = vld [vmem:[%s1476_s5] ss:$0 sm:$0xff] }
  0x5d   : > { %463 = vst.msk [vmem:[%s1277_s13 + $0x20] sm:$0xf] %vm453_vm0, %v1056_v1  ;;  %465 = vst.msk [vmem:[%s1277_s13 + $0x28] sm:$0xf] %vm453_vm0, %v1056_v1  ;;  %v353_v37 = vmul.f32 %v828_v31, %v764_v26  ;;  %v832_v40 = vunpack.c.h.bf16 %v854_v33  ;;  %v835_v44 = vunpack.c.l.bf16 %v855_v38  ;;  %v836_v45 = vunpack.c.h.bf16 %v855_v38  ;;  %s860_s19 = smul.u32 1280, %s1117_s25  ;;  %s656_s0 = sshll.u32 %s1277_s13, 4  ;;  %s1415_s0 = int_to_ptr.vmem [resolvable:$true] %s656_s0 }
  0x5e   : > { %464 = vst.msk [vmem:[%s1277_s13 + $0x24] sm:$0x1] %vm455_vm1, %v1056_v1  ;;  %466 = vst.msk [vmem:[%s1277_s13 + $0x2c] sm:$0x1] %vm455_vm1, %v1056_v1  ;;  %v366_v34 = vadd.f32 %v765_v32, %v351_v28  ;;  %v365_v35 = vadd.f32 %v765_v32, %v350_v29  ;;  %v367_v48 = vadd.f32 %v765_v32, %v352_v36  ;;  %vm589_vm2 = vsmask.f32 7938 }
  0x5f   : > { %467 = vst.msk [vmem:[%s1277_s13 + $0x30] sm:$0xf] %vm453_vm0, %v1056_v1  ;;  %469 = vst.msk [vmem:[%s1277_s13 + $0x38] sm:$0xf] %vm453_vm0, %v1056_v1  ;;  %v368_v49 = vadd.f32 %v765_v32, %v353_v37  ;;  %v354_v50 = vmul.f32 %v831_v39, %v764_v26  ;;  %v355_v51 = vmul.f32 %v832_v40, %v764_v26  ;;  %vm595_vm3 = vsmask.f32 256  ;;  %s1413_s7 = scalar_lea.hbm %s1477_s6, %s860_s19 }
  0x60   : > { %468 = vst.msk [vmem:[%s1277_s13 + $0x34] sm:$0x1] %vm455_vm1, %v1056_v1  ;;  %470 = vst.msk [vmem:[%s1277_s13 + $0x3c] sm:$0x1] %vm455_vm1, %v1056_v1  ;;  %v356_v56 = vmul.f32 %v835_v44, %v764_v26  ;;  %v357_v57 = vmul.f32 %v836_v45, %v764_v26  ;;  %v780_v16 = vld [vmem:[%s1277_s13 + $0x10] sm:$0xf] }
  0x61   : > { %471 = vst.msk [vmem:[%s1277_s13 + $0x40] sm:$0xf] %vm453_vm0, %v1056_v1  ;;  %473 = vst.msk [vmem:[%s1277_s13 + $0x48] sm:$0xf] %vm453_vm0, %v1056_v1  ;;  %v369_v62 = vadd.f32 %v765_v32, %v354_v50  ;;  %v370_v63 = vadd.f32 %v765_v32, %v355_v51  ;;  %s979_s29 = scalar_lea.vmem %s1415_s0, 1280  ;;  %p1495_p1 = scmp.ne.s32.totalorder %s1484_s9, 0 }
  0x62   : > { %472 = vst.msk [vmem:[%s1277_s13 + $0x44] sm:$0x1] %vm455_vm1, %v1056_v1  ;;  %474 = vst.msk [vmem:[%s1277_s13 + $0x4c] sm:$0x1] %vm455_vm1, %v1056_v1  ;;  %p980_p13 = scmp.ne.s32.totalorder %s1415_s0, %s979_s29  ;;  %s1058_s16 = smov [#allocation7]  }
  0x63   : > { %vm1343_vm4 = vmand %vm453_vm0, %vm589_vm2  ;;  %v778_v23 = vld [vmem:[%s1277_s13 + $0xc] sm:$0x1] }
  0x64   : > { %vm1348_vm5 = vmand %vm455_vm1, %vm595_vm3  ;;  %p981_p12 = pnand %p980_p13, %p1495_p1 }
  0x65   : > { %v790_v50 = vld [vmem:[%s1277_s13 + $0x24] sm:$0x1] }
  0x66   : > { %p982_p10 = pneg %p981_p12 }
  0xc9   : > { %v380_v6 = vpop.permute.xlu0 %379 }
  0xca   : > { %v383_v7 = vmul.f32 %v840_v3, %v380_v6  ;;  %v382_v8 = vmul.f32 %v839_v4, %v380_v6  ;;  %v384_v12 = vmul.f32 %v843_v9, %v380_v6  ;;  %v385_v13 = vmul.f32 %v844_v10, %v380_v6 }
  0xcb   : > { %v386_v17 = vmul.f32 %v847_v14, %v380_v6  ;;  %v387_v18 = vmul.f32 %v848_v15, %v380_v6  ;;  %v388_v21 = vmul.f32 %v851_v19, %v380_v6  ;;  %v389_v22 = vmul.f32 %v852_v20, %v380_v6 }
  0xcc   : > { %400 = vrot.lane.b32.xlu1 %v383_v7, %s1057_s8  ;;  %398 = vrot.lane.b32.xlu0 %v382_v8, %s1057_s8  ;;  %v371_v8 = vadd.f32 %v765_v32, %v356_v56  ;;  %v372_v9 = vadd.f32 %v765_v32, %v357_v57 }
  0xd0   : > { %402 = vrot.lane.b32.xlu1 %v384_v12, %s1057_s8  ;;  %404 = vrot.lane.b32.xlu0 %v385_v13, %s1057_s8 }
  0xd4   : > { %406 = vrot.lane.b32.xlu1 %v386_v17, %s1057_s8  ;;  %408 = vrot.lane.b32.xlu0 %v387_v18, %s1057_s8 }
  0xd8   : > { %410 = vrot.lane.b32.xlu1 %v388_v21, %s1057_s8  ;;  %412 = vrot.lane.b32.xlu0 %v389_v22, %s1057_s8  ;;  %v782_v21 = vld [vmem:[%s1277_s13 + $0x14] sm:$0x1]  ;;  %v776_v22 = vld [vmem:[%s1277_s13 + $0x8] sm:$0xf]  ;;  %s983_s8 = sshll.u32 %s1058_s16, 4  ;;  %s984_s8 = int_to_ptr.vmem [resolvable:$false] %s983_s8 }
  0xd9   : > { %s985_s14 = scalar_lea.vmem %s984_s8, 2560  ;;  %p986_p5 = scmp.lt.s32.totalorder %s1415_s0, %s984_s8 }
  0xda   : > { %p987_p7 = scmp.lt.s32.totalorder %s985_s14, %s979_s29 }
  0xdc   : > { %p988_p9 = por %p987_p7, %p986_p5 }
  0xde   : > { %p989_p11 = pnand %p988_p9, %p982_p10 }
 0x13e   : > { %v401_v42 = vpop.permute.xlu1 %400  ;;  %v399_v43 = vpop.permute.xlu0 %398 }
 0x13f   : > { %v423_v46 = vadd.f32 %v401_v42, %v366_v34  ;;  %v422_v47 = vadd.f32 %v399_v43, %v365_v35  ;;  %v784_v43 = vld [vmem:[%s1277_s13 + $0x18] sm:$0xf] }
 0x141   : > { %v438_v52 = vadd.f32 %v1336_v41, %v423_v46  ;;  %v437_v53 = vadd.f32 %v1336_v41, %v422_v47 }
 0x142   : > { %v403_v54 = vpop.permute.xlu1 %402  ;;  %v405_v55 = vpop.permute.xlu0 %404 }
 0x143   : > { %v446_v58 = vmax.f32 %v438_v52, 0.0  ;;  %v445_v59 = vmax.f32 %v437_v53, 0.0  ;;  %v424_v60 = vadd.f32 %v403_v54, %v367_v48  ;;  %v425_v61 = vadd.f32 %v405_v55, %v368_v49  ;;  %v786_v48 = vld [vmem:[%s1277_s13 + $0x1c] sm:$0x1]  ;;  %v788_v49 = vld [vmem:[%s1277_s13 + $0x20] sm:$0xf] }
 0x145   : > { %v814_v0 = vpack.c.bf16 %v446_v58, %v446_v58  ;;  %v813_v1 = vpack.c.bf16 %v445_v59, %v445_v59  ;;  %v439_v2 = vadd.f32 %v1336_v41, %v424_v60  ;;  %v440_v3 = vadd.f32 %v1336_v41, %v425_v61 }
 0x146   : > { %v407_v4 = vpop.permute.xlu1 %406  ;;  %v409_v5 = vpop.permute.xlu0 %408 }
 0x147   : > { %v516_v6 = vshrl.u32 %v814_v0, 16  ;;  %v508_v7 = vshrl.u32 %v813_v1, 16  ;;  %v447_v11 = vmax.f32 %v439_v2, 0.0  ;;  %v448_v12 = vmax.f32 %v440_v3, 0.0 }
 0x148   : > { %v426_v13 = vadd.f32 %v407_v4, %v369_v62  ;;  %v427_v14 = vadd.f32 %v409_v5, %v370_v63  ;;  %v519_v18 = vshll.u32 %v814_v0, 16  ;;  %v511_v20 = vshll.u32 %v813_v1, 16  ;;  %v792_v4 = vld [vmem:[%s1277_s13 + $0x28] sm:$0xf] }
 0x149   : > { %v518_v17 = vrot.slane %v516_v6, 7  ;;  %v510_v19 = vrot.slane %v508_v7, 7  ;;  %v815_v24 = vpack.c.bf16 %v447_v11, %v447_v11  ;;  %v816_v25 = vpack.c.bf16 %v448_v12, %v448_v12  ;;  %v796_v11 = vld [vmem:[%s1277_s13 + $0x30] sm:$0xf]  ;;  %v798_v12 = vld [vmem:[%s1277_s13 + $0x34] sm:$0x1] }
 0x14a   : > { %v441_v26 = vadd.f32 %v1336_v41, %v426_v13  ;;  %v442_v27 = vadd.f32 %v1336_v41, %v427_v14  ;;  %v411_v36 = vpop.permute.xlu1 %410  ;;  %v413_v37 = vpop.permute.xlu0 %412 }
 0x14b   : > { %v521_v28 = vor.u32 %v519_v18, %v518_v17  ;;  %v522_v29 = vrot.slane %v518_v17, 4  ;;  %v513_v30 = vor.u32 %v511_v20, %v510_v19  ;;  %v514_v31 = vrot.slane %v510_v19, 4 }
 0x14c   : > { %v524_v32 = vshrl.u32 %v815_v24, 16  ;;  %v527_v33 = vshll.u32 %v815_v24, 16  ;;  %v532_v34 = vshrl.u32 %v816_v25, 16  ;;  %v535_v35 = vshll.u32 %v816_v25, 16 }
 0x14d   : > { %v601_v38 = vsel %vm1343_vm4, %v521_v28, %v780_v16  ;;  %v604_v39 = vsel %vm1348_vm5, %v522_v29, %v782_v21  ;;  %v592_v40 = vsel %vm1343_vm4, %v513_v30, %v776_v22  ;;  %v598_v42 = vsel %vm1348_vm5, %v514_v31, %v778_v23 }
 0x14e   : > { %781 = vst [vmem:[%s1277_s13 + $0x10] sm:$0xf] %v601_v38  ;;  %783 = vst [vmem:[%s1277_s13 + $0x14] sm:$0x1] %v604_v39  ;;  %v526_v44 = vrot.slane %v524_v32, 7  ;;  %v534_v45 = vrot.slane %v532_v34, 7  ;;  %v428_v51 = vadd.f32 %v411_v36, %v371_v8  ;;  %v429_v52 = vadd.f32 %v413_v37, %v372_v9 }
 0x14f   : > { %777 = vst [vmem:[%s1277_s13 + $0x8] sm:$0xf] %v592_v40  ;;  %779 = vst [vmem:[%s1277_s13 + $0xc] sm:$0x1] %v598_v42  ;;  %v449_v46 = vmax.f32 %v441_v26, 0.0  ;;  %v450_v47 = vmax.f32 %v442_v27, 0.0 }
 0x150   : > { %v529_v53 = vor.u32 %v527_v33, %v526_v44  ;;  %v530_v54 = vrot.slane %v526_v44, 4  ;;  %v537_v55 = vor.u32 %v535_v35, %v534_v45  ;;  %v538_v56 = vrot.slane %v534_v45, 4  ;;  %v794_v9 = vld [vmem:[%s1277_s13 + $0x2c] sm:$0x1]  ;;  %v800_v26 = vld [vmem:[%s1277_s13 + $0x38] sm:$0xf] }
 0x151   : > { %v817_v57 = vpack.c.bf16 %v449_v46, %v449_v46  ;;  %v818_v58 = vpack.c.bf16 %v450_v47, %v450_v47  ;;  %v443_v59 = vadd.f32 %v1336_v41, %v428_v51  ;;  %v444_v60 = vadd.f32 %v1336_v41, %v429_v52  ;;  %v802_v27 = vld [vmem:[%s1277_s13 + $0x3c] sm:$0x1]  ;;  %v804_v32 = vld [vmem:[%s1277_s13 + $0x40] sm:$0xf]  ;;  %v806_v33 = vld [vmem:[%s1277_s13 + $0x44] sm:$0x1] }
 0x152   : > { %v607_v61 = vsel %vm1343_vm4, %v529_v53, %v784_v43  ;;  %v610_v62 = vsel %vm1348_vm5, %v530_v54, %v786_v48  ;;  %v613_v63 = vsel %vm1343_vm4, %v537_v55, %v788_v49  ;;  %v616_v0 = vsel %vm1348_vm5, %v538_v56, %v790_v50 }
 0x153   : > { %785 = vst [vmem:[%s1277_s13 + $0x18] sm:$0xf] %v607_v61  ;;  %787 = vst [vmem:[%s1277_s13 + $0x1c] sm:$0x1] %v610_v62  ;;  %v540_v41 = vshrl.u32 %v817_v57, 16  ;;  %v548_v1 = vshrl.u32 %v818_v58, 16 }
 0x154   : > { %789 = vst [vmem:[%s1277_s13 + $0x20] sm:$0xf] %v613_v63  ;;  %791 = vst [vmem:[%s1277_s13 + $0x24] sm:$0x1] %v616_v0  ;;  %v451_v2 = vmax.f32 %v443_v59, 0.0  ;;  %v452_v3 = vmax.f32 %v444_v60, 0.0 }
 0x155   : > { %v542_v5 = vrot.slane %v540_v41, 7  ;;  %v543_v6 = vshll.u32 %v817_v57, 16  ;;  %v550_v7 = vrot.slane %v548_v1, 7  ;;  %v551_v8 = vshll.u32 %v818_v58, 16 }
 0x156   : > { %v819_v13 = vpack.c.bf16 %v451_v2, %v451_v2  ;;  %v820_v14 = vpack.c.bf16 %v452_v3, %v452_v3 }
 0x157   : > { %v545_v16 = vor.u32 %v543_v6, %v542_v5  ;;  %v546_v17 = vrot.slane %v542_v5, 4  ;;  %v553_v18 = vor.u32 %v551_v8, %v550_v7  ;;  %v554_v19 = vrot.slane %v550_v7, 4 }
 0x158   : > { %v556_v20 = vshrl.u32 %v819_v13, 16  ;;  %v564_v21 = vshrl.u32 %v820_v14, 16  ;;  %v559_v29 = vshll.u32 %v819_v13, 16  ;;  %v567_v31 = vshll.u32 %v820_v14, 16 }
 0x159   : > { %v619_v22 = vsel %vm1343_vm4, %v545_v16, %v792_v4  ;;  %v622_v23 = vsel %vm1348_vm5, %v546_v17, %v794_v9  ;;  %v625_v24 = vsel %vm1343_vm4, %v553_v18, %v796_v11  ;;  %v628_v25 = vsel %vm1348_vm5, %v554_v19, %v798_v12 }
 0x15a   : > { %793 = vst [vmem:[%s1277_s13 + $0x28] sm:$0xf] %v619_v22  ;;  %795 = vst [vmem:[%s1277_s13 + $0x2c] sm:$0x1] %v622_v23  ;;  %v558_v28 = vrot.slane %v556_v20, 7  ;;  %v566_v30 = vrot.slane %v564_v21, 7 }
 0x15b   : > { %797 = vst [vmem:[%s1277_s13 + $0x30] sm:$0xf] %v625_v24  ;;  %799 = vst [vmem:[%s1277_s13 + $0x34] sm:$0x1] %v628_v25 }
 0x15c   : > { %v561_v34 = vor.u32 %v559_v29, %v558_v28  ;;  %v562_v35 = vrot.slane %v558_v28, 4  ;;  %v569_v36 = vor.u32 %v567_v31, %v566_v30  ;;  %v570_v37 = vrot.slane %v566_v30, 4 }
 0x15e   : > { %v631_v38 = vsel %vm1343_vm4, %v561_v34, %v800_v26  ;;  %v634_v39 = vsel %vm1348_vm5, %v562_v35, %v802_v27  ;;  %v637_v40 = vsel %vm1343_vm4, %v569_v36, %v804_v32  ;;  %v640_v42 = vsel %vm1348_vm5, %v570_v37, %v806_v33 }
 0x15f   : > { %801 = vst [vmem:[%s1277_s13 + $0x38] sm:$0xf] %v631_v38  ;;  %803 = vst [vmem:[%s1277_s13 + $0x3c] sm:$0x1] %v634_v39 }
 0x160   : > { %805 = vst [vmem:[%s1277_s13 + $0x40] sm:$0xf] %v637_v40  ;;  %807 = vst [vmem:[%s1277_s13 + $0x44] sm:$0x1] %v640_v42 }
 0x161   : > { %992 = shalt.err (!%p989_p11)
}
 0x162   : > { %s993_s13 = scalar_lea.hbm %s1413_s7, 1280  ;;  %s997_s18 = scalar_lea.hbm %s1477_s6, 2560 }
 0x163   : > { %p994_p3 = scmp.ne.s32.totalorder %s1413_s7, %s993_s13  ;;  %p998_p2 = scmp.lt.u32.totalorder %s1413_s7, %s1477_s6 }
 0x164   : > { %p999_p4 = scmp.lt.u32.totalorder %s997_s18, %s993_s13  ;;  %p1001_p13 = scmp.lt.u32.totalorder %s993_s13, %s1413_s7 }
 0x165   : > { %p995_p8 = pnand %p994_p3, %p1495_p1 }
 0x166   : > { %p1000_p6 = por %p999_p4, %p998_p2 }
 0x167   : > { %p996_p0 = pneg %p995_p8 }
 0x168   : > { %p1002_p12 = por %p1001_p13, %p1000_p6 }
 0x16a   : > { %p1003_p10 = pnand %p1002_p12, %p996_p0 }
 0x16c   : > { %1006 = shalt.err (!%p1003_p10)
}
 0x16d   : > { %s1059_s19 = smov 64   ;;  %s1060_s25 = smov 4  }
 0x16e   : > { %865 = dma.vmem_to_hbm [thread:$0]  (%p1495_p1), %s1415_s0, 1280, %s1413_s7, %s643_s15, %s1059_s19, %s1059_s19, %s1060_s25  }
 0x16f PF: > { %s671_s11 = sand.u32 1, %s1037_s21   ;;  %p1496_p5 = scmp.ne.s32.totalorder %s1485_s10, 0 }
 0x170   : > { %p1497_p7 = scmp.ge.s32.totalorder %s1049_s24, 2  ;;  %s672_s29 = scalar_lea.sflag [#allocation4], %s671_s11 }
 0x172   : > { %p875_p9 = pnand %p1497_p7, %p1496_p5 }
 0x174   : > { %1032 = dma.done.wait (!%p875_p9), %s672_s29, 1280  }
 0x175   : > { %1034 = vsyncadd (!%p875_p9), %s672_s29, 4294966016  ;;  %p22_p11 = scmp.ge.s32.totalorder %s1121_s27, 4   ;;  %s1498_s21 = smov %s1041_s22 }
 0x176   : > { %s1499_s22 = smov %s1045_s23  ;;  %s1500_s23 = smov %s1133_s30 }
 0x177   : > { %s1501_s24 = smov %s1121_s27  ;;  %24 = sbr.rel (!%p22_p11) target bundleno = 9 (0x9), region = 103 }
 0x17e   :  { %677 = vsyncpa [#allocation3], 1 }
 0x17f   :  { %679 = vsyncpa [#allocation3 + $0x1], 1 }
 0x180   :  { %680 = vsyncpa [#allocation6], 1 }
 0x181   :  { %682 = vsyncpa [#allocation6 + $0x1], 1 }
 0x182   :  { %683 = vsyncpa [#allocation4], 1 }
 0x183   :  { %685 = vsyncpa [#allocation4 + $0x1], 1 }

// kernel: forward.10
= control target key start
LH: loop header
LB: loop body
LE: loop exit
PB: predicated region body
PF: predicated region fallthrough
CT: control target
= control target key end

     0   :  { %9 = vsyncpa [#allocation3], 0  ;;  %s2789_s0 = inlined_call_operand.hbm [shape: bf16[2,10,10,32], index: 0, kind: input, shape index: {}]   ;;  %s2790_s1 = inlined_call_operand.hbm [shape: bf16[9,32,128], index: 1, kind: input, shape index: {}]   ;;  %s2791_s2 = inlined_call_operand.hbm [shape: bf16[2,64,128], index: 2, kind: output, shape index: {0}]   ;;  %s2792_s3 = inlined_call_operand.hbm [shape: f32[2,8,128], index: 3, kind: output, shape index: {1}]  }
   0x1   :  { %11 = vsyncpa [#allocation3 + $0x1], 0 }
   0x2   :  { %12 = vsyncpa [#allocation6], 0 }
   0x3   :  { %13 = vsyncpa [#allocation4], 0 }
   0x4   :  { %15 = vsyncpa [#allocation4 + $0x1], 0 }
   0x5   :  { %16 = vsyncpa [#allocation9], 0 }
   0x6   :  { %18 = vsyncpa [#allocation9 + $0x1], 0  ;;  %s2263_s12 = smov 0   ;;  %s2265_s13 = smov 0  }
   0x7   :  { %s2267_s14 = smov 0   ;;  %s2269_s15 = smov 0  }
   0x8 LB: > { %s2284_s16 = sadd.s32 4294967295, %s2233_s15   ;;  %s1600_s17 = sadd.s32 4294967294, %s2233_s15   ;;  %s2233_s15 = sphi %s2269_s15, %s2816_s15   ;;  %s2229_s14 = sphi %s2267_s14, %s2815_s14   ;;  %s2225_s13 = sphi %s2265_s13, %s2814_s13   ;;  %s2221_s12 = sphi %s2263_s12, %s2813_s12  }
   0x9   : > { %p44_p0 = scmp.ne.s32.totalorder %s2225_s13, %s2221_s12  ;;  %p2793_p1 = scmp.eq.s32.totalorder %s2284_s16, 0 }
   0xa   : > { %p95_p3 = scmp.eq.s32.totalorder %s1600_s17, 1  ;;  %p1601_p5 = scmp.ge.s32.totalorder %s2233_s15, 1 }
   0xb   : > { %p2293_p4 = por %p2793_p1, %p44_p0  ;;  %p128_p7 = scmp.lt.s32.totalorder %s2233_s15, 3 }
   0xc   : > { %p2298_p6 = por %p95_p3, %p44_p0  ;;  %s2235_s21 = smov [#allocation5]  }
   0xd   : > { %s2796_s18 = scalar_select %p2293_p4, 1, 0 }
   0xe   : > { %s2797_s19 = scalar_select %p2298_p6, 1, 0 }
   0xf   : > { %p2303_p8 = pnand %p1601_p5, %p128_p7  ;;  %s140_s22 = sshll.u32 %s2235_s21, 4  ;;  %s2307_s22 = int_to_ptr.vmem [resolvable:$true] %s140_s22 }
  0x10   : > { %s2319_s24 = sadd.s32 1, %s2233_s15   ;;  %s31_s25 = sadd.s32 1, %s2229_s14 }
  0x11   : > { %s2798_s20 = scalar_select %p2303_p8, 1, 0 }
  0x12   : > { %p1990_p9 = pneg %p2303_p8  ;;  %s28_s26 = ssub.s32 %s2233_s15, %s2319_s24 }
  0x13   : > { %s2073_s29 = scalar_lea.hbm %s2790_s1, 2304 }
  0x14   : > { %p2314_p11 = pnand %p1990_p9, %p2793_p1  ;;  %p2074_p12 = scmp.ne.s32.totalorder %s2790_s1, %s2073_s29 }
  0x15   : > { %p2080_p5 = scmp.lt.u32.totalorder %s2073_s29, %s2790_s1 }
  0x16   : > { %p2075_p13 = pneg %p2314_p11 }
  0x18   : > { %p2076_p0 = pnand %p2075_p13, %p2074_p12 }
  0x1a   : > { %p2077_p3 = pneg %p2076_p0 }
  0x1c   : > { %p2082_p7 = pnand %p2080_p5, %p2077_p3 }
  0x1e   : > { %2085 = shalt.err (!%p2082_p7)
}
  0x1f   : > { %s2086_s7 = scalar_lea.vmem %s2307_s22, 2304  ;;  %p2094_p2 = scmp.lt.s32.totalorder %s2307_s22, %s2307_s22 }
  0x20   : > { %p2087_p9 = scmp.ne.s32.totalorder %s2307_s22, %s2086_s7  ;;  %p2095_p6 = scmp.lt.s32.totalorder %s2086_s7, %s2086_s7 }
  0x22   : > { %p2089_p10 = pnand %p2087_p9, %p2075_p13  ;;  %p2096_p4 = por %p2095_p6, %p2094_p2 }
  0x24   : > { %p2090_p1 = pneg %p2089_p10 }
  0x26   : > { %p2097_p8 = pnand %p2096_p4, %p2090_p1 }
  0x28   : > { %2100 = shalt.err (!%p2097_p8)
}
  0x29   : > { %s2236_s8 = smov 64   ;;  %s2237_s9 = smov 4  }
  0x2a   : > { %1993 = dma.hbm_to_vmem [thread:$0]  (!%p2314_p11), %s2790_s1, 2304, %s2307_s22, [#allocation6], %s2236_s8, %s2236_s8, %s2237_s9  }
  0x2b   : > { %p29_p1 = scmp.eq.s32.totalorder %s28_s26, 0  ;;  %p38_p2 = scmp.ne.s32.totalorder %s2229_s14, %s2225_s13 }
  0x2c   : > { %p39_p4 = scmp.eq.s32.totalorder %s2233_s15, 0  ;;  %p2006_p6 = scmp.lt.s32.totalorder %s2233_s15, 2 }
  0x2d   : > { %s2353_s17 = scalar_select %p29_p1, %s2229_s14, %s31_s25  }
  0x2e   : > { %p40_p8 = por %p39_p4, %p38_p2  ;;  %p2800_p10 = scmp.eq.s32.totalorder %s2284_s16, 1 }
  0x2f   : > { %s154_s23 = sand.u32 1, %s2229_s14   ;;  %s1978_s27 = smul.u32 1280, %s2233_s15 }
  0x30   : > { %p2357_p12 = por %p2800_p10, %p38_p2  ;;  %s1977_s28 = smul.u32 80, %s154_s23 }
  0x31   : > { %p2363_p13 = pnand %p2006_p6, %p40_p8  ;;  %s2370_s25 = scalar_lea.hbm %s2789_s0, %s1978_s27 }
  0x32   : > { %s158_s30 = scalar_lea.vmem [#allocation2], %s1977_s28  ;;  %s2374_s5 = scalar_lea.sflag [#allocation3], %s154_s23 }
  0x33   : > { %s165_s4 = sshll.u32 %s158_s30, 4  ;;  %s2101_s6 = scalar_lea.hbm %s2370_s25, 1280  ;;  %s2372_s4 = int_to_ptr.vmem [resolvable:$true] %s165_s4 }
  0x34   : > { %p2102_p11 = scmp.ne.s32.totalorder %s2370_s25, %s2101_s6  ;;  %p2103_p0 = pneg %p2363_p13 }
  0x35   : > { %s2106_s11 = scalar_lea.hbm %s2789_s0, 2560  ;;  %p2107_p7 = scmp.lt.u32.totalorder %s2370_s25, %s2789_s0 }
  0x36   : > { %p2104_p3 = pnand %p2103_p0, %p2102_p11  ;;  %p2108_p9 = scmp.lt.u32.totalorder %s2106_s11, %s2101_s6 }
  0x37   : > { %p2110_p2 = scmp.lt.u32.totalorder %s2101_s6, %s2370_s25 }
  0x38   : > { %p2105_p5 = pneg %p2104_p3  ;;  %p2109_p1 = por %p2108_p9, %p2107_p7 }
  0x3a   : > { %p2111_p4 = por %p2110_p2, %p2109_p1 }
  0x3c   : > { %p2112_p6 = pnand %p2111_p4, %p2105_p5 }
  0x3e   : > { %2115 = shalt.err (!%p2112_p6)
}
  0x3f   : > { %s2116_s23 = scalar_lea.vmem %s2372_s4, 1280  ;;  %s2238_s28 = smov [#allocation2]  }
  0x40   : > { %p2117_p8 = scmp.ne.s32.totalorder %s2372_s4, %s2116_s23  ;;  %s2121_s26 = sshll.u32 %s2238_s28, 4  ;;  %s2122_s26 = int_to_ptr.vmem [resolvable:$false] %s2121_s26 }
  0x41   : > { %s2123_s30 = scalar_lea.vmem %s2122_s26, 2560  ;;  %p2124_p3 = scmp.lt.s32.totalorder %s2372_s4, %s2122_s26 }
  0x42   : > { %p2119_p10 = pnand %p2117_p8, %p2103_p0  ;;  %p2125_p7 = scmp.lt.s32.totalorder %s2123_s30, %s2116_s23 }
  0x44   : > { %p2120_p11 = pneg %p2119_p10  ;;  %p2126_p9 = por %p2125_p7, %p2124_p3 }
  0x46   : > { %p2127_p1 = pnand %p2126_p9, %p2120_p11 }
  0x48   : > { %2130 = shalt.err (!%p2127_p1)
}
  0x49   : > { %1997 = dma.hbm_to_vmem [thread:$0]  (!%p2363_p13), %s2370_s25, 1280, %s2372_s4, %s2374_s5, %s2236_s8, %s2236_s8, %s2237_s9  }
  0x4a   : > { %p2803_p0 = scmp.ne.s32.totalorder %s2798_s20, 0 }
  0x4b   : > { %s2408_s6 = sand.u32 (!%p2803_p0), 1, %s2225_s13   ;;  %p2804_p5 = scmp.ne.s32.totalorder (!%p2803_p0), %s2796_s18, 0 }
  0x4c   : > { %177 = sbr.rel (%p2803_p0) target bundleno = 442 (0x1ba), region = 28  ;;  %s180_s10 = scalar_lea.sflag (!%p2803_p0), [#allocation3], %s2408_s6 }
  0x4d   : > { %s1979_s7 = smul.u32 (!%p2803_p0), 80, %s2408_s6 }
  0x4f   : > { %s2412_s11 = scalar_lea.vmem (!%p2803_p0), [#allocation2], %s1979_s7 }
  0x53   : > { %2204 = dma.done.wait (%p2804_p5), %s180_s10, 1280  }
  0x54   : > { %2206 = vsyncadd (%p2804_p5), %s180_s10, 4294966016  ;;  %p2805_p13 = scmp.eq.s32.totalorder %s2284_s16, 0 }
  0x56   : > { %2208 = dma.done.wait (%p2805_p13), [#allocation6], 2304   ;;  %p2806_p2 = pmov %p2805_p13 }
  0x57   : > { %vm240_vm0 = vsmask.f32 3328  ;;  %vm241_vm1 = vsmask.f32 7440  ;;  %v2046_v0 = vld [vmem:[#allocation5 + $0x10] sm:$0xff]   ;;  %v2422_v1 = vld [vmem:[#allocation5 + $0x40] sm:$0xff]  }
  0x58   : > { %2210 = vsyncadd (%p2806_p2), [#allocation6], 4294964992  ;;  %1801 = vmatprep.subr.bf16.mxu1 %v2046_v0  ;;  %v2048_v2 = vld [vmem:[#allocation5 + $0x18] sm:$0xff]   ;;  %1849 = vmatprep.subr.bf16.mxu0 %v2422_v1  ;;  %v2425_v3 = vld [vmem:[#allocation5 + $0x48] sm:$0xff]   ;;  %vm384_vm2 = vcmask 261120   ;;  %vm579_vm4 = vcmask 1042432  }
  0x59   : > { %1802 = vmatpush3.bf16.msra.mxu1 %v2046_v0  ;;  %1850 = vmatpush3.bf16.msra.mxu0 %v2422_v1  ;;  %v2429_v4 = vld [vmem:[%s2412_s11] sm:$0xf]  ;;  %v2432_v5 = vld [vmem:[%s2412_s11 + $0x4] sm:$0x1]  ;;  %v2435_v6 = vld [vmem:[%s2412_s11 + $0x8] sm:$0xf] }
  0x5a   : > { %1803 = vmatprep.subr.bf16.mxu1 %v2048_v2  ;;  %1851 = vmatprep.subr.bf16.mxu0 %v2425_v3  ;;  %v2439_v7 = vld [vmem:[%s2412_s11 + $0xc] sm:$0x1]  ;;  %v244_v8 = vshrl.u32 %v2429_v4, 16  ;;  %v247_v9 = vshll.u32 %v2429_v4, 16  ;;  %v253_v10 = vshll.u32 %v2432_v5, 16  ;;  %v258_v11 = vshrl.u32 %v2435_v6, 16  ;;  %vm2467_vm3 = vmor %vm240_vm0, %vm241_vm1 }
  0x5b   : > { %v261_v12 = vshll.u32 %v2435_v6, 16  ;;  %v267_v13 = vshll.u32 %v2439_v7, 16  ;;  %v588_v14 = vrot.slane %v2439_v7, 5  ;;  %v2449_v21 = vld [vmem:[#allocation5] sm:$0xff]   ;;  %v2454_v23 = vld [vmem:[#allocation5 + $0x50] sm:$0xff]   ;;  %vm580_vm5 = vcmask 1046532  }
  0x5c   : > { %v246_v15 = vrot.slane %v244_v8, 4  ;;  %v249_v16 = vrot.slane %v247_v9, 5  ;;  %v255_v17 = vrot.slane %v253_v10, 5  ;;  %v260_v18 = vrot.slane %v258_v11, 4  ;;  %v2452_v22 = vld [vmem:[%s2412_s11 + $0x10] sm:$0xf]  ;;  %vm2537_vm6 = vmor %vm579_vm4, %vm580_vm5 }
  0x5d   : > { %1804 = vmatpush3.bf16.msra.mxu1 %v2048_v2  ;;  %1852 = vmatpush3.bf16.msra.mxu0 %v2425_v3  ;;  %v263_v19 = vrot.slane %v261_v12, 5  ;;  %v269_v20 = vrot.slane %v267_v13, 5  ;;  %v2457_v25 = vld [vmem:[%s2412_s11 + $0x14] sm:$0x1]  ;;  %v2460_v26 = vld [vmem:[%s2412_s11 + $0x18] sm:$0xf] }
  0x5e   : > { %v250_v24 = vor.u32 %v249_v16, %v246_v15  ;;  %v2463_v27 = vld [vmem:[%s2412_s11 + $0x1c] sm:$0x1]  ;;  %1813 = vmatprep.subr.bf16.mxu1 %v2449_v21  ;;  %v2473_v30 = vld [vmem:[%s2412_s11 + $0x20] sm:$0xf]  ;;  %v2476_v31 = vld [vmem:[%s2412_s11 + $0x24] sm:$0x1]  ;;  %1861 = vmatprep.subr.bf16.mxu0 %v2454_v23 }
  0x5f   : > { %v264_v29 = vor.u32 %v263_v19, %v260_v18  ;;  %v272_v32 = vshrl.u32 %v2452_v22, 16  ;;  %v275_v33 = vshll.u32 %v2452_v22, 16  ;;  %v281_v35 = vshll.u32 %v2457_v25, 16  ;;  %v2491_v50 = vld [vmem:[%s2412_s11 + $0x28] sm:$0xf]  ;;  %s1607_s18 = sshll.u32 %s2408_s6, 5 }
  0x60   : > { %v251_v34 = vrot.slane %v250_v24, 4  ;;  %v286_v36 = vshrl.u32 %v2460_v26, 16  ;;  %v289_v37 = vshll.u32 %v2460_v26, 16  ;;  %v295_v41 = vshll.u32 %v2463_v27, 16  ;;  %v2496_v55 = vld [vmem:[%s2412_s11 + $0x2c] sm:$0x1] }
  0x61   : > { %v265_v38 = vrot.slane %v264_v29, 4  ;;  %v274_v39 = vrot.slane %v272_v32, 4  ;;  %v277_v40 = vrot.slane %v275_v33, 5  ;;  %v283_v43 = vrot.slane %v281_v35, 5  ;;  %v2508_v10 = vld [vmem:[%s2412_s11 + $0x30] sm:$0xf] }
  0x62   : > { %v256_v42 = vsel %vm2467_vm3, %v251_v34, %v255_v17  ;;  %v288_v44 = vrot.slane %v286_v36, 4  ;;  %v291_v45 = vrot.slane %v289_v37, 5  ;;  %v297_v48 = vrot.slane %v295_v41, 5  ;;  %v2513_v15 = vld [vmem:[%s2412_s11 + $0x34] sm:$0x1]  ;;  %s2701_s20 = scalar_lea.vmem [#allocation7], %s1607_s18 }
  0x63   : > { %v270_v46 = vsel %vm2467_vm3, %v265_v38, %v269_v20  ;;  %v278_v47 = vor.u32 %v277_v40, %v274_v39  ;;  %v300_v49 = vshrl.u32 %v2473_v30, 16  ;;  %v303_v53 = vshll.u32 %v2473_v30, 16  ;;  %v2516_v16 = vld [vmem:[%s2412_s11 + $0x38] sm:$0xf]  ;;  %v2519_v17 = vld [vmem:[%s2412_s11 + $0x3c] sm:$0x1] }
  0x64   : > { %v1609_v51 = vcombine.low %v256_v42, %v270_v46  ;;  %v292_v52 = vor.u32 %v291_v45, %v288_v44  ;;  %v309_v54 = vshll.u32 %v2476_v31, 16  ;;  %v592_v58 = vrot.slane %v2457_v25, 5  ;;  %v2053_v25 = vld [vmem:[#allocation5 + $0x8] sm:$0xff]   ;;  %v2052_v40 = vld [vmem:[#allocation5 + $0x58] sm:$0xff]   ;;  %s1472_s8 = sshll.u32 %s2701_s20, 4  ;;  %s1723_s9 = sshll.u32 %s2284_s16, 9  ;;  %s2707_s8 = int_to_ptr.vmem [resolvable:$true] %s1472_s8 }
  0x65   : > { %v279_v56 = vrot.slane %v278_v47, 4  ;;  %v302_v57 = vrot.slane %v300_v49, 4  ;;  %v596_v59 = vrot.slane %v2463_v27, 5  ;;  %v305_v61 = vrot.slane %v303_v53, 5  ;;  %v2056_v49 = vld [vmem:[#allocation5 + $0x20] sm:$0xff]   ;;  %s2712_s4 = scalar_lea.hbm %s2791_s2, %s1723_s9  ;;  %s1454_s5 = scalar_lea.sflag [#allocation4], %s2408_s6 }
  0x66   : > { %1805 = vmatprep.mubr.msk.bf16.mxu1 %vm384_vm2, %v1609_v51  ;;  %v293_v60 = vrot.slane %v292_v52, 4  ;;  %v311_v62 = vrot.slane %v309_v54, 5  ;;  %v600_v63 = vrot.slane %v2476_v31, 5  ;;  %v314_v2 = vshrl.u32 %v2491_v50, 16  ;;  %s2131_s27 = scalar_lea.vmem %s2707_s8, 512  ;;  %s2239_s22 = smov [#allocation7]  }
  0x67   : > { %v284_v0 = vsel %vm2467_vm3, %v279_v56, %v283_v43  ;;  %v317_v8 = vshll.u32 %v2491_v50, 16  ;;  %v323_v9 = vshll.u32 %v2496_v55, 16  ;;  %v306_v12 = vor.u32 %v305_v61, %v302_v57  ;;  %p2132_p4 = scmp.ne.s32.totalorder %s2707_s8, %s2131_s27  ;;  %s2135_s23 = sshll.u32 %s2239_s22, 4  ;;  %s2136_s23 = int_to_ptr.vmem [resolvable:$false] %s2135_s23 }
  0x68   : > { %v298_v11 = vsel %vm2467_vm3, %v293_v60, %v297_v48  ;;  %v1657_v13 = vcombine.low %v270_v46, %v284_v0  ;;  %v316_v19 = vrot.slane %v314_v2, 4  ;;  %v328_v32 = vshrl.u32 %v2508_v10, 16  ;;  %s2137_s28 = scalar_lea.vmem %s2136_s23, 1024  ;;  %p2138_p10 = scmp.lt.s32.totalorder %s2707_s8, %s2136_s23 }
  0x69   : > { %v2521_v18 = vcombine.low %v284_v0, %v298_v11  ;;  %v319_v20 = vrot.slane %v317_v8, 5  ;;  %v325_v24 = vrot.slane %v323_v9, 5  ;;  %v307_v29 = vrot.slane %v306_v12, 4  ;;  %v2054_v9 = vld [vmem:[#allocation5 + $0x60] sm:$0xff]   ;;  %p2133_p6 = pnand %p2132_p4, %p2357_p12  ;;  %p2139_p11 = scmp.lt.s32.totalorder %s2137_s28, %s2131_s27 }
  0x6a   : > { %1853 = vmatprep.mubr.msk.bf16.mxu0 %vm384_vm2, %v1657_v13  ;;  %v331_v33 = vshll.u32 %v2508_v10, 16  ;;  %v337_v34 = vshll.u32 %v2513_v15, 16  ;;  %v342_v36 = vshrl.u32 %v2516_v16, 16  ;;  %v345_v37 = vshll.u32 %v2516_v16, 16 }
  0x6b   : > { %1806 = vmatmul.mubr.msk.bf16.vlgmr.msra.gmra.mrb[0].mxu1 %vm384_vm2, %v2521_v18  ;;  %v320_v35 = vor.u32 %v319_v20, %v316_v19  ;;  %v351_v38 = vshll.u32 %v2519_v17, 16  ;;  %v312_v39 = vsel %vm2467_vm3, %v307_v29, %v311_v62  ;;  %v330_v41 = vrot.slane %v328_v32, 4  ;;  %v2602_v29 = vld [vmem:[%s2412_s11 + $0x40] sm:$0xf]  ;;  %v2605_v32 = vld [vmem:[%s2412_s11 + $0x44] sm:$0x1]  ;;  %p2134_p8 = pneg %p2133_p6  ;;  %p2140_p3 = por %p2139_p11, %p2138_p10 }
  0x6c   : > { %1814 = vmatpush3.bf16.msra.mxu1 %v2449_v21  ;;  %v333_v42 = vrot.slane %v331_v33, 5  ;;  %v339_v43 = vrot.slane %v337_v34, 5  ;;  %v1658_v44 = vcombine.low %v298_v11, %v312_v39  ;;  %v344_v46 = vrot.slane %v342_v36, 4 }
  0x6d   : > { %v321_v45 = vrot.slane %v320_v35, 4  ;;  %1815 = vmatprep.subr.bf16.mxu1 %v2053_v25  ;;  %v347_v47 = vrot.slane %v345_v37, 5  ;;  %v353_v52 = vrot.slane %v351_v38, 5  ;;  %v1630_v21 = vrot.slane %v2435_v6, 9  ;;  %v2058_v35 = vld [vmem:[#allocation5 + $0x68] sm:$0xff]   ;;  %p2141_p7 = pnand %p2140_p3, %p2134_p8 }
  0x6e   : > { %v334_v51 = vor.u32 %v333_v42, %v330_v41  ;;  %v1631_v53 = vrot.slane %v2452_v22, 9  ;;  %1854 = vmatmul.mubr.msk.bf16.vlgmr.msra.gmra.mrb[0].mxu0 %vm384_vm2, %v1658_v44  ;;  %v1632_v57 = vrot.slane %v2460_v26, 9  ;;  %v1633_v60 = vrot.slane %v2473_v30, 9  ;;  %v2062_v42 = vld [vmem:[#allocation5 + $0x70] sm:$0xff]  }
  0x6f   : > { %v2546_v54 = vsel %vm2467_vm3, %v321_v45, %v325_v24  ;;  %v348_v56 = vor.u32 %v347_v47, %v344_v46  ;;  %1862 = vmatpush3.bf16.msra.mxu0 %v2454_v23  ;;  %v2558_v0 = vsel %vm2537_vm6, %v1630_v21, %v588_v14  ;;  %v1619_v14 = vcombine.low %v2429_v4, %v2435_v6  ;;  %v2063_v44 = vld [vmem:[#allocation5 + $0x30] sm:$0xff]   ;;  %v2064_v46 = vld [vmem:[#allocation5 + $0x78] sm:$0xff]  }
  0x70   : > { %v2552_v61 = vcombine.low %v312_v39, %v2546_v54  ;;  %v335_v62 = vrot.slane %v334_v51, 4  ;;  %1816 = vmatpush3.bf16.msra.mxu1 %v2053_v25  ;;  %v2562_v2 = vsel %vm2537_vm6, %v1631_v53, %v592_v58  ;;  %1863 = vmatprep.subr.bf16.mxu0 %v2052_v40  ;;  %v1634_v58 = vrot.slane %v2491_v50, 9  ;;  %v2066_v53 = vld [vmem:[#allocation5 + $0x38] sm:$0xff]  }
  0x71   : > { %v349_v8 = vrot.slane %v348_v56, 4  ;;  %v1668_v23 = vcombine.low %v2558_v0, %v2562_v2  ;;  %1825 = vmatprep.subr.bf16.mxu1 %v2056_v49  ;;  %v604_v12 = vrot.slane %v2496_v55, 5  ;;  %v1635_v13 = vrot.slane %v2508_v10, 9 }
  0x72   : > { %1809 = vmatprep.mubr.msk.bf16.mxu1 %vm384_vm2, %v2552_v61  ;;  %v2570_v7 = vsel %vm2467_vm3, %v335_v62, %v339_v43  ;;  %v608_v19 = vrot.slane %v2513_v15, 5  ;;  %v597_v24 = vsel %vm2537_vm6, %v1632_v57, %v596_v59  ;;  %v601_v25 = vsel %vm2537_vm6, %v1633_v60, %v600_v63  ;;  %v2067_v60 = vld [vmem:[#allocation5 + $0x80] sm:$0xff]  }
  0x73   : > { %v2577_v11 = vsel %vm2467_vm3, %v349_v8, %v353_v52  ;;  %1865 = vmatprep.mubr.msk.bf16.mxu0 %vm384_vm2, %v1668_v23  ;;  %1864 = vmatpush3.bf16.msra.mxu0 %v2052_v40  ;;  %v605_v55 = vsel %vm2537_vm6, %v1634_v58, %v604_v12  ;;  %v1669_v27 = vcombine.low %v597_v24, %v601_v25  ;;  %v1636_v31 = vrot.slane %v2516_v16, 9  ;;  %v2060_v40 = vld [vmem:[#allocation5 + $0x28] sm:$0xff]  }
  0x74   : > { %v2585_v20 = vcombine.low %v2570_v7, %v2577_v11  ;;  %1873 = vmatprep.subr.bf16.mxu0 %v2054_v9  ;;  %v2599_v15 = vsel %vm2537_vm6, %v1635_v13, %v608_v19  ;;  %v612_v63 = vrot.slane %v2519_v17, 5  ;;  %v1667_v33 = vrot.slane %v2602_v29, 9 }
  0x75   : > { %v1670_v59 = vcombine.low %v605_v55, %v2599_v15  ;;  %v960_v34 = vrot.slane %v2605_v32, 5  ;;  %v1620_v36 = vcombine.low %v2452_v22, %v2460_v26  ;;  %v1621_v37 = vcombine.low %v2473_v30, %v2491_v50 }
  0x76   : > { %1810 = vmatmul.mubr.msk.bf16.gmra.mrb[4].mxu1 %vm384_vm2, %v2585_v20  ;;  %v584_v38 = vrot.slane %v2432_v5, 5  ;;  %v613_v17 = vsel %vm2537_vm6, %v1636_v31, %v612_v63  ;;  %v1629_v41 = vrot.slane %v2429_v4, 9  ;;  %v1622_v4 = vcombine.low %v2508_v10, %v2516_v16  ;;  %v2070_v31 = vld [vmem:[#allocation5 + $0x88] sm:$0xff]  }
  0x77   : > { %1817 = vmatprep.mubr.msk.bf16.mxu1 %vm384_vm2, %v1619_v14  ;;  %v2626_v39 = vsel %vm2537_vm6, %v1667_v33, %v960_v34  ;;  %v1638_v47 = vcombine.low %v2562_v2, %v597_v24  ;;  %v1639_v51 = vcombine.low %v601_v25, %v605_v55  ;;  %v837_v56 = vshrl.u32 %v2602_v29, 16 }
  0x78   : > { %v1671_v5 = vcombine.low %v613_v17, %v2626_v39  ;;  %v585_v43 = vsel %vm2537_vm6, %v1629_v41, %v584_v38  ;;  %v840_v57 = vshll.u32 %v2602_v29, 16  ;;  %v1640_v14 = vcombine.low %v2599_v15, %v613_v17 }
  0x79   : > { %v1637_v45 = vcombine.low %v585_v43, %v2558_v0  ;;  %v839_v0 = vrot.slane %v837_v56, 4  ;;  %v1647_v58 = vcombine.low %v2435_v6, %v2452_v22  ;;  %v846_v13 = vshll.u32 %v2605_v32, 16 }
  0x7a   : > { %1866 = vmatmul.mubr.msk.bf16.vlgmr.msra.gmra.mrb[0].mxu0 %vm384_vm2, %v1669_v27  ;;  %v842_v2 = vrot.slane %v840_v57, 5  ;;  %v1648_v6 = vcombine.low %v2460_v26, %v2473_v30  ;;  %v1649_v22 = vcombine.low %v2491_v50, %v2508_v10  ;;  %v1650_v30 = vcombine.low %v2516_v16, %v2602_v29 }
  0x7b   : > { %1874 = vmatpush3.bf16.msra.mxu0 %v2054_v9  ;;  %1869 = vmatprep.mubr.msk.bf16.mxu0 %vm384_vm2, %v1670_v59  ;;  %v235_v9 = vld [vmem:[%s2412_s11 + $0x4c] sm:$0x1]  ;;  %v848_v55 = vrot.slane %v846_v13, 5  ;;  %v1659_v28 = vcombine.low %v2546_v54, %v2570_v7 }
  0x7c   : > { %1875 = vmatprep.subr.bf16.mxu0 %v2058_v35  ;;  %v843_v12 = vor.u32 %v842_v2, %v839_v0  ;;  %v1175_v24 = vshll.u32 %v235_v9, 16  ;;  %v1277_v50 = vrot.slane %v235_v9, 5 }
  0x7e   : > { %1818 = vmatmul.mubr.msk.bf16.vlgmr.msra.gmra.mrb[0].mxu1 %vm384_vm2, %v1620_v36  ;;  %v844_v25 = vrot.slane %v843_v12, 4  ;;  %v1177_v27 = vrot.slane %v1175_v24, 5 }
  0x7f   : > { %1826 = vmatpush3.bf16.msra.mxu1 %v2056_v49  ;;  %1821 = vmatprep.mubr.msk.bf16.mxu1 %vm384_vm2, %v1621_v37  ;;  %v2644_v49 = vld [vmem:[%s2412_s11 + $0x48] sm:$0xf] }
  0x80   : > { %1876 = vmatpush3.bf16.msra.mxu0 %v2058_v35  ;;  %1827 = vmatprep.subr.bf16.mxu1 %v2060_v40  ;;  %v1166_v52 = vshrl.u32 %v2644_v49, 16  ;;  %v1169_v21 = vshll.u32 %v2644_v49, 16  ;;  %v1678_v62 = vcombine.low %v2602_v29, %v2644_v49 }
  0x81   : > { %1885 = vmatprep.subr.bf16.mxu0 %v2062_v42 }
  0x82   : > { %1870 = vmatmul.mubr.msk.bf16.gmra.mrb[4].mxu0 %vm384_vm2, %v1671_v5  ;;  %v1168_v8 = vrot.slane %v1166_v52, 4  ;;  %v1171_v23 = vrot.slane %v1169_v21, 5 }
  0x83   : > { %1828 = vmatpush3.bf16.msra.mxu1 %v2060_v40  ;;  %1877 = vmatprep.mubr.msk.bf16.mxu0 %vm384_vm2, %v1620_v36 }
  0x84   : > { %1837 = vmatprep.subr.bf16.mxu1 %v2063_v44  ;;  %v1172_v19 = vor.u32 %v1171_v23, %v1168_v8 }
  0x86   : > { %1822 = vmatmul.mubr.msk.bf16.gmra.mrb[4].mxu1 %vm384_vm2, %v1622_v4  ;;  %v1173_v15 = vrot.slane %v1172_v19, 4 }
  0x87   : > { %1829 = vmatprep.mubr.msk.bf16.mxu1 %vm384_vm2, %v1637_v45 }
  0x88   : > { %v1178_v32 = vsel %vm2467_vm3, %v1173_v15, %v1177_v27 }
  0x8a   : > { %1878 = vmatmul.mubr.msk.bf16.vlgmr.msra.gmra.mrb[0].mxu0 %vm384_vm2, %v1621_v37 }
  0x8b   : > { %1886 = vmatpush3.bf16.msra.mxu0 %v2062_v42  ;;  %1881 = vmatprep.mubr.msk.bf16.mxu0 %vm384_vm2, %v1622_v4 }
  0x8c   : > { %1887 = vmatprep.subr.bf16.mxu0 %v2064_v46 }
  0x8e   : > { %1830 = vmatmul.mubr.msk.bf16.vlgmr.msra.gmra.mrb[0].mxu1 %vm384_vm2, %v1638_v47 }
  0x8f   : > { %1838 = vmatpush3.bf16.msra.mxu1 %v2063_v44  ;;  %1833 = vmatprep.mubr.msk.bf16.mxu1 %vm384_vm2, %v1639_v51 }
  0x90   : > { %1888 = vmatpush3.bf16.msra.mxu0 %v2064_v46  ;;  %1839 = vmatprep.subr.bf16.mxu1 %v2066_v53 }
  0x91   : > { %1897 = vmatprep.subr.bf16.mxu0 %v2067_v60 }
  0x92   : > { %1882 = vmatmul.mubr.msk.bf16.gmra.mrb[4].mxu0 %vm384_vm2, %v1678_v62 }
  0x93   : > { %1840 = vmatpush3.bf16.msra.mxu1 %v2066_v53  ;;  %1889 = vmatprep.mubr.msk.bf16.mxu0 %vm384_vm2, %v2521_v18  ;;  %v849_v18 = vsel %vm2467_vm3, %v844_v25, %v848_v55 }
  0x94   : > { %1909 = vmatprep.subr.bf16.mxu1 %v2422_v1  ;;  %v1685_v26 = vcombine.low %v849_v18, %v1178_v32  ;;  %v1660_v10 = vcombine.low %v2577_v11, %v849_v18 }
  0x96   : > { %1834 = vmatmul.mubr.msk.bf16.gmra.mrb[4].mxu1 %vm384_vm2, %v1640_v14 }
  0x97   : > { %1841 = vmatprep.mubr.msk.bf16.mxu1 %vm384_vm2, %v1647_v58 }
  0x9a   : > { %1890 = vmatmul.mubr.msk.bf16.vlgmr.msra.gmra.mrb[0].mxu0 %vm384_vm2, %v2552_v61 }
  0x9b   : > { %1898 = vmatpush3.bf16.msra.mxu0 %v2067_v60  ;;  %1893 = vmatprep.mubr.msk.bf16.mxu0 %vm384_vm2, %v2585_v20 }
  0x9c   : > { %1899 = vmatprep.subr.bf16.mxu0 %v2070_v31 }
  0x9e   : > { %1842 = vmatmul.mubr.msk.bf16.vlgmr.msra.gmra.mrb[0].mxu1 %vm384_vm2, %v1648_v6 }
  0x9f   : > { %1911 = vmatpush3.bf16.msra.mxu1 %v2422_v1  ;;  %1845 = vmatprep.mubr.msk.bf16.mxu1 %vm384_vm2, %v1649_v22  ;;  %v1692_v1 = vrot.slane %v2644_v49, 9 }
  0xa0   : > { %1900 = vmatpush3.bf16.msra.mxu0 %v2070_v31  ;;  %1910 = vmatprep.subr.bf16.mxu1 %v2425_v3 }
  0xa2   : > { %1894 = vmatmul.mubr.msk.bf16.gmra.mrb[4].mxu0 %vm384_vm2, %v1685_v26 }
  0xa3   : > { %1912 = vmatpush3.bf16.msra.mxu1 %v2425_v3  ;;  %1901 = vmatprep.mubr.msk.bf16.mxu0 %vm384_vm2, %v1638_v47  ;;  %v1278_v3 = vsel %vm2537_vm6, %v1692_v1, %v1277_v50 }
  0xa4   : > { %v1693_v16 = vcombine.low %v2626_v39, %v1278_v3 }
  0xa6   : > { %1846 = vmatmul.mubr.msk.bf16.gmra.mrb[4].mxu1 %vm384_vm2, %v1650_v30 }
  0xa7   : > { %1857 = vmatprep.mubr.msk.bf16.mxu1 %vm384_vm2, %v1659_v28 }
  0xaa   : > { %1902 = vmatmul.mubr.msk.bf16.vlgmr.msra.gmra.mrb[0].mxu0 %vm384_vm2, %v1639_v51 }
  0xab   : > { %1905 = vmatprep.mubr.msk.bf16.mxu0 %vm384_vm2, %v1640_v14 }
  0xb2   : > { %1858 = vmatmul.mubr.msk.bf16.vlgmr.msra.gmra.mrb[4].mxu1 %vm384_vm2, %v1660_v10  ;;  %1906 = vmatmul.mubr.msk.bf16.gmra.mrb[4].mxu0 %vm384_vm2, %v1693_v16 }
 0x171   : > { %v1843_v54 = vpop.f32.mrb[0].mxu1 }
 0x172   : > { %v797_v61 = vpop.f32.mrb[1].mxu1 }
 0x173   : > { %v1844_v7 = vpop.f32.mrb[2].mxu1 }
 0x174   : > { %v800_v20 = vpop.f32.mrb[3].mxu1 }
 0x17d   : > { %v1903_v29 = vpop.f32.mrb[0].mxu0 }
 0x17e   : > { %v1913_v59 = vadd.f32 %v1903_v29, %v1843_v54  ;;  %v1335_v63 = vpop.f32.mrb[1].mxu0 }
 0x17f   : > { %v1914_v33 = vadd.f32 %v1335_v63, %v797_v61  ;;  %v1904_v34 = vpop.f32.mrb[2].mxu0 }
 0x180   : > { %v1915_v48 = vadd.f32 %v1904_v34, %v1844_v7  ;;  %v1338_v35 = vpop.f32.mrb[3].mxu0  ;;  %v1429_v41 = vmul.f32 %v1913_v59, %v1913_v59 }
 0x181   : > { %v1916_v36 = vadd.f32 %v1338_v35, %v800_v20  ;;  %v1427_v37 = vmul.f32 %v1914_v33, %v1914_v33 }
 0x182   : > { %v1732_v11 = vpack.c.bf16 %v1915_v48, %v1913_v59  ;;  %v1430_v47 = vmul.f32 %v1915_v48, %v1915_v48 }
 0x183   : > { %v1727_v38 = vpack.c.bf16 %v1916_v36, %v1914_v33  ;;  %v1414_v17 = vadd.f32 %v1916_v36, %v1914_v33  ;;  %v1428_v39 = vmul.f32 %v1916_v36, %v1916_v36 }
 0x184   : > { %1744 = vst [vmem:[%s2701_s20 + $0x8] sm:$0xff] %v1732_v11  }
 0x185   : > { %v1859_v40 = vpop.f32.mrb[4].mxu1  ;;  %1728 = vst [vmem:[%s2701_s20] sm:$0xff] %v1727_v38   ;;  %v1415_v42 = vadd.f32 %v1913_v59, %v1414_v17  ;;  %v1435_v5 = vadd.f32 %v1428_v39, %v1427_v37  ;;  %v1907_v43 = vpop.f32.mrb[4].mxu0 }
 0x186   : > { %v934_v44 = vpop.f32.mrb[5].mxu1  ;;  %v1917_v4 = vadd.f32 %v1907_v43, %v1859_v40  ;;  %v1351_v45 = vpop.f32.mrb[5].mxu0 }
 0x187   : > { %v1860_v46 = vpop.f32.mrb[6].mxu1  ;;  %v1436_v49 = vadd.f32 %v1435_v5, %v1429_v41  ;;  %v1918_v51 = vadd.f32 %v1351_v45, %v934_v44  ;;  %v1416_v52 = vadd.f32 %v1915_v48, %v1415_v42  ;;  %v1908_v21 = vpop.f32.mrb[6].mxu0 }
 0x188   : > { %v937_v53 = vpop.f32.mrb[7].mxu1  ;;  %v1919_v56 = vadd.f32 %v1908_v21, %v1860_v46  ;;  %v1354_v57 = vpop.f32.mrb[7].mxu0  ;;  %v1433_v12 = vmul.f32 %v1917_v4, %v1917_v4 }
 0x189   : > { %v1417_v60 = vadd.f32 %v1918_v51, %v1416_v52  ;;  %v1431_v62 = vmul.f32 %v1918_v51, %v1918_v51  ;;  %v1437_v0 = vadd.f32 %v1436_v49, %v1430_v47  ;;  %v1920_v2 = vadd.f32 %v1354_v57, %v937_v53 }
 0x18a   : > { %v1742_v8 = vpack.c.bf16 %v1919_v56, %v1917_v4 }
 0x18b   : > { %v1438_v23 = vadd.f32 %v1437_v0, %v1431_v62  ;;  %v1737_v9 = vpack.c.bf16 %v1920_v2, %v1918_v51  ;;  %v1418_v14 = vadd.f32 %v1920_v2, %v1417_v60  ;;  %v1432_v58 = vmul.f32 %v1920_v2, %v1920_v2 }
 0x18c   : > { %1746 = vst [vmem:[%s2701_s20 + $0x18] sm:$0xff] %v1742_v8  }
 0x18d   : > { %1745 = vst [vmem:[%s2701_s20 + $0x10] sm:$0xff] %v1737_v9   ;;  %v1419_v13 = vadd.f32 %v1917_v4, %v1418_v14  ;;  %v1439_v19 = vadd.f32 %v1438_v23, %v1432_v58 }
 0x18e   : > { %2144 = shalt.err (!%p2141_p7)
}
 0x18f   : > { %s2145_s26 = scalar_lea.hbm %s2712_s4, 512  ;;  %s2149_s10 = scalar_lea.hbm %s2791_s2, 1024 }
 0x190   : > { %p2146_p9 = scmp.ne.s32.totalorder %s2712_s4, %s2145_s26  ;;  %p2150_p5 = scmp.lt.u32.totalorder %s2712_s4, %s2791_s2 }
 0x191   : > { %p2151_p13 = scmp.lt.u32.totalorder %s2149_s10, %s2145_s26  ;;  %p2153_p4 = scmp.lt.u32.totalorder %s2145_s26, %s2712_s4 }
 0x192   : > { %p2147_p1 = pnand %p2146_p9, %p2357_p12 }
 0x193   : > { %p2152_p2 = por %p2151_p13, %p2150_p5 }
 0x194   : > { %p2148_p0 = pneg %p2147_p1 }
 0x195   : > { %p2154_p6 = por %p2153_p4, %p2152_p2 }
 0x197   : > { %p2155_p8 = pnand %p2154_p6, %p2148_p0 }
 0x199   : > { %2158 = shalt.err (!%p2155_p8)
}
 0x19a   : > { %s2240_s20 = smov 64   ;;  %s2241_s9 = smov 4   ;;  %v1434_v24 = vmul.f32 %v1919_v56, %v1919_v56  ;;  %v1420_v25 = vadd.f32 %v1919_v56, %v1419_v13  ;;  %v1440_v55 = vadd.f32 %v1439_v19, %v1433_v12  ;;  %vm1448_vm7 = vcmask 1040384  }
 0x19b   : > { %1986 = dma.vmem_to_hbm [thread:$0]  (%p2357_p12), %s2707_s8, 512, %s2712_s4, %s1454_s5, %s2240_s20, %s2240_s20, %s2241_s9   ;;  %vm1450_vm8 = vcmask 1041408  }
 0x19c   : > { %v1421_v15 = vrot.slane %v1420_v25, 4  ;;  %v1441_v27 = vadd.f32 %v1440_v55, %v1434_v24  ;;  %s1608_s29 = sshll.u32 %s2408_s6, 3  ;;  %s1712_s8 = sshll.u32 %s2284_s16, 7 }
 0x19d   : > { %s214_s25 = scalar_lea.vmem [#allocation8], %s1608_s29  ;;  %s2745_s22 = scalar_lea.hbm %s2792_s3, %s1712_s8 }
 0x19e   : > { %v1422_v31 = vadd.f32 %v1421_v15, %v1420_v25  ;;  %v1442_v6 = vrot.slane %v1441_v27, 4  ;;  %s1488_s4 = sshll.u32 %s214_s25, 4  ;;  %s1459_s23 = scalar_lea.sflag [#allocation9], %s2408_s6  ;;  %s2747_s4 = int_to_ptr.vmem [resolvable:$true] %s1488_s4 }
 0x19f   : > { %s2159_s16 = scalar_lea.vmem %s2747_s4, 128  ;;  %s2242_s28 = smov [#allocation8]  }
 0x1a0   : > { %v1423_v22 = vrot.slane %v1422_v31, 2  ;;  %v1443_v18 = vadd.f32 %v1442_v6, %v1441_v27  ;;  %p2160_p10 = scmp.ne.s32.totalorder %s2747_s4, %s2159_s16  ;;  %s2163_s26 = sshll.u32 %s2242_s28, 4  ;;  %s2164_s26 = int_to_ptr.vmem [resolvable:$false] %s2163_s26 }
 0x1a1   : > { %s2165_s30 = scalar_lea.vmem %s2164_s26, 256  ;;  %p2166_p7 = scmp.lt.s32.totalorder %s2747_s4, %s2164_s26 }
 0x1a2   : > { %v1424_v32 = vadd.f32 %v1423_v22, %v1422_v31  ;;  %v1444_v26 = vrot.slane %v1443_v18, 2  ;;  %p2161_p11 = pnand %p2160_p10, %p2357_p12  ;;  %p2167_p9 = scmp.lt.s32.totalorder %s2165_s30, %s2159_s16 }
 0x1a4   : > { %v1425_v30 = vrot.slane %v1424_v32, 1  ;;  %v1445_v28 = vadd.f32 %v1444_v26, %v1443_v18  ;;  %p2162_p3 = pneg %p2161_p11  ;;  %p2168_p1 = por %p2167_p9, %p2166_p7 }
 0x1a6   : > { %v1446_v1 = vrot.slane %v1445_v28, 1  ;;  %v1426_v50 = vadd.f32 %v1425_v30, %v1424_v32  ;;  %p2169_p0 = pnand %p2168_p1, %p2162_p3 }
 0x1a8   : > { %v1447_v3 = vadd.f32 %v1446_v1, %v1445_v28 }
 0x1aa   : > { %v1449_v10 = vsel %vm1448_vm7, %v1426_v50, %v1447_v3 }
 0x1ab   : > { %v1451_v16 = vsel %vm1450_vm8, %v1449_v10, 0.0 }
 0x1ac   : > { %1452 = vst [vmem:[%s214_s25] sm:$0xff] %v1451_v16 }
 0x1ad   : > { %2172 = shalt.err (!%p2169_p0)
}
 0x1ae   : > { %s2173_s6 = scalar_lea.hbm %s2745_s22, 128  ;;  %s2177_s11 = scalar_lea.hbm %s2792_s3, 256 }
 0x1af   : > { %p2174_p5 = scmp.ne.s32.totalorder %s2745_s22, %s2173_s6  ;;  %p2178_p4 = scmp.lt.u32.totalorder %s2745_s22, %s2792_s3 }
 0x1b0   : > { %p2179_p6 = scmp.lt.u32.totalorder %s2177_s11, %s2173_s6  ;;  %p2181_p10 = scmp.lt.u32.totalorder %s2173_s6, %s2745_s22 }
 0x1b1   : > { %p2175_p13 = pnand %p2174_p5, %p2357_p12 }
 0x1b2   : > { %p2180_p8 = por %p2179_p6, %p2178_p4 }
 0x1b3   : > { %p2176_p2 = pneg %p2175_p13 }
 0x1b4   : > { %p2182_p11 = por %p2181_p10, %p2180_p8 }
 0x1b6   : > { %p2183_p3 = pnand %p2182_p11, %p2176_p2 }
 0x1b8   : > { %2186 = shalt.err (!%p2183_p3)
}
 0x1b9   : > { %1987 = dma.vmem_to_hbm [thread:$0]  (%p2357_p12), %s2747_s4, 128, %s2745_s22, %s1459_s23  }
 0x1ba PF: > { %s1500_s9 = sand.u32 1, %s2221_s12   ;;  %p2811_p7 = scmp.ne.s32.totalorder %s2797_s19, 0 }
 0x1bb   : > { %p2812_p9 = scmp.ge.s32.totalorder %s2233_s15, 2  ;;  %s1501_s29 = scalar_lea.sflag [#allocation4], %s1500_s9 }
 0x1bd   : > { %p1999_p1 = pnand %p2812_p9, %p2811_p7 }
 0x1bf   : > { %2212 = dma.done.wait (!%p1999_p1), %s1501_s29, 512  }
 0x1c0   : > { %2214 = vsyncadd (!%p1999_p1), %s1501_s29, 4294966784  ;;  %s1510_s8 = scalar_lea.sflag [#allocation9], %s1500_s9 }
 0x1c1   : > { %2216 = dma.done.wait (!%p1999_p1), %s1510_s8, 128  }
 0x1c2   : > { %2218 = vsyncadd (!%p1999_p1), %s1510_s8, 4294967168  ;;  %p21_p12 = scmp.ge.s32.totalorder %s2319_s24, 4   ;;  %s2813_s12 = smov %s2225_s13 }
 0x1c3   : > { %s2814_s13 = smov %s2229_s14  ;;  %s2815_s14 = smov %s2353_s17 }
 0x1c4   : > { %s2816_s15 = smov %s2319_s24  ;;  %23 = sbr.rel (!%p21_p12) target bundleno = 8 (0x8), region = 102 }
 0x1cb   :  { %1515 = vsyncpa [#allocation3], 1 }
 0x1cc   :  { %1517 = vsyncpa [#allocation3 + $0x1], 1 }
 0x1cd   :  { %1518 = vsyncpa [#allocation6], 1 }
 0x1ce   :  { %1519 = vsyncpa [#allocation4], 1 }
 0x1cf   :  { %1521 = vsyncpa [#allocation4 + $0x1], 1 }
 0x1d0   :  { %1522 = vsyncpa [#allocation9], 1 }
 0x1d1   :  { %1524 = vsyncpa [#allocation9 + $0x1], 1 }

// kernel: forward.13
= control target key start
LH: loop header
LB: loop body
LE: loop exit
PB: predicated region body
PF: predicated region fallthrough
CT: control target
= control target key end

     0   :  { %8 = vsyncpa [#allocation3], 0  ;;  %s1079_s0 = inlined_call_operand.hbm [shape: bf16[2,64,128], index: 0, kind: input, shape index: {}]   ;;  %s1080_s1 = inlined_call_operand.vmem [shape: f32[1,32], index: 1, kind: input, shape index: {}]   ;;  %s1081_s2 = inlined_call_operand.vmem [shape: f32[1,32], index: 2, kind: input, shape index: {}]   ;;  %s1082_s3 = inlined_call_operand.hbm [shape: bf16[2,10,10,32], index: 3, kind: output, shape index: {}]  }
   0x1   :  { %10 = vsyncpa [#allocation3 + $0x1], 0 }
   0x2   :  { %11 = vsyncpa [#allocation4], 0 }
   0x3   :  { %13 = vsyncpa [#allocation4 + $0x1], 0  ;;  %s779_s12 = smov 0   ;;  %s781_s13 = smov 0  }
   0x4   :  { %s783_s14 = smov 0   ;;  %s785_s15 = smov 0  }
   0x5 LB: > { %s800_s16 = sadd.s32 4294967295, %s750_s15   ;;  %s520_s17 = sadd.s32 4294967294, %s750_s15   ;;  %s750_s15 = sphi %s785_s15, %s1099_s15   ;;  %s746_s14 = sphi %s783_s14, %s1098_s14   ;;  %s742_s13 = sphi %s781_s13, %s1097_s13   ;;  %s738_s12 = sphi %s779_s12, %s1096_s12  }
   0x6   : > { %s804_s18 = sadd.s32 1, %s750_s15   ;;  %s26_s19 = sadd.s32 1, %s746_s14 }
   0x7   : > { %s23_s20 = ssub.s32 %s750_s15, %s804_s18  ;;  %p33_p0 = scmp.ne.s32.totalorder %s746_s14, %s742_s13 }
   0x8   : > { %p24_p1 = scmp.eq.s32.totalorder %s23_s20, 0  ;;  %p34_p2 = scmp.eq.s32.totalorder %s750_s15, 0 }
   0x9   : > { %p39_p3 = scmp.ne.s32.totalorder %s742_s13, %s738_s12  ;;  %p40_p4 = scmp.eq.s32.totalorder %s800_s16, 0 }
   0xa   : > { %s816_s21 = scalar_select %p24_p1, %s746_s14, %s26_s19  }
   0xb   : > { %p818_p5 = por %p34_p2, %p33_p0  ;;  %p822_p6 = por %p40_p4, %p39_p3 }
   0xc   : > { %p105_p7 = scmp.eq.s32.totalorder %s800_s16, 1  ;;  %p111_p8 = scmp.eq.s32.totalorder %s520_s17, 1 }
   0xd   : > { %p615_p10 = scmp.lt.s32.totalorder %s750_s15, 2  ;;  %s137_s26 = sand.u32 1, %s746_s14  }
   0xe   : > { %p829_p11 = por %p105_p7, %p33_p0  ;;  %p833_p12 = por %p111_p8, %p39_p3 }
   0xf   : > { %s573_s27 = sshll.u32 %s750_s15, 9  ;;  %s523_s28 = sshll.u32 %s137_s26, 5 }
  0x10   : > { %s1086_s24 = scalar_select %p829_p11, 1, 0 }
  0x11   : > { %s1087_s25 = scalar_select %p833_p12, 1, 0 }
  0x12   : > { %s842_s4 = scalar_lea.hbm %s1079_s0, %s573_s27  ;;  %s141_s5 = scalar_lea.vmem [#allocation2], %s523_s28 }
  0x13   : > { %s148_s6 = sshll.u32 %s141_s5, 4  ;;  %p846_p13 = pnand %p615_p10, %p818_p5  ;;  %s850_s6 = int_to_ptr.vmem [resolvable:$true] %s148_s6 }
  0x14   : > { %s852_s8 = scalar_lea.sflag [#allocation3], %s137_s26  ;;  %s654_s9 = scalar_lea.hbm %s842_s4, 512 }
  0x15   : > { %p655_p0 = scmp.ne.s32.totalorder %s842_s4, %s654_s9  ;;  %p656_p1 = pneg %p846_p13 }
  0x16   : > { %s659_s17 = scalar_lea.hbm %s1079_s0, 1024  ;;  %p660_p4 = scmp.lt.u32.totalorder %s842_s4, %s1079_s0 }
  0x17   : > { %p657_p2 = pnand %p656_p1, %p655_p0  ;;  %p661_p5 = scmp.lt.u32.totalorder %s659_s17, %s654_s9 }
  0x18   : > { %p663_p8 = scmp.lt.u32.totalorder %s654_s9, %s842_s4 }
  0x19   : > { %p658_p3 = pneg %p657_p2  ;;  %p662_p7 = por %p661_p5, %p660_p4 }
  0x1b   : > { %p664_p10 = por %p663_p8, %p662_p7 }
  0x1d   : > { %p665_p9 = pnand %p664_p10, %p658_p3 }
  0x1f   : > { %668 = shalt.err (!%p665_p9)
}
  0x20   : > { %s669_s22 = scalar_lea.vmem %s850_s6, 512  ;;  %s752_s26 = smov [#allocation2]  }
  0x21   : > { %p670_p0 = scmp.ne.s32.totalorder %s850_s6, %s669_s22  ;;  %s674_s27 = sshll.u32 %s752_s26, 4  ;;  %s675_s27 = int_to_ptr.vmem [resolvable:$false] %s674_s27 }
  0x22   : > { %s676_s28 = scalar_lea.vmem %s675_s27, 1024  ;;  %p677_p11 = scmp.lt.s32.totalorder %s850_s6, %s675_s27 }
  0x23   : > { %p672_p2 = pnand %p670_p0, %p656_p1  ;;  %p678_p4 = scmp.lt.s32.totalorder %s676_s28, %s669_s22 }
  0x25   : > { %p673_p12 = pneg %p672_p2  ;;  %p679_p5 = por %p678_p4, %p677_p11 }
  0x27   : > { %p680_p7 = pnand %p679_p5, %p673_p12 }
  0x29   : > { %683 = shalt.err (!%p680_p7)
}
  0x2a   : > { %s753_s29 = smov 64   ;;  %s754_s30 = smov 4  }
  0x2b   : > { %610 = dma.hbm_to_vmem [thread:$0]  (!%p846_p13), %s842_s4, 512, %s850_s6, %s852_s8, %s753_s29, %s753_s29, %s754_s30  }
  0x2c   : > { %p526_p9 = scmp.ge.s32.totalorder %s750_s15, 1  ;;  %p156_p1 = scmp.lt.s32.totalorder %s750_s15, 3 }
  0x2e   : > { %p157_p3 = pnand %p526_p9, %p156_p1 }
  0x2f   : > { %s883_s5 = sand.u32 (!%p157_p3), 1, %s742_s13  }
  0x30   : > { %160 = sbr.rel (%p157_p3) target bundleno = 102 (0x66), region = 32  ;;  %s527_s9 = sshll.u32 (!%p157_p3), %s883_s5, 5 }
  0x31   : > { %s163_s10 = scalar_lea.sflag (!%p157_p3), [#allocation3], %s883_s5  ;;  %s887_s11 = scalar_lea.vmem (!%p157_p3), [#allocation2], %s527_s9 }
  0x37   : > { %729 = dma.done.wait (%p822_p6), %s163_s10, 512  }
  0x38   : > { %731 = vsyncadd (%p822_p6), %s163_s10, 4294966784  ;;  %s601_s4 = smul.u32 80, %s883_s5  ;;  %vm244_vm0 = vcmask 257024   ;;  %vm246_vm1 = vcmask 253952   ;;  %v755_v0 = vmov 0   ;;  %v583_v1 = vld [vmem:[%s887_s11] sm:$0xff]  }
  0x39   : > { %v528_v2 = vld [vmem:[%s1080_s1] ss:$0 sm:$0xff]  ;;  %v584_v3 = vunpack.c.l.bf16 %v583_v1  ;;  %v585_v4 = vunpack.c.h.bf16 %v583_v1  ;;  %v598_v5 = vld [vmem:[%s887_s11 + $0x8] sm:$0xff]   ;;  %v599_v6 = vld [vmem:[%s887_s11 + $0x10] sm:$0xff]   ;;  %vm380_vm2 = vsmask.f32 7938 }
  0x3a   : > { %s894_s6 = scalar_lea.vmem [#allocation5], %s601_s4  ;;  %v600_v7 = vld [vmem:[%s887_s11 + $0x18] sm:$0xff]   ;;  %v529_v8 = vld [vmem:[%s1081_s2] ss:$0 sm:$0xff]  ;;  %v588_v9 = vunpack.c.l.bf16 %v598_v5  ;;  %v589_v10 = vunpack.c.h.bf16 %v598_v5  ;;  %v592_v11 = vunpack.c.l.bf16 %v599_v6  ;;  %v593_v12 = vunpack.c.h.bf16 %v599_v6  ;;  %vm958_vm4 = vmand %vm244_vm0, %vm380_vm2  ;;  %s602_s19 = smul.u32 1280, %s800_s16 }
  0x3b   : > { %248 = vst.msk [vmem:[%s894_s6 + $0x8] sm:$0xf] %vm244_vm0, %v755_v0  ;;  %245 = vst.msk [vmem:[%s894_s6] sm:$0xf] %vm244_vm0, %v755_v0  ;;  %v213_v13 = vmul.f32 %v584_v3, %v528_v2  ;;  %vm386_vm3 = vsmask.f32 256  ;;  %v214_v14 = vmul.f32 %v585_v4, %v528_v2  ;;  %v596_v15 = vunpack.c.l.bf16 %v600_v7 }
  0x3c   : > { %250 = vst.msk [vmem:[%s894_s6 + $0x10] sm:$0xf] %vm244_vm0, %v755_v0  ;;  %252 = vst.msk [vmem:[%s894_s6 + $0x18] sm:$0xf] %vm244_vm0, %v755_v0  ;;  %v597_v16 = vunpack.c.h.bf16 %v600_v7  ;;  %v215_v17 = vmul.f32 %v588_v9, %v528_v2  ;;  %v216_v18 = vmul.f32 %v589_v10, %v528_v2  ;;  %v217_v19 = vmul.f32 %v592_v11, %v528_v2  ;;  %s447_s20 = sshll.u32 %s894_s6, 4  ;;  %s1021_s26 = scalar_lea.hbm %s1082_s3, %s602_s19  ;;  %s1023_s20 = int_to_ptr.vmem [resolvable:$true] %s447_s20 }
  0x3d   : > { %254 = vst.msk [vmem:[%s894_s6 + $0x20] sm:$0xf] %vm244_vm0, %v755_v0  ;;  %256 = vst.msk [vmem:[%s894_s6 + $0x28] sm:$0xf] %vm244_vm0, %v755_v0  ;;  %v218_v20 = vmul.f32 %v593_v12, %v528_v2  ;;  %v228_v21 = vadd.f32 %v529_v8, %v213_v13  ;;  %v229_v22 = vadd.f32 %v529_v8, %v214_v14  ;;  %s434_s27 = scalar_lea.sflag [#allocation4], %s883_s5  ;;  %s684_s28 = scalar_lea.vmem %s1023_s20, 1280 }
  0x3e   : > { %258 = vst.msk [vmem:[%s894_s6 + $0x30] sm:$0xf] %vm244_vm0, %v755_v0  ;;  %260 = vst.msk [vmem:[%s894_s6 + $0x38] sm:$0xf] %vm244_vm0, %v755_v0  ;;  %v219_v23 = vmul.f32 %v596_v15, %v528_v2  ;;  %v220_v24 = vmul.f32 %v597_v16, %v528_v2  ;;  %v230_v25 = vadd.f32 %v529_v8, %v215_v17  ;;  %p685_p6 = scmp.ne.s32.totalorder %s1023_s20, %s684_s28  ;;  %p1093_p11 = scmp.ne.s32.totalorder %s1086_s24, 0 }
  0x3f   : > { %262 = vst.msk [vmem:[%s894_s6 + $0x40] sm:$0xf] %vm244_vm0, %v755_v0  ;;  %264 = vst.msk [vmem:[%s894_s6 + $0x48] sm:$0xf] %vm244_vm0, %v755_v0  ;;  %v231_v26 = vadd.f32 %v529_v8, %v216_v18  ;;  %v232_v27 = vadd.f32 %v529_v8, %v217_v19  ;;  %v233_v28 = vadd.f32 %v529_v8, %v218_v20  ;;  %v236_v29 = vmax.f32 %v228_v21, 0.0  ;;  %s756_s29 = smov [#allocation5]  }
  0x40   : > { %249 = vst.msk [vmem:[%s894_s6 + $0xc] sm:$0x1] %vm246_vm1, %v755_v0  ;;  %247 = vst.msk [vmem:[%s894_s6 + $0x4] sm:$0x1] %vm246_vm1, %v755_v0  ;;  %v237_v30 = vmax.f32 %v229_v22, 0.0  ;;  %v946_v31 = vadd.f32 %v529_v8, %v219_v23  ;;  %v948_v32 = vadd.f32 %v529_v8, %v220_v24  ;;  %v238_v33 = vmax.f32 %v230_v25, 0.0  ;;  %p686_p12 = pnand %p685_p6, %p1093_p11 }
  0x41   : > { %251 = vst.msk [vmem:[%s894_s6 + $0x14] sm:$0x1] %vm246_vm1, %v755_v0  ;;  %253 = vst.msk [vmem:[%s894_s6 + $0x1c] sm:$0x1] %vm246_vm1, %v755_v0  ;;  %v239_v34 = vmax.f32 %v231_v26, 0.0  ;;  %v240_v35 = vmax.f32 %v232_v27, 0.0  ;;  %v574_v37 = vpack.c.bf16 %v236_v29, %v236_v29 }
  0x42   : > { %255 = vst.msk [vmem:[%s894_s6 + $0x24] sm:$0x1] %vm246_vm1, %v755_v0  ;;  %257 = vst.msk [vmem:[%s894_s6 + $0x2c] sm:$0x1] %vm246_vm1, %v755_v0  ;;  %v241_v36 = vmax.f32 %v233_v28, 0.0  ;;  %v575_v38 = vpack.c.bf16 %v237_v30, %v237_v30  ;;  %v242_v39 = vmax.f32 %v946_v31, 0.0  ;;  %v576_v41 = vpack.c.bf16 %v238_v33, %v238_v33  ;;  %p687_p13 = pneg %p686_p12 }
  0x43   : > { %259 = vst.msk [vmem:[%s894_s6 + $0x34] sm:$0x1] %vm246_vm1, %v755_v0  ;;  %261 = vst.msk [vmem:[%s894_s6 + $0x3c] sm:$0x1] %vm246_vm1, %v755_v0  ;;  %v243_v40 = vmax.f32 %v948_v32, 0.0  ;;  %v577_v42 = vpack.c.bf16 %v239_v34, %v239_v34  ;;  %v578_v43 = vpack.c.bf16 %v240_v35, %v240_v35  ;;  %v299_v45 = vshrl.u32 %v574_v37, 16 }
  0x44   : > { %263 = vst.msk [vmem:[%s894_s6 + $0x44] sm:$0x1] %vm246_vm1, %v755_v0  ;;  %265 = vst.msk [vmem:[%s894_s6 + $0x4c] sm:$0x1] %vm246_vm1, %v755_v0  ;;  %v579_v44 = vpack.c.bf16 %v241_v36, %v241_v36  ;;  %v302_v46 = vshll.u32 %v574_v37, 16  ;;  %v307_v47 = vshrl.u32 %v575_v38, 16  ;;  %v580_v26 = vpack.c.bf16 %v242_v39, %v242_v39 }
  0x45   : > { %v310_v48 = vshll.u32 %v575_v38, 16  ;;  %v538_v49 = vld [vmem:[%s894_s6 + $0x8] sm:$0xf]  ;;  %v542_v51 = vld [vmem:[%s894_s6 + $0x10] sm:$0xf]  ;;  %v315_v53 = vshrl.u32 %v576_v41, 16  ;;  %vm965_vm5 = vmand %vm246_vm1, %vm386_vm3  ;;  %v581_v27 = vpack.c.bf16 %v243_v40, %v243_v40 }
  0x46   : > { %v318_v54 = vshll.u32 %v576_v41, 16  ;;  %v323_v55 = vshrl.u32 %v577_v42, 16  ;;  %v326_v56 = vshll.u32 %v577_v42, 16  ;;  %v301_v57 = vrot.slane %v299_v45, 7  ;;  %v546_v60 = vld [vmem:[%s894_s6 + $0x18] sm:$0xf] }
  0x47   : > { %v540_v50 = vld [vmem:[%s894_s6 + $0xc] sm:$0x1]  ;;  %v309_v59 = vrot.slane %v307_v47, 7  ;;  %v331_v61 = vshrl.u32 %v578_v43, 16  ;;  %v334_v62 = vshll.u32 %v578_v43, 16  ;;  %v317_v0 = vrot.slane %v315_v53, 7 }
  0x48   : > { %v544_v52 = vld [vmem:[%s894_s6 + $0x14] sm:$0x1]  ;;  %v548_v1 = vld [vmem:[%s894_s6 + $0x1c] sm:$0x1]  ;;  %v325_v2 = vrot.slane %v323_v55, 7  ;;  %v339_v3 = vshrl.u32 %v579_v44, 16  ;;  %v304_v5 = vor.u32 %v302_v46, %v301_v57 }
  0x49   : > { %v342_v4 = vshll.u32 %v579_v44, 16  ;;  %v305_v6 = vrot.slane %v301_v57, 4  ;;  %v312_v7 = vor.u32 %v310_v48, %v309_v59  ;;  %v313_v8 = vrot.slane %v309_v59, 4  ;;  %v550_v9 = vld [vmem:[%s894_s6 + $0x20] sm:$0xf]  ;;  %s688_s30 = sshll.u32 %s756_s29, 4  ;;  %s689_s30 = int_to_ptr.vmem [resolvable:$false] %s688_s30 }
  0x4a   : > { %v552_v10 = vld [vmem:[%s894_s6 + $0x24] sm:$0x1]  ;;  %v320_v11 = vor.u32 %v318_v54, %v317_v0  ;;  %v321_v12 = vrot.slane %v317_v0, 4  ;;  %v328_v13 = vor.u32 %v326_v56, %v325_v2  ;;  %v329_v14 = vrot.slane %v325_v2, 4  ;;  %v554_v24 = vld [vmem:[%s894_s6 + $0x28] sm:$0xf]  ;;  %p691_p8 = scmp.lt.s32.totalorder %s1023_s20, %s689_s30 }
  0x4b   : > { %v383_v15 = vsel %vm958_vm4, %v304_v5, %v538_v49  ;;  %v389_v16 = vsel %vm965_vm5, %v305_v6, %v540_v50  ;;  %v392_v17 = vsel %vm958_vm4, %v312_v7, %v542_v51  ;;  %v395_v18 = vsel %vm965_vm5, %v313_v8, %v544_v52  ;;  %v556_v28 = vld [vmem:[%s894_s6 + $0x2c] sm:$0x1]  ;;  %v558_v29 = vld [vmem:[%s894_s6 + $0x30] sm:$0xf]  ;;  %v560_v30 = vld [vmem:[%s894_s6 + $0x34] sm:$0x1] }
  0x4c   : > { %539 = vst [vmem:[%s894_s6 + $0x8] sm:$0xf] %v383_v15  ;;  %541 = vst [vmem:[%s894_s6 + $0xc] sm:$0x1] %v389_v16  ;;  %v398_v19 = vsel %vm958_vm4, %v320_v11, %v546_v60  ;;  %v401_v20 = vsel %vm965_vm5, %v321_v12, %v548_v1  ;;  %v404_v21 = vsel %vm958_vm4, %v328_v13, %v550_v9  ;;  %v333_v23 = vrot.slane %v331_v61, 7  ;;  %s690_s9 = scalar_lea.vmem %s689_s30, 2560 }
  0x4d   : > { %543 = vst [vmem:[%s894_s6 + $0x10] sm:$0xf] %v392_v17  ;;  %545 = vst [vmem:[%s894_s6 + $0x14] sm:$0x1] %v395_v18  ;;  %v407_v22 = vsel %vm965_vm5, %v329_v14, %v552_v10  ;;  %v341_v25 = vrot.slane %v339_v3, 7  ;;  %v347_v35 = vshrl.u32 %v580_v26, 16  ;;  %p692_p10 = scmp.lt.s32.totalorder %s690_s9, %s684_s28 }
  0x4e   : > { %547 = vst [vmem:[%s894_s6 + $0x18] sm:$0xf] %v398_v19  ;;  %549 = vst [vmem:[%s894_s6 + $0x1c] sm:$0x1] %v401_v20  ;;  %v336_v31 = vor.u32 %v334_v62, %v333_v23  ;;  %v337_v32 = vrot.slane %v333_v23, 4  ;;  %v350_v36 = vshll.u32 %v580_v26, 16 }
  0x4f   : > { %551 = vst [vmem:[%s894_s6 + $0x20] sm:$0xf] %v404_v21  ;;  %553 = vst [vmem:[%s894_s6 + $0x24] sm:$0x1] %v407_v22  ;;  %v344_v33 = vor.u32 %v342_v4, %v341_v25  ;;  %v345_v34 = vrot.slane %v341_v25, 4  ;;  %v355_v37 = vshrl.u32 %v581_v27, 16  ;;  %p693_p0 = por %p692_p10, %p691_p8 }
  0x50   : > { %v358_v38 = vshll.u32 %v581_v27, 16  ;;  %v410_v39 = vsel %vm958_vm4, %v336_v31, %v554_v24  ;;  %v413_v40 = vsel %vm965_vm5, %v337_v32, %v556_v28  ;;  %v349_v43 = vrot.slane %v347_v35, 7  ;;  %v562_v44 = vld [vmem:[%s894_s6 + $0x38] sm:$0xf]  ;;  %v564_v46 = vld [vmem:[%s894_s6 + $0x3c] sm:$0x1] }
  0x51   : > { %v416_v41 = vsel %vm958_vm4, %v344_v33, %v558_v29  ;;  %v419_v42 = vsel %vm965_vm5, %v345_v34, %v560_v30  ;;  %555 = vst [vmem:[%s894_s6 + $0x28] sm:$0xf] %v410_v39  ;;  %557 = vst [vmem:[%s894_s6 + $0x2c] sm:$0x1] %v413_v40  ;;  %v357_v45 = vrot.slane %v355_v37, 7  ;;  %p694_p2 = pnand %p693_p0, %p687_p13 }
  0x52   : > { %559 = vst [vmem:[%s894_s6 + $0x30] sm:$0xf] %v416_v41  ;;  %561 = vst [vmem:[%s894_s6 + $0x34] sm:$0x1] %v419_v42  ;;  %v566_v47 = vld [vmem:[%s894_s6 + $0x40] sm:$0xf]  ;;  %v352_v49 = vor.u32 %v350_v36, %v349_v43 }
  0x53   : > { %v568_v48 = vld [vmem:[%s894_s6 + $0x44] sm:$0x1]  ;;  %v353_v50 = vrot.slane %v349_v43, 4  ;;  %v360_v51 = vor.u32 %v358_v38, %v357_v45  ;;  %v361_v52 = vrot.slane %v357_v45, 4 }
  0x54   : > { %v422_v53 = vsel %vm958_vm4, %v352_v49, %v562_v44 }
  0x55   : > { %v425_v54 = vsel %vm965_vm5, %v353_v50, %v564_v46  ;;  %v428_v55 = vsel %vm958_vm4, %v360_v51, %v566_v47  ;;  %v431_v56 = vsel %vm965_vm5, %v361_v52, %v568_v48  ;;  %563 = vst [vmem:[%s894_s6 + $0x38] sm:$0xf] %v422_v53 }
  0x56   : > { %565 = vst [vmem:[%s894_s6 + $0x3c] sm:$0x1] %v425_v54  ;;  %567 = vst [vmem:[%s894_s6 + $0x40] sm:$0xf] %v428_v55 }
  0x57   : > { %569 = vst [vmem:[%s894_s6 + $0x44] sm:$0x1] %v431_v56 }
  0x58   : > { %697 = shalt.err (!%p694_p2)
}
  0x59   : > { %s698_s10 = scalar_lea.hbm %s1021_s26, 1280  ;;  %s702_s6 = scalar_lea.hbm %s1082_s3, 2560 }
  0x5a   : > { %p699_p4 = scmp.ne.s32.totalorder %s1021_s26, %s698_s10  ;;  %p703_p9 = scmp.lt.u32.totalorder %s1021_s26, %s1082_s3 }
  0x5b   : > { %p704_p1 = scmp.lt.u32.totalorder %s702_s6, %s698_s10  ;;  %p706_p6 = scmp.lt.u32.totalorder %s698_s10, %s1021_s26 }
  0x5c   : > { %p700_p5 = pnand %p699_p4, %p1093_p11 }
  0x5d   : > { %p705_p3 = por %p704_p1, %p703_p9 }
  0x5e   : > { %p701_p7 = pneg %p700_p5 }
  0x5f   : > { %p707_p12 = por %p706_p6, %p705_p3 }
  0x61   : > { %p708_p13 = pnand %p707_p12, %p701_p7 }
  0x63   : > { %711 = shalt.err (!%p708_p13)
}
  0x64   : > { %s757_s8 = smov 64   ;;  %s758_s17 = smov 4  }
  0x65   : > { %605 = dma.vmem_to_hbm [thread:$0]  (%p1093_p11), %s1023_s20, 1280, %s1021_s26, %s434_s27, %s757_s8, %s757_s8, %s758_s17  }
  0x66 PF: > { %s462_s19 = sand.u32 1, %s738_s12   ;;  %p1094_p8 = scmp.ne.s32.totalorder %s1087_s25, 0 }
  0x67   : > { %p1095_p10 = scmp.ge.s32.totalorder %s750_s15, 2  ;;  %s463_s16 = scalar_lea.sflag [#allocation4], %s462_s19 }
  0x69   : > { %p612_p0 = pnand %p1095_p10, %p1094_p8 }
  0x6b   : > { %733 = dma.done.wait (!%p612_p0), %s463_s16, 1280  }
  0x6c   : > { %735 = vsyncadd (!%p612_p0), %s463_s16, 4294966016  ;;  %p16_p2 = scmp.ge.s32.totalorder %s804_s18, 4   ;;  %s1096_s12 = smov %s742_s13 }
  0x6d   : > { %s1097_s13 = smov %s746_s14  ;;  %s1098_s14 = smov %s816_s21 }
  0x6e   : > { %s1099_s15 = smov %s804_s18  ;;  %18 = sbr.rel (!%p16_p2) target bundleno = 5 (0x5), region = 78 }
  0x75   :  { %468 = vsyncpa [#allocation3], 1 }
  0x76   :  { %470 = vsyncpa [#allocation3 + $0x1], 1 }
  0x77   :  { %471 = vsyncpa [#allocation4], 1 }
  0x78   :  { %473 = vsyncpa [#allocation4 + $0x1], 1 }

// kernel: forward.15
= control target key start
LH: loop header
LB: loop body
LE: loop exit
PB: predicated region body
PF: predicated region fallthrough
CT: control target
= control target key end

     0   :  { %9 = vsyncpa [#allocation3], 0  ;;  %s1303_s0 = inlined_call_operand.hbm [shape: bf16[2,64,128], index: 0, kind: input, shape index: {}]   ;;  %s1304_s1 = inlined_call_operand.hbm [shape: bf16[2,10,10,32], index: 1, kind: input, shape index: {}]   ;;  %s1305_s2 = inlined_call_operand.vmem [shape: f32[1,32], index: 2, kind: input, shape index: {}]   ;;  %s1306_s3 = inlined_call_operand.vmem [shape: f32[1,32], index: 3, kind: input, shape index: {}]   ;;  %s1307_s4 = inlined_call_operand.vmem [shape: bf16[2,10,10,32], index: 4, kind: output, shape index: {}]  }
   0x1   :  { %11 = vsyncpa [#allocation3 + $0x1], 0 }
   0x2   :  { %12 = vsyncpa [#allocation5], 0 }
   0x3   :  { %14 = vsyncpa [#allocation5 + $0x1], 0  ;;  %s961_s15 = smov 0   ;;  %s963_s16 = smov 0  }
   0x4   :  { %s965_s17 = smov 0   ;;  %s967_s18 = smov 0  }
   0x5 LB: > { %s980_s19 = sadd.s32 4294967295, %s929_s18   ;;  %s983_s20 = sadd.s32 1, %s929_s18   ;;  %s929_s18 = sphi %s967_s18, %s1321_s18   ;;  %s925_s17 = sphi %s965_s17, %s1320_s17   ;;  %s921_s16 = sphi %s963_s16, %s1319_s16   ;;  %s917_s15 = sphi %s961_s15, %s1318_s15  }
   0x6   : > { %s24_s21 = ssub.s32 %s929_s18, %s983_s20  ;;  %s27_s22 = sadd.s32 1, %s925_s17 }
   0x7   : > { %p25_p0 = scmp.eq.s32.totalorder %s24_s21, 0  ;;  %p34_p1 = scmp.ne.s32.totalorder %s925_s17, %s921_s16 }
   0x8   : > { %p35_p2 = scmp.eq.s32.totalorder %s929_s18, 0  ;;  %p40_p3 = scmp.ne.s32.totalorder %s921_s16, %s917_s15 }
   0x9   : > { %s993_s23 = scalar_select %p25_p0, %s925_s17, %s27_s22  }
   0xa   : > { %p36_p4 = por %p35_p2, %p34_p1  ;;  %p41_p5 = scmp.eq.s32.totalorder %s980_s19, 0 }
   0xb   : > { %p795_p6 = scmp.lt.s32.totalorder %s929_s18, 2  ;;  %s1002_s25 = sand.u32 1, %s925_s17  }
   0xc   : > { %p997_p7 = por %p41_p5, %p40_p3  ;;  %s685_s26 = sshll.u32 %s1002_s25, 5 }
   0xd   : > { %s752_s27 = sshll.u32 %s929_s18, 9  ;;  %s168_s5 = scalar_lea.vmem [#allocation2], %s685_s26 }
   0xe   : > { %s1309_s24 = scalar_select %p997_p7, 1, 0 }
   0xf   : > { %s1009_s30 = scalar_lea.hbm %s1303_s0, %s752_s27  ;;  %s175_s6 = sshll.u32 %s168_s5, 4  ;;  %s1011_s6 = int_to_ptr.vmem [resolvable:$true] %s175_s6 }
  0x10   : > { %p1013_p8 = pnand %p795_p6, %p36_p4  ;;  %s165_s8 = scalar_lea.sflag [#allocation3], %s1002_s25 }
  0x11   : > { %s831_s9 = scalar_lea.hbm %s1009_s30, 512  ;;  %s836_s12 = scalar_lea.hbm %s1303_s0, 1024 }
  0x12   : > { %p832_p10 = scmp.ne.s32.totalorder %s1009_s30, %s831_s9  ;;  %p833_p11 = pneg %p1013_p8 }
  0x13   : > { %p837_p0 = scmp.lt.u32.totalorder %s1009_s30, %s1303_s0  ;;  %p838_p1 = scmp.lt.u32.totalorder %s836_s12, %s831_s9 }
  0x14   : > { %p834_p12 = pnand %p833_p11, %p832_p10  ;;  %p840_p3 = scmp.lt.u32.totalorder %s831_s9, %s1009_s30 }
  0x15   : > { %p839_p2 = por %p838_p1, %p837_p0 }
  0x16   : > { %p835_p13 = pneg %p834_p12 }
  0x17   : > { %p841_p4 = por %p840_p3, %p839_p2 }
  0x19   : > { %p842_p5 = pnand %p841_p4, %p835_p13 }
  0x1b   : > { %845 = shalt.err (!%p842_p5)
}
  0x1c   : > { %s846_s15 = scalar_lea.vmem %s1011_s6, 512  ;;  %s931_s21 = smov [#allocation2]  }
  0x1d   : > { %p847_p6 = scmp.ne.s32.totalorder %s1011_s6, %s846_s15  ;;  %s851_s22 = sshll.u32 %s931_s21, 4  ;;  %s852_s22 = int_to_ptr.vmem [resolvable:$false] %s851_s22 }
  0x1e   : > { %s853_s26 = scalar_lea.vmem %s852_s22, 1024  ;;  %p854_p9 = scmp.lt.s32.totalorder %s1011_s6, %s852_s22 }
  0x1f   : > { %p849_p10 = pnand %p847_p6, %p833_p11  ;;  %p855_p0 = scmp.lt.s32.totalorder %s853_s26, %s846_s15 }
  0x21   : > { %p850_p12 = pneg %p849_p10  ;;  %p856_p1 = por %p855_p0, %p854_p9 }
  0x23   : > { %p857_p2 = pnand %p856_p1, %p850_p12 }
  0x25   : > { %860 = shalt.err (!%p857_p2)
}
  0x26   : > { %s932_s27 = smov 64   ;;  %s933_s28 = smov 4  }
  0x27   : > { %791 = dma.hbm_to_vmem [thread:$0]  (!%p1013_p8), %s1009_s30, 512, %s1011_s6, %s165_s8, %s932_s27, %s932_s27, %s933_s28  }
  0x28   : > { %p204_p9 = scmp.lt.s32.totalorder %s929_s18, 3  ;;  %s780_s29 = smul.u32 80, %s1002_s25 }
  0x29   : > { %p1311_p13 = scmp.ge.s32.totalorder %s929_s18, 1  ;;  %s781_s9 = smul.u32 1280, %s929_s18 }
  0x2a   : > { %s189_s13 = scalar_lea.vmem [#allocation4], %s780_s29  ;;  %s186_s30 = scalar_lea.sflag [#allocation5], %s1002_s25 }
  0x2b   : > { %p1053_p3 = pnand %p1311_p13, %p204_p9  ;;  %s1061_s12 = scalar_lea.hbm %s1304_s1, %s781_s9 }
  0x2c   : > { %s196_s14 = sshll.u32 %s189_s13, 4  ;;  %s861_s6 = scalar_lea.hbm %s1061_s12, 1280  ;;  %s1063_s14 = int_to_ptr.vmem [resolvable:$true] %s196_s14 }
  0x2d   : > { %p862_p4 = scmp.ne.s32.totalorder %s1061_s12, %s861_s6  ;;  %s866_s15 = scalar_lea.hbm %s1304_s1, 2560 }
  0x2e   : > { %p867_p10 = scmp.lt.u32.totalorder %s1061_s12, %s1304_s1  ;;  %p868_p12 = scmp.lt.u32.totalorder %s866_s15, %s861_s6 }
  0x2f   : > { %p864_p5 = pnand %p862_p4, %p833_p11  ;;  %p870_p1 = scmp.lt.u32.totalorder %s861_s6, %s1061_s12 }
  0x30   : > { %p869_p0 = por %p868_p12, %p867_p10 }
  0x31   : > { %p865_p6 = pneg %p864_p5 }
  0x32   : > { %p871_p2 = por %p870_p1, %p869_p0 }
  0x34   : > { %p872_p9 = pnand %p871_p2, %p865_p6 }
  0x36   : > { %875 = shalt.err (!%p872_p9)
}
  0x37   : > { %s876_s26 = scalar_lea.vmem %s1063_s14, 1280  ;;  %s934_s29 = smov [#allocation4]  }
  0x38   : > { %p877_p13 = scmp.ne.s32.totalorder %s1063_s14, %s876_s26  ;;  %s881_s9 = sshll.u32 %s934_s29, 4  ;;  %s882_s9 = int_to_ptr.vmem [resolvable:$false] %s881_s9 }
  0x39   : > { %s883_s10 = scalar_lea.vmem %s882_s9, 2560  ;;  %p884_p7 = scmp.lt.s32.totalorder %s1063_s14, %s882_s9 }
  0x3a   : > { %p879_p4 = pnand %p877_p13, %p833_p11  ;;  %p885_p10 = scmp.lt.s32.totalorder %s883_s10, %s876_s26 }
  0x3c   : > { %p880_p5 = pneg %p879_p4  ;;  %p886_p12 = por %p885_p10, %p884_p7 }
  0x3e   : > { %p887_p0 = pnand %p886_p12, %p880_p5 }
  0x40   : > { %890 = shalt.err (!%p887_p0)
}
  0x41   : > { %794 = dma.hbm_to_vmem [thread:$0]  (!%p1013_p8), %s1061_s12, 1280, %s1063_s14, %s186_s30, %s932_s27, %s932_s27, %s933_s28  }
  0x42   : > { %208 = sbr.rel (%p1053_p3) target bundleno = 125 (0x7d), region = 36  ;;  %s210_s11 = sand.u32 (!%p1053_p3), 1, %s921_s16  }
  0x43   : > { %s690_s13 = sshll.u32 (!%p1053_p3), %s210_s11, 5  ;;  %s211_s6 = scalar_lea.sflag (!%p1053_p3), [#allocation3], %s210_s11 }
  0x44   : > { %s1097_s18 = scalar_lea.vmem (!%p1053_p3), [#allocation2], %s690_s13  ;;  %p1313_p7 = scmp.ne.s32.totalorder (!%p1053_p3), %s1309_s24, 0 }
  0x49   : > { %908 = dma.done.wait (%p1313_p7), %s211_s6, 512  }
  0x4a   : > { %910 = vsyncadd (%p1313_p7), %s211_s6, 4294966784  ;;  %s782_s25 = smul.u32 80, %s210_s11  ;;  %s220_s7 = scalar_lea.sflag [#allocation5], %s210_s11 }
  0x4c   : > { %s1103_s8 = scalar_lea.vmem [#allocation4], %s782_s25 }
  0x4d   : > { %912 = dma.done.wait (%p1313_p7), %s220_s7, 1280  }
  0x4e   : > { %914 = vsyncadd (%p1313_p7), %s220_s7, 4294966016  ;;  %p253_p8 = scmp.lt.s32.totalorder %s980_s19, 1  ;;  %vm403_vm0 = vcmask 257024   ;;  %vm405_vm1 = vcmask 253952   ;;  %v935_v0 = vmov 0   ;;  %v762_v1 = vld [vmem:[%s1097_s18] sm:$0xff]  }
  0x4f   : > { %v692_v2 = vld [vmem:[%s1103_s8 + $0x8] ss:$8 sps:$4 sm:$0xff]   ;;  %v693_v3 = vld [vmem:[%s1103_s8 + $0xc] sm:$0x1]  ;;  %v763_v4 = vunpack.c.l.bf16 %v762_v1  ;;  %v764_v9 = vunpack.c.h.bf16 %v762_v1  ;;  %v695_v10 = vld [vmem:[%s1103_s8 + $0x14] sm:$0x1] }
  0x50   : > { %s1323_s19 = smov (!%p253_p8, %s980_s19), 1  ;;  %v292_v5 = vunpack.c.l.bf16 %v692_v2  ;;  %v293_v6 = vunpack.c.l.bf16 %v693_v3  ;;  %v1162_v7 = vld [vmem:[%s1305_s2] ss:$0 sm:$0xff]  ;;  %vm324_vm2 = vcmask 1046528   ;;  %v294_v11 = vunpack.c.h.bf16 %v692_v2  ;;  %v777_v13 = vld [vmem:[%s1097_s18 + $0x8] sm:$0xff]   ;;  %v1180_v29 = vld [vmem:[%s1097_s18 + $0x10] sm:$0xff]  }
  0x51   : > { %s783_s27 = smul.u32 80, %s1323_s19  ;;  %v1167_v8 = vld [vmem:[%s1306_s3] ss:$0 sm:$0xff]  ;;  %v295_v12 = vunpack.c.l.bf16 %v695_v10  ;;  %v697_v15 = vld [vmem:[%s1103_s8 + $0x1c] sm:$0x1]  ;;  %v364_v18 = vmul.f32 %v763_v4, %v1162_v7  ;;  %v365_v19 = vmul.f32 %v764_v9, %v1162_v7  ;;  %v767_v22 = vunpack.c.l.bf16 %v777_v13 }
  0x52   : > { %v696_v14 = vld [vmem:[%s1103_s8 + $0x18] ss:$8 sps:$4 sm:$0xff]   ;;  %v325_v16 = vrot.slane %v292_v5, 1  ;;  %v326_v17 = vrot.slane %v293_v6, 1  ;;  %vm539_vm3 = vsmask.f32 7938  ;;  %v297_v28 = vunpack.c.l.bf16 %v697_v15 }
  0x53   : > { %s1114_s12 = scalar_lea.vmem %s1307_s4, %s783_s27  ;;  %vm545_vm4 = vsmask.f32 256  ;;  %v328_v20 = vrot.slane %v294_v11, 1  ;;  %v329_v21 = vrot.slane %v295_v12, 1  ;;  %v296_v23 = vunpack.c.l.bf16 %v696_v14  ;;  %v699_v24 = vld [vmem:[%s1103_s8 + $0x24] sm:$0x1]  ;;  %vm1199_vm5 = vmand %vm403_vm0, %vm539_vm3 }
  0x54   : > { %407 = vst.msk [vmem:[%s1114_s12 + $0x8] sm:$0xf] %vm403_vm0, %v935_v0  ;;  %404 = vst.msk [vmem:[%s1114_s12] sm:$0xf] %vm403_vm0, %v935_v0  ;;  %v327_v25 = vsel %vm324_vm2, %v325_v16, %v326_v17  ;;  %v379_v26 = vadd.f32 %v1167_v8, %v364_v18  ;;  %v380_v27 = vadd.f32 %v1167_v8, %v365_v19  ;;  %v768_v33 = vunpack.c.h.bf16 %v777_v13  ;;  %v1185_v38 = vld [vmem:[%s1103_s8 + $0x28] ss:$8 sps:$4 sm:$0xff]  }
  0x55   : > { %409 = vst.msk [vmem:[%s1114_s12 + $0x10] sm:$0xf] %vm403_vm0, %v935_v0  ;;  %411 = vst.msk [vmem:[%s1114_s12 + $0x18] sm:$0xf] %vm403_vm0, %v935_v0  ;;  %v330_v30 = vsel %vm324_vm2, %v328_v20, %v329_v21  ;;  %v331_v31 = vrot.slane %v296_v23, 1  ;;  %v366_v32 = vmul.f32 %v767_v22, %v1162_v7  ;;  %v298_v36 = vunpack.c.h.bf16 %v696_v14 }
  0x56   : > { %413 = vst.msk [vmem:[%s1114_s12 + $0x20] sm:$0xf] %vm403_vm0, %v935_v0  ;;  %415 = vst.msk [vmem:[%s1114_s12 + $0x28] sm:$0xf] %vm403_vm0, %v935_v0  ;;  %v387_v34 = vadd.f32 %v379_v26, %v327_v25  ;;  %v388_v35 = vadd.f32 %v380_v27, %v330_v30  ;;  %v299_v37 = vunpack.c.l.bf16 %v699_v24  ;;  %v701_v39 = vld [vmem:[%s1103_s8 + $0x2c] sm:$0x1]  ;;  %v367_v42 = vmul.f32 %v768_v33, %v1162_v7 }
  0x57   : > { %417 = vst.msk [vmem:[%s1114_s12 + $0x30] sm:$0xf] %vm403_vm0, %v935_v0  ;;  %419 = vst.msk [vmem:[%s1114_s12 + $0x38] sm:$0xf] %vm403_vm0, %v935_v0  ;;  %v332_v40 = vrot.slane %v297_v28, 1  ;;  %v381_v41 = vadd.f32 %v1167_v8, %v366_v32  ;;  %v771_v43 = vunpack.c.l.bf16 %v1180_v29  ;;  %v334_v46 = vrot.slane %v298_v36, 1 }
  0x58   : > { %421 = vst.msk [vmem:[%s1114_s12 + $0x40] sm:$0xf] %vm403_vm0, %v935_v0  ;;  %423 = vst.msk [vmem:[%s1114_s12 + $0x48] sm:$0xf] %vm403_vm0, %v935_v0  ;;  %v395_v44 = vmax.f32 %v387_v34, 0.0  ;;  %v396_v45 = vmax.f32 %v388_v35, 0.0  ;;  %v382_v49 = vadd.f32 %v1167_v8, %v367_v42  ;;  %v300_v50 = vunpack.c.l.bf16 %v1185_v38 }
  0x59   : > { %408 = vst.msk [vmem:[%s1114_s12 + $0xc] sm:$0x1] %vm405_vm1, %v935_v0  ;;  %406 = vst.msk [vmem:[%s1114_s12 + $0x4] sm:$0x1] %vm405_vm1, %v935_v0  ;;  %v335_v47 = vrot.slane %v299_v37, 1  ;;  %v333_v48 = vsel %vm324_vm2, %v331_v31, %v332_v40  ;;  %v301_v51 = vunpack.c.l.bf16 %v701_v39  ;;  %v368_v59 = vmul.f32 %v771_v43, %v1162_v7  ;;  %v779_v25 = vld [vmem:[%s1097_s18 + $0x18] sm:$0xff]  }
  0x5a   : > { %410 = vst.msk [vmem:[%s1114_s12 + $0x14] sm:$0x1] %vm405_vm1, %v935_v0  ;;  %412 = vst.msk [vmem:[%s1114_s12 + $0x1c] sm:$0x1] %vm405_vm1, %v935_v0  ;;  %v753_v52 = vpack.c.bf16 %v395_v44, %v395_v44  ;;  %v754_v53 = vpack.c.bf16 %v396_v45, %v396_v45  ;;  %v389_v54 = vadd.f32 %v381_v41, %v333_v48  ;;  %v337_v57 = vrot.slane %v300_v50, 1 }
  0x5b   : > { %414 = vst.msk [vmem:[%s1114_s12 + $0x24] sm:$0x1] %vm405_vm1, %v935_v0  ;;  %416 = vst.msk [vmem:[%s1114_s12 + $0x2c] sm:$0x1] %vm405_vm1, %v935_v0  ;;  %v336_v55 = vsel %vm324_vm2, %v334_v46, %v335_v47  ;;  %v338_v58 = vrot.slane %v301_v51, 1  ;;  %v383_v5 = vadd.f32 %v1167_v8, %v368_v59  ;;  %v772_v12 = vunpack.c.h.bf16 %v1180_v29 }
  0x5c   : > { %418 = vst.msk [vmem:[%s1114_s12 + $0x34] sm:$0x1] %vm405_vm1, %v935_v0  ;;  %420 = vst.msk [vmem:[%s1114_s12 + $0x3c] sm:$0x1] %vm405_vm1, %v935_v0  ;;  %v390_v56 = vadd.f32 %v382_v49, %v336_v55  ;;  %v458_v60 = vshrl.u32 %v753_v52, 16  ;;  %v461_v61 = vshll.u32 %v753_v52, 16  ;;  %v302_v13 = vunpack.c.h.bf16 %v1185_v38 }
  0x5d   : > { %422 = vst.msk [vmem:[%s1114_s12 + $0x44] sm:$0x1] %vm405_vm1, %v935_v0  ;;  %424 = vst.msk [vmem:[%s1114_s12 + $0x4c] sm:$0x1] %vm405_vm1, %v935_v0  ;;  %v466_v62 = vshrl.u32 %v754_v53, 16  ;;  %v469_v63 = vshll.u32 %v754_v53, 16  ;;  %v339_v4 = vsel %vm324_vm2, %v337_v57, %v338_v58  ;;  %v369_v45 = vmul.f32 %v772_v12, %v1162_v7 }
  0x5e   : > { %v703_v0 = vld [vmem:[%s1103_s8 + $0x34] sm:$0x1]  ;;  %v397_v2 = vmax.f32 %v389_v54, 0.0  ;;  %v398_v3 = vmax.f32 %v390_v56, 0.0  ;;  %v460_v6 = vrot.slane %v458_v60, 7  ;;  %vm1208_vm6 = vmand %vm405_vm1, %vm545_vm4  ;;  %v391_v19 = vadd.f32 %v383_v5, %v339_v4 }
  0x5f   : > { %v718_v9 = vld [vmem:[%s1114_s12 + $0x8] sm:$0xf]  ;;  %v468_v11 = vrot.slane %v466_v62, 7  ;;  %v722_v15 = vld [vmem:[%s1114_s12 + $0x10] sm:$0xf]  ;;  %v303_v20 = vunpack.c.l.bf16 %v703_v0  ;;  %v340_v41 = vrot.slane %v302_v13, 1  ;;  %v775_v46 = vunpack.c.l.bf16 %v779_v25 }
  0x60   : > { %v720_v14 = vld [vmem:[%s1114_s12 + $0xc] sm:$0x1]  ;;  %v755_v17 = vpack.c.bf16 %v397_v2, %v397_v2  ;;  %v756_v18 = vpack.c.bf16 %v398_v3, %v398_v3  ;;  %v463_v21 = vor.u32 %v461_v61, %v460_v6  ;;  %v464_v22 = vrot.slane %v460_v6, 4  ;;  %v704_v30 = vld [vmem:[%s1103_s8 + $0x38] ss:$8 sps:$4 sm:$0xff]  }
  0x61   : > { %v724_v16 = vld [vmem:[%s1114_s12 + $0x14] sm:$0x1]  ;;  %v471_v23 = vor.u32 %v469_v63, %v468_v11  ;;  %v472_v24 = vrot.slane %v468_v11, 4  ;;  %v726_v35 = vld [vmem:[%s1114_s12 + $0x18] sm:$0xf]  ;;  %v399_v40 = vmax.f32 %v391_v19, 0.0  ;;  %v304_v47 = vunpack.c.l.bf16 %v704_v30 }
  0x62   : > { %v474_v26 = vshrl.u32 %v755_v17, 16  ;;  %v477_v27 = vshll.u32 %v755_v17, 16  ;;  %v482_v28 = vshrl.u32 %v756_v18, 16  ;;  %v485_v29 = vshll.u32 %v756_v18, 16  ;;  %v705_v36 = vld [vmem:[%s1103_s8 + $0x3c] sm:$0x1] }
  0x63   : > { %v542_v31 = vsel %vm1199_vm5, %v463_v21, %v718_v9  ;;  %v548_v32 = vsel %vm1208_vm6, %v464_v22, %v720_v14  ;;  %v551_v33 = vsel %vm1199_vm5, %v471_v23, %v722_v15  ;;  %v554_v34 = vsel %vm1208_vm6, %v472_v24, %v724_v16  ;;  %v728_v38 = vld [vmem:[%s1114_s12 + $0x1c] sm:$0x1]  ;;  %v730_v42 = vld [vmem:[%s1114_s12 + $0x20] sm:$0xf]  ;;  %v732_v43 = vld [vmem:[%s1114_s12 + $0x24] sm:$0x1] }
  0x64   : > { %719 = vst [vmem:[%s1114_s12 + $0x8] sm:$0xf] %v542_v31  ;;  %721 = vst [vmem:[%s1114_s12 + $0xc] sm:$0x1] %v548_v32  ;;  %v476_v37 = vrot.slane %v474_v26, 7  ;;  %v484_v39 = vrot.slane %v482_v28, 7  ;;  %v757_v52 = vpack.c.bf16 %v399_v40, %v399_v40  ;;  %v384_v54 = vadd.f32 %v1167_v8, %v369_v45 }
  0x65   : > { %723 = vst [vmem:[%s1114_s12 + $0x10] sm:$0xf] %v551_v33  ;;  %725 = vst [vmem:[%s1114_s12 + $0x14] sm:$0x1] %v554_v34  ;;  %v341_v44 = vrot.slane %v303_v20, 1  ;;  %v305_v55 = vunpack.c.l.bf16 %v705_v36  ;;  %v343_v0 = vrot.slane %v304_v47, 1  ;;  %v370_v3 = vmul.f32 %v775_v46, %v1162_v7 }
  0x66   : > { %v479_v48 = vor.u32 %v477_v27, %v476_v37  ;;  %v480_v49 = vrot.slane %v476_v37, 4  ;;  %v487_v50 = vor.u32 %v485_v29, %v484_v39  ;;  %v488_v51 = vrot.slane %v484_v39, 4  ;;  %v707_v60 = vld [vmem:[%s1103_s8 + $0x44] sm:$0x1]  ;;  %v734_v12 = vld [vmem:[%s1114_s12 + $0x28] sm:$0xf] }
  0x67   : > { %v342_v53 = vsel %vm324_vm2, %v340_v41, %v341_v44  ;;  %v490_v61 = vshrl.u32 %v757_v52, 16  ;;  %v493_v62 = vshll.u32 %v757_v52, 16  ;;  %v344_v2 = vrot.slane %v305_v55, 1  ;;  %v736_v13 = vld [vmem:[%s1114_s12 + $0x2c] sm:$0x1] }
  0x68   : > { %v557_v56 = vsel %vm1199_vm5, %v479_v48, %v726_v35  ;;  %v560_v57 = vsel %vm1208_vm6, %v480_v49, %v728_v38  ;;  %v563_v58 = vsel %vm1199_vm5, %v487_v50, %v730_v42  ;;  %v566_v59 = vsel %vm1208_vm6, %v488_v51, %v732_v43  ;;  %v740_v31 = vld [vmem:[%s1114_s12 + $0x34] sm:$0x1]  ;;  %v742_v42 = vld [vmem:[%s1114_s12 + $0x38] sm:$0xf]  ;;  %v744_v43 = vld [vmem:[%s1114_s12 + $0x3c] sm:$0x1] }
  0x69   : > { %727 = vst [vmem:[%s1114_s12 + $0x18] sm:$0xf] %v557_v56  ;;  %729 = vst [vmem:[%s1114_s12 + $0x1c] sm:$0x1] %v560_v57  ;;  %v392_v63 = vadd.f32 %v384_v54, %v342_v53  ;;  %v776_v4 = vunpack.c.h.bf16 %v779_v25  ;;  %v306_v5 = vunpack.c.h.bf16 %v704_v30  ;;  %v492_v6 = vrot.slane %v490_v61, 7 }
  0x6a   : > { %731 = vst [vmem:[%s1114_s12 + $0x20] sm:$0xf] %v563_v58  ;;  %733 = vst [vmem:[%s1114_s12 + $0x24] sm:$0x1] %v566_v59  ;;  %v307_v11 = vunpack.c.l.bf16 %v707_v60  ;;  %v345_v14 = vsel %vm324_vm2, %v343_v0, %v344_v2  ;;  %v385_v15 = vadd.f32 %v1167_v8, %v370_v3  ;;  %v746_v51 = vld [vmem:[%s1114_s12 + $0x40] sm:$0xf] }
  0x6b   : > { %v400_v9 = vmax.f32 %v392_v63, 0.0  ;;  %v346_v16 = vrot.slane %v306_v5, 1  ;;  %v371_v17 = vmul.f32 %v776_v4, %v1162_v7  ;;  %v495_v18 = vor.u32 %v493_v62, %v492_v6  ;;  %v748_v52 = vld [vmem:[%s1114_s12 + $0x44] sm:$0x1] }
  0x6c   : > { %v496_v19 = vrot.slane %v492_v6, 4  ;;  %v347_v21 = vrot.slane %v307_v11, 1  ;;  %v393_v22 = vadd.f32 %v385_v15, %v345_v14 }
  0x6d   : > { %v758_v20 = vpack.c.bf16 %v400_v9, %v400_v9  ;;  %v386_v23 = vadd.f32 %v1167_v8, %v371_v17  ;;  %v569_v24 = vsel %vm1199_vm5, %v495_v18, %v734_v12  ;;  %v738_v8 = vld [vmem:[%s1114_s12 + $0x30] sm:$0xf] }
  0x6e   : > { %v572_v25 = vsel %vm1208_vm6, %v496_v19, %v736_v13  ;;  %735 = vst [vmem:[%s1114_s12 + $0x28] sm:$0xf] %v569_v24  ;;  %v401_v7 = vmax.f32 %v393_v22, 0.0  ;;  %v348_v28 = vsel %vm324_vm2, %v346_v16, %v347_v21 }
  0x6f   : > { %v498_v26 = vshrl.u32 %v758_v20, 16  ;;  %v501_v27 = vshll.u32 %v758_v20, 16  ;;  %737 = vst [vmem:[%s1114_s12 + $0x2c] sm:$0x1] %v572_v25  ;;  %v394_v30 = vadd.f32 %v386_v23, %v348_v28 }
  0x70   : > { %v759_v32 = vpack.c.bf16 %v401_v7, %v401_v7 }
  0x71   : > { %v500_v29 = vrot.slane %v498_v26, 7  ;;  %v402_v35 = vmax.f32 %v394_v30, 0.0 }
  0x72   : > { %v506_v36 = vshrl.u32 %v759_v32, 16  ;;  %v509_v37 = vshll.u32 %v759_v32, 16 }
  0x73   : > { %v503_v33 = vor.u32 %v501_v27, %v500_v29  ;;  %v504_v34 = vrot.slane %v500_v29, 4  ;;  %v760_v40 = vpack.c.bf16 %v402_v35, %v402_v35 }
  0x74   : > { %v508_v41 = vrot.slane %v506_v36, 7 }
  0x75   : > { %v575_v38 = vsel %vm1199_vm5, %v503_v33, %v738_v8  ;;  %v578_v39 = vsel %vm1208_vm6, %v504_v34, %v740_v31  ;;  %v514_v44 = vshrl.u32 %v760_v40, 16  ;;  %v517_v45 = vshll.u32 %v760_v40, 16 }
  0x76   : > { %739 = vst [vmem:[%s1114_s12 + $0x30] sm:$0xf] %v575_v38  ;;  %741 = vst [vmem:[%s1114_s12 + $0x34] sm:$0x1] %v578_v39  ;;  %v511_v46 = vor.u32 %v509_v37, %v508_v41  ;;  %v512_v47 = vrot.slane %v508_v41, 4 }
  0x77   : > { %v516_v48 = vrot.slane %v514_v44, 7 }
  0x78   : > { %v581_v49 = vsel %vm1199_vm5, %v511_v46, %v742_v42  ;;  %v584_v50 = vsel %vm1208_vm6, %v512_v47, %v744_v43 }
  0x79   : > { %743 = vst [vmem:[%s1114_s12 + $0x38] sm:$0xf] %v581_v49  ;;  %745 = vst [vmem:[%s1114_s12 + $0x3c] sm:$0x1] %v584_v50  ;;  %v519_v53 = vor.u32 %v517_v45, %v516_v48  ;;  %v520_v54 = vrot.slane %v516_v48, 4 }
  0x7b   : > { %v587_v55 = vsel %vm1199_vm5, %v519_v53, %v746_v51  ;;  %v590_v56 = vsel %vm1208_vm6, %v520_v54, %v748_v52 }
  0x7c   : > { %747 = vst [vmem:[%s1114_s12 + $0x40] sm:$0xf] %v587_v55  ;;  %749 = vst [vmem:[%s1114_s12 + $0x44] sm:$0x1] %v590_v56 }
  0x7d PF: > { %p17_p11 = scmp.ge.s32.totalorder %s983_s20, 4   ;;  %s1318_s15 = smov %s921_s16 }
  0x7e   : > { %s1319_s16 = smov %s925_s17  ;;  %s1320_s17 = smov %s993_s23 }
  0x7f   : > { %s1321_s18 = smov %s983_s20  ;;  %19 = sbr.rel (!%p17_p11) target bundleno = 5 (0x5), region = 91 }
  0x86   :  { %613 = vsyncpa [#allocation3], 1 }
  0x87   :  { %615 = vsyncpa [#allocation3 + $0x1], 1 }
  0x88   :  { %616 = vsyncpa [#allocation5], 1 }
  0x89   :  { %618 = vsyncpa [#allocation5 + $0x1], 1 }

</bundles_post_ra>
